<compile_context>
chip_gen: v7x
topology: tpu7x:2x2x1
jax: 0.10.0
libtpu: 0.0.40
codegen_flags: <defaults>
</compile_context>

<pallas_src>
import jax
import jax.numpy as jnp
from jax.experimental import pallas as pl
from jax.experimental.pallas import tpu as pltpu

H1 = 64    # hidden channels of graph-conv layer 1
H2 = 256   # feature channels fed to the 1x1 conv head (nn.Conv2d(256, ...))


def _pick_tiles(n_total, t_total, w_nodes):
    """Sample-block and frame-block sizes satisfying the (8, 128) tiling rule."""
    nb = 8 if n_total % 8 == 0 else n_total
    tb = t_total                                   # fallback: full T (L == T*W)
    for cand in range(1, t_total + 1):
        if t_total % cand == 0 and (cand * w_nodes) % 128 == 0:
            tb = cand
            break
    return nb, tb


# ----------------------------------------------------------------------------
# Pallas kernel: batched GCN feature extraction + global average pool.
#   x block (Nb, C, Tb*W)  ->  accumulated output block (Nb, 1, 256)
# ----------------------------------------------------------------------------
def gcn_extract_pooled(x, bd1, w1t, b1, bd2, w2t, b2, *, t_total, w_nodes,
                       nb, tb):
    n_total, c_in, _ = x.shape
    l = tb * w_nodes                      # lane width of one frame chunk
    h1 = w1t.shape[0]
    h2 = w2t.shape[0]
    inv_total = 1.0 / float(t_total * w_nodes)
    grid = (n_total // nb, t_total // tb)

    def kernel(x_ref, bd1_ref, w1t_ref, b1_ref, bd2_ref, w2t_ref, b2_ref,
               o_ref):
        # Output block is resident across the T-chunk ("arbitrary") grid axis:
        # zero it on the first chunk, accumulate partial pooled sums after.
        @pl.when(pl.program_id(1) == 0)
        def _init():
            o_ref[...] = jnp.zeros_like(o_ref)

        x_blk = x_ref[...]                                      # (Nb, C, L) bf16
        w1b = jnp.broadcast_to(w1t_ref[...], (nb, h1, c_in))    # (Nb, H1, C)
        w2b = jnp.broadcast_to(w2t_ref[...], (nb, h2, h1))      # (Nb, H2, H1)
        bd1b = jnp.broadcast_to(bd1_ref[...], (nb, l, l))       # I_Tb (x) A1^T
        bd2b = jnp.broadcast_to(bd2_ref[...], (nb, l, l))       # I_Tb (x) A2^T

        # ---- layer 1: channel mix (MXU) -> vertex aggregation (MXU) --------
        h = jnp.einsum('nhc,ncl->nhl', w1b, x_blk,
                       preferred_element_type=jnp.float32)      # (Nb, H1, L)
        h = jnp.einsum('nhl,nlk->nhk', h.astype(jnp.bfloat16), bd1b,
                       preferred_element_type=jnp.float32)
        h = jnp.maximum(h + b1_ref[...], 0.0)                   # f32 bias+ReLU

        # ---- layer 2 --------------------------------------------------------
        g = jnp.einsum('neh,nhl->nel', w2b, h.astype(jnp.bfloat16),
                       preferred_element_type=jnp.float32)      # (Nb, H2, L)
        g = jnp.einsum('nel,nlk->nek', g.astype(jnp.bfloat16), bd2b,
                       preferred_element_type=jnp.float32)
        g = jnp.maximum(g + b2_ref[...], 0.0)                   # (Nb, H2, L) f32

        # ---- global average pool over (T, W): ones-row matmul on the MXU ---
        pool = jnp.full((nb, 1, l), inv_total, dtype=jnp.float32)
        o_ref[...] += jnp.einsum('nol,nel->noe', pool, g,
                                 preferred_element_type=jnp.float32)

    return pl.pallas_call(
        kernel,
        out_shape=jax.ShapeDtypeStruct((n_total, 1, h2), jnp.float32),
        grid_spec=pltpu.PrefetchScalarGridSpec(
            num_scalar_prefetch=0,
            grid=grid,
            in_specs=[
                pl.BlockSpec((nb, c_in, l), lambda n, t: (n, 0, t)),
                pl.BlockSpec((l, l), lambda n, t: (0, 0)),
                pl.BlockSpec((h1, c_in), lambda n, t: (0, 0)),
                pl.BlockSpec((1, h1, 1), lambda n, t: (0, 0, 0)),
                pl.BlockSpec((l, l), lambda n, t: (0, 0)),
                pl.BlockSpec((h2, h1), lambda n, t: (0, 0)),
                pl.BlockSpec((1, h2, 1), lambda n, t: (0, 0, 0)),
            ],
            out_specs=pl.BlockSpec((nb, 1, h2), lambda n, t: (n, 0, 0)),
        ),
        compiler_params=pltpu.CompilerParams(
            dimension_semantics=("parallel", "arbitrary"),
            vmem_limit_bytes=32 * 1024 * 1024,
        ),
    )(x, bd1, w1t, b1, bd2, w2t, b2)


# ----------------------------------------------------------------------------
# O3N forward (glue mirroring the PyTorch views; fusion + 1x1 head in JAX).
# input: (B, S, C, T, V, M)  with S == output_size (== self.video_num)
# ----------------------------------------------------------------------------
def o3n_forward(inp, params):
    a1, w1, b1, a2, w2, b2, wf, bfc = params
    B, S, C, T, V, M = inp.shape
    N, W = B * S, V * M
    nb, tb = _pick_tiles(N, T, W)

    # input.view([B*S, C, T, V*M]) -> native layout (N, C, T*W); bf16 HBM side.
    x = inp.reshape(N, C, T * W).astype(jnp.bfloat16)

    # Block-diagonal I_Tb (x) A^T: per-frame vertex aggregation as ONE matmul.
    eye_tb = jnp.eye(tb, dtype=jnp.float32)
    bd1 = jnp.kron(eye_tb, a1.T).astype(jnp.bfloat16)
    bd2 = jnp.kron(eye_tb, a2.T).astype(jnp.bfloat16)

    pooled = gcn_extract_pooled(
        x, bd1, w1.T.astype(jnp.bfloat16), b1.reshape(1, H1, 1),
        bd2, w2.T.astype(jnp.bfloat16), b2.reshape(1, H2, 1),
        t_total=T, w_nodes=W, nb=nb, tb=tb)
    pooled = pooled.reshape(N, H2)                          # (B*S, 256) f32

    # Xs.view(B*S, M, -1).mean(dim=1).view(B, S, -1)
    xs = pooled.reshape(N, M, -1).mean(axis=1).reshape(B, S, -1)

    # Fusion: sum_{j>i} (Xs[j] - Xs[i]) == sum_k (2k - (S-1)) * Xs[k]
    coef = 2.0 * jnp.arange(S, dtype=jnp.float32) - (S - 1)
    fused = jnp.einsum('s,bsc->bc', coef, xs)

    # 1x1-conv head (256 -> output_size): plain JAX (tiny; a second pallas_call
    # cost more in launch + HBM round-trip than its compute).
    out = fused @ wf + bfc
    return out.reshape(B, -1)


# ----------------------------------------------------------------------------
# Pure-JAX reference (same math, same bf16 cast points) for correctness.
# ----------------------------------------------------------------------------
def o3n_reference(inp, params):
    a1, w1, b1, a2, w2, b2, wf, bfc = params
    B, S, C, T, V, M = inp.shape
    N, W = B * S, V * M
    bf16 = jnp.bfloat16

    x = inp.reshape(N, C, T, W).astype(bf16)
    h = jnp.einsum('nctw,hc->nhtw', x, w1.T.astype(bf16),
                   preferred_element_type=jnp.float32)
    h = jnp.einsum('nhtw,vw->nhtv', h.astype(bf16), a1.astype(bf16),
                   preferred_element_type=jnp.float32)
    h = jax.nn.relu(h + b1.reshape(1, H1, 1, 1))
    g = jnp.einsum('nhtw,eh->netw', h.astype(bf16), w2.T.astype(bf16),
                   preferred_element_type=jnp.float32)
    g = jnp.einsum('netw,vw->netv', g.astype(bf16), a2.astype(bf16),
                   preferred_element_type=jnp.float32)
    g = jax.nn.relu(g + b2.reshape(1, H2, 1, 1))
    pooled = jnp.mean(g, axis=(2, 3))                       # (N, 256)

    xs = pooled.reshape(N, M, -1).mean(axis=1).reshape(B, S, -1)
    coef = 2.0 * jnp.arange(S, dtype=jnp.float32) - (S - 1)
    fused = jnp.einsum('s,bsc->bc', coef, xs)
    out = fused @ wf + bfc
    return out.reshape(B, -1)


def make_params(key, C, W, output_size):
    k1, k2, k3, k4, k5 = jax.random.split(key, 5)
    # synthetic normalized adjacency: ring + self loops over W graph nodes
    idx = jnp.arange(W)
    A = jnp.zeros((W, W), jnp.float32)
    A = A.at[idx, idx].set(1.0)
    A = A.at[idx, (idx + 1) % W].set(1.0)
    A = A.at[idx, (idx - 1) % W].set(1.0)
    A = A / A.sum(axis=1, keepdims=True)
    a1 = A * jnp.ones((W, W), jnp.float32)   # edge importance (ones init)
    a2 = A * jnp.ones((W, W), jnp.float32)

    w1 = jax.random.normal(k1, (C, H1), jnp.float32) / jnp.sqrt(C)
    b1 = 0.1 * jax.random.normal(k4, (H1,), jnp.float32)
    w2 = jax.random.normal(k2, (H1, H2), jnp.float32) / jnp.sqrt(H1)
    b2 = 0.1 * jax.random.normal(k5, (H2,), jnp.float32)
    wf = jax.random.normal(k3, (H2, output_size), jnp.float32) / jnp.sqrt(H2)
    bfc = jnp.zeros((output_size,), jnp.float32)
    return (a1, w1, b1, a2, w2, b2, wf, bfc)


if __name__ == "__main__":
    # toy but self-consistent shapes:
    #   B=4 clips, S=output_size=4 segments, C=3 coords, T=16 frames,
    #   V=16 joints, M=1 person (M must be 1 so the 256-ch head is consistent)
    # -> N=16 samples, W=16 nodes; tiles Nb=8, Tb=8 -> grid (2, 2).
    B, S, C, T, V, M = 4, 4, 3, 16, 16, 1
    output_size = S

    key = jax.random.PRNGKey(0)
    k_in, k_par = jax.random.split(key)
    inp = jax.random.normal(k_in, (B, S, C, T, V, M), jnp.float32)
    params = make_params(k_par, C, V * M, output_size)

    out = jax.block_until_ready(o3n_forward(inp, params))
    ref = o3n_reference(inp, params)

    assert out.shape == (B, output_size), out.shape
    assert jnp.allclose(out, ref, atol=1e-2, rtol=1e-2), (out, ref)

    print("KERNEL_OK")
</pallas_src>

<mosaic_0001>
module attributes {stable_mosaic.version = 11 : i64} {
  func.func @kernel(%arg0: i32, %arg1: i32, %arg2: memref<8x3x128xbf16, #tpu.memory_space<vmem>>, %arg3: memref<128x128xbf16, #tpu.memory_space<vmem>>, %arg4: memref<64x3xbf16, #tpu.memory_space<vmem>>, %arg5: memref<1x64x1xf32, #tpu.memory_space<vmem>>, %arg6: memref<128x128xbf16, #tpu.memory_space<vmem>>, %arg7: memref<256x64xbf16, #tpu.memory_space<vmem>>, %arg8: memref<1x256x1xf32, #tpu.memory_space<vmem>>, %arg9: memref<8x1x256xf32, #tpu.memory_space<vmem>>) attributes {dimension_semantics = [#tpu.dimension_semantics<parallel>, #tpu.dimension_semantics<arbitrary>], iteration_bounds = array<i64: 2, 2>, scalar_prefetch = 0 : i64, scratch_operands = 0 : i64, tpu.core_type = #tpu.core_type<tc>, window_params = [{transform_indices = @transform_0, window_bounds = array<i64: 8, 3, 128>}, {pipeline_mode = #tpu.pipeline_mode<synchronous>, transform_indices = @transform_1, window_bounds = array<i64: 128, 128>}, {pipeline_mode = #tpu.pipeline_mode<synchronous>, transform_indices = @transform_2, window_bounds = array<i64: 64, 3>}, {pipeline_mode = #tpu.pipeline_mode<synchronous>, transform_indices = @transform_3, window_bounds = array<i64: 1, 64, 1>}, {pipeline_mode = #tpu.pipeline_mode<synchronous>, transform_indices = @transform_4, window_bounds = array<i64: 128, 128>}, {pipeline_mode = #tpu.pipeline_mode<synchronous>, transform_indices = @transform_5, window_bounds = array<i64: 256, 64>}, {pipeline_mode = #tpu.pipeline_mode<synchronous>, transform_indices = @transform_6, window_bounds = array<i64: 1, 256, 1>}, {transform_indices = @transform_7, window_bounds = array<i64: 8, 1, 256>}]} {
    %c0_i32 = arith.constant 0 : i32
    %0 = arith.cmpi eq, %arg1, %c0_i32 : i32
    %1 = arith.extui %0 : i1 to i32
    %c0_i32_0 = arith.constant 0 : i32
    %2 = arith.cmpi ne, %1, %c0_i32_0 : i32
    scf.if %2 {
      %cst_30 = arith.constant 0.000000e+00 : f32
      %38 = vector.broadcast %cst_30 : f32 to vector<8x1x256xf32>
      %c0_31 = arith.constant 0 : index
      %c0_32 = arith.constant 0 : index
      %c0_33 = arith.constant 0 : index
      %39 = vector.load %arg9[%c0_31, %c0_32, %c0_33] : memref<8x1x256xf32, #tpu.memory_space<vmem>>, vector<8x1x256xf32>
      tpu.vector_store %arg9[%c0_31, %c0_32, %c0_33], %38 {strides = array<i32>} : memref<8x1x256xf32, #tpu.memory_space<vmem>>, vector<8x1x256xf32>,
    } else {
    }
    %c0 = arith.constant 0 : index
    %c0_1 = arith.constant 0 : index
    %c0_2 = arith.constant 0 : index
    %3 = vector.load %arg2[%c0, %c0_1, %c0_2] : memref<8x3x128xbf16, #tpu.memory_space<vmem>>, vector<8x3x128xbf16>
    %c0_3 = arith.constant 0 : index
    %c0_4 = arith.constant 0 : index
    %4 = vector.load %arg4[%c0_3, %c0_4] : memref<64x3xbf16, #tpu.memory_space<vmem>>, vector<64x3xbf16>
    %5 = vector.shape_cast %4 : vector<64x3xbf16> to vector<1x64x3xbf16>
    %6 = vector.broadcast %5 : vector<1x64x3xbf16> to vector<8x64x3xbf16>
    %c0_5 = arith.constant 0 : index
    %c0_6 = arith.constant 0 : index
    %7 = vector.load %arg7[%c0_5, %c0_6] : memref<256x64xbf16, #tpu.memory_space<vmem>>, vector<256x64xbf16>
    %8 = vector.shape_cast %7 : vector<256x64xbf16> to vector<1x256x64xbf16>
    %9 = vector.broadcast %8 : vector<1x256x64xbf16> to vector<8x256x64xbf16>
    %c0_7 = arith.constant 0 : index
    %c0_8 = arith.constant 0 : index
    %10 = vector.load %arg3[%c0_7, %c0_8] : memref<128x128xbf16, #tpu.memory_space<vmem>>, vector<128x128xbf16>
    %11 = vector.shape_cast %10 : vector<128x128xbf16> to vector<1x128x128xbf16>
    %12 = vector.broadcast %11 : vector<1x128x128xbf16> to vector<8x128x128xbf16>
    %c0_9 = arith.constant 0 : index
    %c0_10 = arith.constant 0 : index
    %13 = vector.load %arg6[%c0_9, %c0_10] : memref<128x128xbf16, #tpu.memory_space<vmem>>, vector<128x128xbf16>
    %14 = vector.shape_cast %13 : vector<128x128xbf16> to vector<1x128x128xbf16>
    %15 = vector.broadcast %14 : vector<1x128x128xbf16> to vector<8x128x128xbf16>
    "tpu.trace_start"() <{level = 10 : i32, message = "nhc,ncl->nhl"}> : () -> ()
    %cst = arith.constant dense<0.000000e+00> : vector<8x64x128xf32>
    %16 = tpu.matmul %6, %3, %cst {dimension_numbers = #tpu.dot_dimension_numbers<[2], [1], [1], [2], [0, 0, 0, 1, 1, 2], [0], [0]>} : vector<8x64x3xbf16>, vector<8x3x128xbf16>, vector<8x64x128xf32> -> vector<8x64x128xf32>
    "tpu.trace_stop"() : () -> ()
    %17 = arith.truncf %16 : vector<8x64x128xf32> to vector<8x64x128xbf16>
    "tpu.trace_start"() <{level = 10 : i32, message = "nhl,nlk->nhk"}> : () -> ()
    %cst_11 = arith.constant dense<0.000000e+00> : vector<8x64x128xf32>
    %18 = tpu.matmul %17, %12, %cst_11 {dimension_numbers = #tpu.dot_dimension_numbers<[2], [1], [1], [2], [0, 0, 0, 1, 1, 2], [0], [0]>} : vector<8x64x128xbf16>, vector<8x128x128xbf16>, vector<8x64x128xf32> -> vector<8x64x128xf32>
    "tpu.trace_stop"() : () -> ()
    %c0_12 = arith.constant 0 : index
    %c0_13 = arith.constant 0 : index
    %c0_14 = arith.constant 0 : index
    %19 = vector.load %arg5[%c0_12, %c0_13, %c0_14] : memref<1x64x1xf32, #tpu.memory_space<vmem>>, vector<1x64x1xf32>
    %20 = vector.broadcast %19 : vector<1x64x1xf32> to vector<8x64x128xf32>
    %21 = arith.addf %18, %20 : vector<8x64x128xf32>
    %cst_15 = arith.constant 0.000000e+00 : f32
    %22 = vector.broadcast %cst_15 : f32 to vector<8x64x128xf32>
    %23 = arith.maximumf %21, %22 : vector<8x64x128xf32>
    %24 = arith.truncf %23 : vector<8x64x128xf32> to vector<8x64x128xbf16>
    "tpu.trace_start"() <{level = 10 : i32, message = "neh,nhl->nel"}> : () -> ()
    %cst_16 = arith.constant dense<0.000000e+00> : vector<8x256x128xf32>
    %25 = tpu.matmul %9, %24, %cst_16 {dimension_numbers = #tpu.dot_dimension_numbers<[2], [1], [1], [2], [0, 0, 0, 1, 1, 2], [0], [0]>} : vector<8x256x64xbf16>, vector<8x64x128xbf16>, vector<8x256x128xf32> -> vector<8x256x128xf32>
    "tpu.trace_stop"() : () -> ()
    %26 = arith.truncf %25 : vector<8x256x128xf32> to vector<8x256x128xbf16>
    "tpu.trace_start"() <{level = 10 : i32, message = "nel,nlk->nek"}> : () -> ()
    %cst_17 = arith.constant dense<0.000000e+00> : vector<8x256x128xf32>
    %27 = tpu.matmul %26, %15, %cst_17 {dimension_numbers = #tpu.dot_dimension_numbers<[2], [1], [1], [2], [0, 0, 0, 1, 1, 2], [0], [0]>} : vector<8x256x128xbf16>, vector<8x128x128xbf16>, vector<8x256x128xf32> -> vector<8x256x128xf32>
    "tpu.trace_stop"() : () -> ()
    %c0_18 = arith.constant 0 : index
    %c0_19 = arith.constant 0 : index
    %c0_20 = arith.constant 0 : index
    %28 = vector.load %arg8[%c0_18, %c0_19, %c0_20] : memref<1x256x1xf32, #tpu.memory_space<vmem>>, vector<1x256x1xf32>
    %29 = vector.broadcast %28 : vector<1x256x1xf32> to vector<8x256x128xf32>
    %30 = arith.addf %27, %29 : vector<8x256x128xf32>
    %cst_21 = arith.constant 0.000000e+00 : f32
    %31 = vector.broadcast %cst_21 : f32 to vector<8x256x128xf32>
    %32 = arith.maximumf %30, %31 : vector<8x256x128xf32>
    %cst_22 = arith.constant 3.906250e-03 : f32
    %33 = vector.broadcast %cst_22 : f32 to vector<8x1x128xf32>
    %c0_23 = arith.constant 0 : index
    %c0_24 = arith.constant 0 : index
    %c0_25 = arith.constant 0 : index
    %34 = vector.load %arg9[%c0_23, %c0_24, %c0_25] : memref<8x1x256xf32, #tpu.memory_space<vmem>>, vector<8x1x256xf32>
    "tpu.trace_start"() <{level = 10 : i32, message = "nol,nel->noe"}> : () -> ()
    %cst_26 = arith.constant dense<0.000000e+00> : vector<8x1x256xf32>
    %35 = tpu.matmul %33, %32, %cst_26 {dimension_numbers = #tpu.dot_dimension_numbers<[2], [2], [1], [1], [0, 0, 0, 1, 1, 1], [0], [0]>} : vector<8x1x128xf32>, vector<8x256x128xf32>, vector<8x1x256xf32> -> vector<8x1x256xf32>
    "tpu.trace_stop"() : () -> ()
    %36 = arith.addf %34, %35 : vector<8x1x256xf32>
    %c0_27 = arith.constant 0 : index
    %c0_28 = arith.constant 0 : index
    %c0_29 = arith.constant 0 : index
    %37 = vector.load %arg9[%c0_27, %c0_28, %c0_29] : memref<8x1x256xf32, #tpu.memory_space<vmem>>, vector<8x1x256xf32>
    tpu.vector_store %arg9[%c0_27, %c0_28, %c0_29], %36 {strides = array<i32>} : memref<8x1x256xf32, #tpu.memory_space<vmem>>, vector<8x1x256xf32>,
    return
  }
  func.func @transform_0(%arg0: i32, %arg1: i32) -> (i32, i32, i32) {
    %c0_i32 = arith.constant 0 : i32
    %c0_i32_0 = arith.constant 0 : i32
    return %arg0, %c0_i32, %arg1 : i32, i32, i32
  }
  func.func @transform_1(%arg0: i32, %arg1: i32) -> (i32, i32) {
    %c0_i32 = arith.constant 0 : i32
    %c0_i32_0 = arith.constant 0 : i32
    %c0_i32_1 = arith.constant 0 : i32
    return %c0_i32, %c0_i32_0 : i32, i32
  }
  func.func @transform_2(%arg0: i32, %arg1: i32) -> (i32, i32) {
    %c0_i32 = arith.constant 0 : i32
    %c0_i32_0 = arith.constant 0 : i32
    %c0_i32_1 = arith.constant 0 : i32
    return %c0_i32, %c0_i32_0 : i32, i32
  }
  func.func @transform_3(%arg0: i32, %arg1: i32) -> (i32, i32, i32) {
    %c0_i32 = arith.constant 0 : i32
    %c0_i32_0 = arith.constant 0 : i32
    %c0_i32_1 = arith.constant 0 : i32
    %c0_i32_2 = arith.constant 0 : i32
    return %c0_i32, %c0_i32_0, %c0_i32_1 : i32, i32, i32
  }
  func.func @transform_4(%arg0: i32, %arg1: i32) -> (i32, i32) {
    %c0_i32 = arith.constant 0 : i32
    %c0_i32_0 = arith.constant 0 : i32
    %c0_i32_1 = arith.constant 0 : i32
    return %c0_i32, %c0_i32_0 : i32, i32
  }
  func.func @transform_5(%arg0: i32, %arg1: i32) -> (i32, i32) {
    %c0_i32 = arith.constant 0 : i32
    %c0_i32_0 = arith.constant 0 : i32
    %c0_i32_1 = arith.constant 0 : i32
    return %c0_i32, %c0_i32_0 : i32, i32
  }
  func.func @transform_6(%arg0: i32, %arg1: i32) -> (i32, i32, i32) {
    %c0_i32 = arith.constant 0 : i32
    %c0_i32_0 = arith.constant 0 : i32
    %c0_i32_1 = arith.constant 0 : i32
    %c0_i32_2 = arith.constant 0 : i32
    return %c0_i32, %c0_i32_0, %c0_i32_1 : i32, i32, i32
  }
  func.func @transform_7(%arg0: i32, %arg1: i32) -> (i32, i32, i32) {
    %c0_i32 = arith.constant 0 : i32
    %c0_i32_0 = arith.constant 0 : i32
    %c0_i32_1 = arith.constant 0 : i32
    return %arg0, %c0_i32, %c0_i32_0 : i32, i32, i32
  }
}

</mosaic_0001>

<bundles_post_ra>
// kernel: tpu_custom_call.1
= control target key start
LH: loop header
LB: loop body
LE: loop exit
PB: predicated region body
PF: predicated region fallthrough
CT: control target
= control target key end

     0   :  { %12 = vsyncpa [#allocation4], 0  ;;  %s11448_s0 = inlined_call_operand.vmem [shape: bf16[16,3,256], index: 0, kind: input, shape index: {}]   ;;  %s11449_s1 = inlined_call_operand.vmem [shape: bf16[128,128], index: 1, kind: input, shape index: {}]   ;;  %s11450_s2 = inlined_call_operand.vmem [shape: bf16[64,3], index: 2, kind: input, shape index: {}]   ;;  %s11451_s3 = inlined_call_operand.vmem [shape: f32[1,64,1], index: 3, kind: input, shape index: {}]   ;;  %s11452_s4 = inlined_call_operand.vmem [shape: bf16[128,128], index: 4, kind: input, shape index: {}]   ;;  %s11453_s5 = inlined_call_operand.vmem [shape: bf16[256,64], index: 5, kind: input, shape index: {}]   ;;  %s11454_s6 = inlined_call_operand.vmem [shape: f32[1,256,1], index: 6, kind: input, shape index: {}]   ;;  %s11455_s7 = inlined_call_operand.hbm [shape: f32[16,1,256], index: 7, kind: output, shape index: {}]  }
   0x1   :  { %14 = vsyncpa [#allocation4 + $0x1], 0  ;;  %s8455_s24 = smov 0   ;;  %s8457_s25 = smov 0  }
   0x2   :  { %s8459_s26 = smov 0   ;;  %s8461_s27 = smov 0  }
   0x3   :  { %s8463_s28 = smov 0   ;;  %s8465_s29 = smov 0  }
   0x4   :  { %s8467_s30 = smov 0   ;;  %s8469_s8 = smov 0  }
   0x5   :  { %s8471_s9 = smov 0   ;;  %s8473_s10 = smov 0  }
   0x6 LB: > { %s5952_s11 = sadd.s32 4294967295, %s8405_s10   ;;  %s5953_s12 = sadd.s32 4294967294, %s8405_s10   ;;  %s8405_s10 = sphi %s8473_s10, %s20_s10   ;;  %s8401_s9 = sphi %s8471_s9, %s11685_s9   ;;  %s8397_s8 = sphi %s8469_s8, %s11684_s8   ;;  %s8393_s30 = sphi %s8467_s30, %s11683_s30   ;;  %s8389_s29 = sphi %s8465_s29, %s11682_s29   ;;  %s8385_s28 = sphi %s8463_s28, %s11681_s28   ;;  %s8381_s27 = sphi %s8461_s27, %s11680_s27   ;;  %s8377_s26 = sphi %s8459_s26, %s11679_s26   ;;  %s8373_s25 = sphi %s8457_s25, %s11678_s25   ;;  %s8369_s24 = sphi %s8455_s24, %s11677_s24  }
   0x7   : > { %s29_s13 = sadd.s32 1, %s8397_s8  ;;  %s32_s14 = sadd.s32 1, %s8401_s9 }
   0x8   : > { %p30_p0 = scmp.ge.s32.totalorder %s29_s13, 2  ;;  %s41_s15 = sadd.s32 1, %s8385_s28 }
   0x9   : > { %p48_p1 = scmp.ne.s32.totalorder %s8385_s28, %s8381_s27  ;;  %p49_p2 = scmp.eq.s32.totalorder %s8405_s10, 0 }
   0xa   : > { %s11687_s13 = smov (%p30_p0, %s29_s13), 0  ;;  %s11689_s14 = smov (!%p30_p0, %s32_s14), %s8401_s9 }
   0xb   : > { %11501 = sst [smem:[#allocation6_spill]] %s11687_s13  ;;  %s37_s16 = ssub.s32 %s8397_s8, %s11687_s13 }
   0xc   : > { %p8518_p3 = por %p49_p2, %p48_p1  ;;  %p34_p4 = scmp.ge.s32.totalorder %s11689_s14, 2 }
   0xd   : > { %s193_s18 = sadd.s32 1, %s8377_s26  ;;  %p203_p5 = scmp.ne.s32.totalorder %s8377_s26, %s8373_s25 }
   0xe   : > { %p204_p6 = scmp.eq.s32.totalorder %s5952_s11, 3  ;;  %s11691_s14 = smov (%p34_p4, %s11689_s14), 0 }
   0xf   : > { %11503 = sst [smem:[#allocation7_spill]] %s11691_s14  ;;  %p209_p8 = scmp.ne.s32.totalorder %s8373_s25, %s8369_s24 }
  0x10   : > { %p8527_p7 = por %p204_p6, %p203_p5  ;;  %s36_s20 = ssub.s32 %s8401_s9, %s11691_s14 }
  0x11   : > { %p210_p9 = scmp.eq.s32.totalorder %s5953_s12, 3  ;;  %s38_s21 = sor.u32 %s37_s16, %s36_s20 }
  0x12   : > { %p191_p10 = scmp.eq.s32.totalorder %s36_s20, 0  ;;  %p39_p11 = scmp.eq.s32.totalorder %s38_s21, 0 }
  0x13   : > { %p8535_p12 = por %p210_p9, %p209_p8  ;;  %p5955_p13 = scmp.ge.s32.totalorder %s8405_s10, 4 }
  0x14   : > { %s8540_s23 = scalar_select %p191_p10, %s8377_s26, %s193_s18  }
  0x15   : > { %s11505_s22 = scalar_select %p8535_p12, 1, 0 }
  0x16   : > { %s8543_s11 = scalar_select %p39_p11, %s8385_s28, %s41_s15  }
  0x17   : > { %11506 = sst [smem:[#allocation8_spill]] %s11505_s22  ;;  %244 = sbr.rel (%p5955_p13) target bundleno = 41 (0x29), region = 40 }
  0x1e   : > { %247 = sbr.rel (!%p8518_p3) target bundleno = 41 (0x29), region = 44  ;;  %s249_s12 = sand.u32 (%p8518_p3), 1, %s8385_s28  }
  0x1f   : > { %s6166_s16 = sshll.u32 (%p8518_p3), %s8401_s9, 4  ;;  %s5956_s20 = sshll.u32 (%p8518_p3), %s249_s12, 4 }
  0x20   : > { %s254_s21 = sadd.s32 (%p8518_p3), %s8397_s8, %s6166_s16  ;;  %s251_s15 = scalar_lea.vmem (%p8518_p3), [#allocation2], %s5956_s20 }
  0x21   : > { %s5959_s14 = sshll.u32 (%p8518_p3), %s254_s21, 1 }
  0x22   : > { %s256_s18 = scalar_lea.vmem (%p8518_p3), %s11448_s0, %s5959_s14 }
  0x23   : > { %v272_v0 = vld [vmem:[%s256_s18] sm:$0x3] (%p8518_p3)  ;;  %v274_v1 = vld [vmem:[%s256_s18 + $0x4] sm:$0x3] (%p8518_p3)  ;;  %v276_v2 = vld [vmem:[%s256_s18 + $0x8] sm:$0x3] (%p8518_p3) }
  0x24   : > { %273 = vst [vmem:[%s251_s15] sm:$0x3] (%p8518_p3), %v272_v0  ;;  %275 = vst [vmem:[%s251_s15 + $0x2] sm:$0x3] (%p8518_p3), %v274_v1  ;;  %v278_v3 = vld [vmem:[%s256_s18 + $0xc] sm:$0x3] (%p8518_p3) }
  0x25   : > { %277 = vst [vmem:[%s251_s15 + $0x4] sm:$0x3] %v276_v2  ;;  %v280_v4 = vld [vmem:[%s256_s18 + $0x10] sm:$0x3]  ;;  %v282_v5 = vld [vmem:[%s256_s18 + $0x14] sm:$0x3] }
  0x26   : > { %279 = vst [vmem:[%s251_s15 + $0x6] sm:$0x3] %v278_v3  ;;  %281 = vst [vmem:[%s251_s15 + $0x8] sm:$0x3] %v280_v4  ;;  %v284_v6 = vld [vmem:[%s256_s18 + $0x18] sm:$0x3] }
  0x27   : > { %283 = vst [vmem:[%s251_s15 + $0xa] sm:$0x3] %v282_v5  ;;  %v286_v7 = vld [vmem:[%s256_s18 + $0x1c] sm:$0x3]  ;;  %285 = vst [vmem:[%s251_s15 + $0xc] sm:$0x3] %v284_v6 }
  0x28   : > { %287 = vst [vmem:[%s251_s15 + $0xe] sm:$0x3] %v286_v7 }
  0x29 PF: > { %p5960_p0 = scmp.ge.s32.totalorder %s8405_s10, 1  ;;  %p325_p1 = scmp.lt.s32.totalorder %s8405_s10, 5 }
  0x2b   : > { %p326_p2 = pnand %p5960_p0, %p325_p1 }
  0x2d   : > { %329 = sbr.rel (%p326_p2) target bundleno = 1531 (0x5fb), region = 85 }
  0x34   : > { %s332_s13 = sand.u32 1, %s8381_s27   ;;  %s360_s14 = sand.u32 1, %s8373_s25  }
  0x35   : > { %s5961_s17 = sshll.u32 %s332_s13, 4  ;;  %s5962_s22 = sshll.u32 %s360_s14, 4 }
  0x36   : > { %s8560_s12 = scalar_lea.vmem [#allocation2], %s5961_s17  ;;  %s8562_s16 = scalar_lea.vmem [#allocation3], %s5962_s22 }
  0x37   : > { %p5963_p3 = scmp.ne.s32.totalorder %s8389_s29, 0 }
  0x38   : > { %v370_v8 = vlaneseq (!%p5963_p3)  ;;  %v8407_v9 = vmov (!%p5963_p3), 0.0  }
  0x39   : > { %369 = sbr.rel (%p5963_p3) target bundleno = 64 (0x40), region = 93 }
  0x3a   : > { %vm372_vm0 = vcmp.lt.s32.totalorder (!%p5963_p3), %v370_v8, 256 }
  0x3b   : > { %374 = vst.msk [vmem:[%s8562_s16] sm:$0x3] (!%p5963_p3), %vm372_vm0, %v8407_v9  ;;  %375 = vst.msk [vmem:[%s8562_s16 + $0x2] sm:$0x3] (!%p5963_p3), %vm372_vm0, %v8407_v9 }
  0x3c   : > { %376 = vst.msk [vmem:[%s8562_s16 + $0x4] sm:$0x3] (!%p5963_p3), %vm372_vm0, %v8407_v9  ;;  %377 = vst.msk [vmem:[%s8562_s16 + $0x6] sm:$0x3] (!%p5963_p3), %vm372_vm0, %v8407_v9 }
  0x3d   : > { %378 = vst.msk [vmem:[%s8562_s16 + $0x8] sm:$0x3] (!%p5963_p3), %vm372_vm0, %v8407_v9  ;;  %379 = vst.msk [vmem:[%s8562_s16 + $0xa] sm:$0x3] (!%p5963_p3), %vm372_vm0, %v8407_v9 }
  0x3e   : > { %380 = vst.msk [vmem:[%s8562_s16 + $0xc] sm:$0x3] (!%p5963_p3), %vm372_vm0, %v8407_v9  ;;  %381 = vst.msk [vmem:[%s8562_s16 + $0xe] sm:$0x3] (!%p5963_p3), %vm372_vm0, %v8407_v9 }
  0x40 PF: > { %v382_v10 = vld [vmem:[%s8560_s12] sm:$0x3]  ;;  %vm495_vm1 = vcmask 1040384   ;;  %vm496_vm2 = vcmask 1041408   ;;  %v8408_v12 = vmov 65535   ;;  %vm482_vm3 = vcmask 23552  }
  0x41   : > { %v8577_v11 = vld [vmem:[%s11450_s2] sm:$0xff]   ;;  %v497_v13 = vsel %vm495_vm1, 4294967295, %v8408_v12  ;;  %v8258_v18 = vld [vmem:[%s11450_s2 + $0x8] sm:$0xff]   ;;  %v8259_v21 = vld [vmem:[%s11450_s2 + $0x10] sm:$0xff]   ;;  %v8409_v41 = vmov 0   ;;  %vm1867_vm4 = vcmask 523264  }
  0x42   : > { %v383_v14 = vld [vmem:[%s8560_s12 + $0x2] sm:$0x3]  ;;  %v498_v15 = vsel %vm496_vm2, %v497_v13, 0  ;;  %6931 = vmatprep.mubr.msk.bf16.mxu0 %vm482_vm3, %v8577_v11  ;;  %6941 = vmatprep.mubr.msk.bf16.mxu1 %vm482_vm3, %v8577_v11  ;;  %v384_v19 = vld [vmem:[%s8560_s12 + $0x4] sm:$0x3]  ;;  %v8260_v28 = vld [vmem:[%s11450_s2 + $0x18] sm:$0xff]  }
  0x43   : > { %v500_v16 = vand.u32 %v498_v15, %v382_v10  ;;  %v568_v17 = vand.u32 %v498_v15, %v383_v14  ;;  %v385_v20 = vld [vmem:[%s8560_s12 + $0x6] sm:$0x3]  ;;  %v636_v22 = vand.u32 %v498_v15, %v384_v19  ;;  %v386_v24 = vld [vmem:[%s8560_s12 + $0x8] sm:$0x3]  ;;  %v387_v25 = vld [vmem:[%s8560_s12 + $0xa] sm:$0x3]  ;;  %8255 = vset.pattern.permute.xlu0 %v8409_v41  ;;  %8256 = vset.pattern.permute.xlu1 %v8409_v41 }
  0x44   : > { %v704_v23 = vand.u32 %v498_v15, %v385_v20  ;;  %v772_v26 = vand.u32 %v498_v15, %v386_v24  ;;  %v840_v27 = vand.u32 %v498_v15, %v387_v25  ;;  %v388_v29 = vld [vmem:[%s8560_s12 + $0xc] sm:$0x3]  ;;  %v389_v30 = vld [vmem:[%s8560_s12 + $0xe] sm:$0x3]  ;;  %v8622_v33 = vld [vmem:[%s11449_s1] sm:$0xff]   ;;  %s6168_s13 = sshll.u32 %s8393_s30, 8 }
  0x45   : > { %6929 = vmatprep.subr.bf16.mxu0 %v500_v16  ;;  %6939 = vmatprep.subr.bf16.mxu1 %v568_v17  ;;  %v908_v31 = vand.u32 %v498_v15, %v388_v29  ;;  %v976_v32 = vand.u32 %v498_v15, %v389_v30  ;;  %v8639_v34 = vld [vmem:[%s11449_s1 + $0x8] sm:$0xff]   ;;  %v8652_v35 = vld [vmem:[%s11449_s1 + $0x10] sm:$0xff]   ;;  %v8661_v36 = vld [vmem:[%s11449_s1 + $0x18] sm:$0xff]   ;;  %s5871_s17 = sshll.u32 %s8562_s16, 4  ;;  %s11378_s27 = scalar_lea.hbm %s11455_s7, %s6168_s13  ;;  %s11380_s17 = int_to_ptr.vmem [resolvable:$true] %s5871_s17 }
  0x46   : > { %6930 = vmatpush3.bf16.msra.mxu0 %v500_v16  ;;  %6940 = vmatpush3.bf16.msra.mxu1 %v568_v17  ;;  %v8672_v37 = vld [vmem:[%s11449_s1 + $0x20] sm:$0xff]   ;;  %v8681_v38 = vld [vmem:[%s11449_s1 + $0x28] sm:$0xff]   ;;  %v8690_v39 = vld [vmem:[%s11449_s1 + $0x30] sm:$0xff]   ;;  %s11390_s30 = scalar_lea.sflag [#allocation4], %s360_s14  ;;  %s8295_s29 = scalar_lea.vmem %s11380_s17, 256 }
  0x47   : > { %6949 = vmatprep.subr.bf16.mxu0 %v636_v22  ;;  %6959 = vmatprep.subr.bf16.mxu1 %v704_v23  ;;  %v8701_v40 = vld [vmem:[%s11449_s1 + $0x38] sm:$0xff]   ;;  %v1075_v42 = vld [vmem:[%s11451_s3] sm:$0xff]  ;;  %v1077_v43 = vld [vmem:[%s11451_s3 + $0x10] sm:$0xff]  ;;  %p8296_p4 = scmp.ne.s32.totalorder %s11380_s17, %s8295_s29  ;;  %s8412_s20 = smov [#allocation3]  }
  0x48   : > { %1085 = vperm.xlu0 %8255, %v1075_v42   ;;  %v1076_v44 = vld [vmem:[%s11451_s3 + $0x8] sm:$0xff]  ;;  %1095 = vperm.xlu1 %8256, %v1077_v43   ;;  %v1078_v45 = vld [vmem:[%s11451_s3 + $0x18] sm:$0xff]  ;;  %v1079_v46 = vld [vmem:[%s11451_s3 + $0x20] sm:$0xff]  ;;  %s8299_s21 = sshll.u32 %s8412_s20, 4  ;;  %s8300_s21 = int_to_ptr.vmem [resolvable:$false] %s8299_s21 }
  0x49   : > { %6932 = vmatmul.mubr.msk.bf16.vlgmr.msra.gmra.mrb[0].mxu0 %vm482_vm3, %v8258_v18  ;;  %6942 = vmatmul.mubr.msk.bf16.vlgmr.msra.gmra.mrb[0].mxu1 %vm482_vm3, %v8258_v18  ;;  %v1080_v47 = vld [vmem:[%s11451_s3 + $0x28] sm:$0xff]  ;;  %v1081_v48 = vld [vmem:[%s11451_s3 + $0x30] sm:$0xff]  ;;  %v1082_v49 = vld [vmem:[%s11451_s3 + $0x38] sm:$0xff]  ;;  %p8297_p5 = pnand %p8296_p4, %p8527_p7  ;;  %s8301_s18 = scalar_lea.vmem %s8300_s21, 512 }
  0x4a   : > { %6935 = vmatprep.mubr.msk.bf16.mxu0 %vm482_vm3, %v8259_v21  ;;  %6945 = vmatprep.mubr.msk.bf16.mxu1 %vm482_vm3, %v8259_v21  ;;  %v3348_v50 = vld [vmem:[%s11454_s6 + $0x80] sm:$0xff]  ;;  %v3349_v51 = vld [vmem:[%s11454_s6 + $0x88] sm:$0xff]  ;;  %v3350_v54 = vld [vmem:[%s11454_s6 + $0x90] sm:$0xff]  ;;  %p8302_p8 = scmp.lt.s32.totalorder %s11380_s17, %s8300_s21  ;;  %p8303_p9 = scmp.lt.s32.totalorder %s8301_s18, %s8295_s29 }
  0x4b   : > { %6950 = vmatpush3.bf16.msra.mxu0 %v636_v22  ;;  %6960 = vmatpush3.bf16.msra.mxu1 %v704_v23  ;;  %v3332_v52 = vld [vmem:[%s11454_s6] sm:$0xff]  ;;  %v3333_v53 = vld [vmem:[%s11454_s6 + $0x8] sm:$0xff]  ;;  %v3351_v55 = vld [vmem:[%s11454_s6 + $0x98] sm:$0xff]  ;;  %p8298_p6 = pneg %p8297_p5 }
  0x4c   : > { %6969 = vmatprep.subr.bf16.mxu0 %v772_v26  ;;  %6979 = vmatprep.subr.bf16.mxu1 %v840_v27  ;;  %v3334_v56 = vld [vmem:[%s11454_s6 + $0x10] sm:$0xff]  ;;  %v3335_v57 = vld [vmem:[%s11454_s6 + $0x18] sm:$0xff]  ;;  %v3352_v58 = vld [vmem:[%s11454_s6 + $0xa0] sm:$0xff]  ;;  %p8304_p10 = por %p8303_p9, %p8302_p8 }
  0x4d   : > { %1090 = vperm.xlu0 %8255, %v1076_v44   ;;  %1100 = vperm.xlu1 %8256, %v1078_v45   ;;  %v3353_v59 = vld [vmem:[%s11454_s6 + $0xa8] sm:$0xff]  ;;  %v3336_v60 = vld [vmem:[%s11454_s6 + $0x20] sm:$0xff]  ;;  %v3354_v62 = vld [vmem:[%s11454_s6 + $0xb0] sm:$0xff] }
  0x4e   : > { %v3337_v61 = vld [vmem:[%s11454_s6 + $0x28] sm:$0xff]  ;;  %v3355_v63 = vld [vmem:[%s11454_s6 + $0xb8] sm:$0xff]  ;;  %v3338_v0 = vld [vmem:[%s11454_s6 + $0x30] sm:$0xff]  ;;  %p8305_p11 = pnand %p8304_p10, %p8298_p6 }
  0x4f   : > { %v3339_v1 = vld [vmem:[%s11454_s6 + $0x38] sm:$0xff]  ;;  %v3356_v2 = vld [vmem:[%s11454_s6 + $0xc0] sm:$0xff]  ;;  %v3357_v3 = vld [vmem:[%s11454_s6 + $0xc8] sm:$0xff] }
  0x50   : > { %v3340_v4 = vld [vmem:[%s11454_s6 + $0x40] sm:$0xff]  ;;  %v3341_v5 = vld [vmem:[%s11454_s6 + $0x48] sm:$0xff]  ;;  %v3358_v6 = vld [vmem:[%s11454_s6 + $0xd0] sm:$0xff] }
  0x51   : > { %6936 = vmatmul.mubr.msk.bf16.gmra.mrb[4].mxu0 %vm482_vm3, %v8260_v28  ;;  %6946 = vmatmul.mubr.msk.bf16.gmra.mrb[4].mxu1 %vm482_vm3, %v8260_v28  ;;  %v3359_v7 = vld [vmem:[%s11454_s6 + $0xd8] sm:$0xff]  ;;  %v3342_v8 = vld [vmem:[%s11454_s6 + $0x50] sm:$0xff]  ;;  %v3360_v10 = vld [vmem:[%s11454_s6 + $0xe0] sm:$0xff] }
  0x52   : > { %6951 = vmatprep.mubr.msk.bf16.mxu0 %vm482_vm3, %v8577_v11  ;;  %6961 = vmatprep.mubr.msk.bf16.mxu1 %vm482_vm3, %v8577_v11  ;;  %v3343_v9 = vld [vmem:[%s11454_s6 + $0x58] sm:$0xff]  ;;  %v3344_v12 = vld [vmem:[%s11454_s6 + $0x60] sm:$0xff]  ;;  %v3345_v13 = vld [vmem:[%s11454_s6 + $0x68] sm:$0xff] }
  0x53   : > { %1105 = vperm.xlu0 %8255, %v1079_v46   ;;  %1110 = vperm.xlu1 %8256, %v1080_v47   ;;  %v3362_v14 = vld [vmem:[%s11454_s6 + $0xf0] sm:$0xff]  ;;  %v3363_v15 = vld [vmem:[%s11454_s6 + $0xf8] sm:$0xff] }
  0x54   : > { %v3346_v16 = vld [vmem:[%s11454_s6 + $0x70] sm:$0xff]  ;;  %v3347_v17 = vld [vmem:[%s11454_s6 + $0x78] sm:$0xff] }
  0x57   : > { %1115 = vperm.xlu0 %8255, %v1081_v48   ;;  %1120 = vperm.xlu1 %8256, %v1082_v49  }
  0x59   : > { %6952 = vmatmul.mubr.msk.bf16.vlgmr.msra.gmra.mrb[8].mxu0 %vm482_vm3, %v8258_v18  ;;  %6962 = vmatmul.mubr.msk.bf16.vlgmr.msra.gmra.mrb[8].mxu1 %vm482_vm3, %v8258_v18 }
  0x5a   : > { %6955 = vmatprep.mubr.msk.bf16.mxu0 %vm482_vm3, %v8259_v21  ;;  %6965 = vmatprep.mubr.msk.bf16.mxu1 %vm482_vm3, %v8259_v21 }
  0x5b   : > { %6970 = vmatpush3.bf16.msra.mxu0 %v772_v26  ;;  %6980 = vmatpush3.bf16.msra.mxu1 %v840_v27 }
  0x5c   : > { %6989 = vmatprep.subr.bf16.mxu0 %v908_v31  ;;  %6999 = vmatprep.subr.bf16.mxu1 %v976_v32 }
  0x5d   : > { %3446 = vperm.xlu0 %8255, %v3348_v50   ;;  %3451 = vperm.xlu1 %8256, %v3349_v51  }
  0x61   : > { %6956 = vmatmul.mubr.msk.bf16.gmra.mrb[12].mxu0 %vm482_vm3, %v8260_v28  ;;  %6966 = vmatmul.mubr.msk.bf16.gmra.mrb[12].mxu1 %vm482_vm3, %v8260_v28 }
  0x62   : > { %6971 = vmatprep.mubr.msk.bf16.mxu0 %vm482_vm3, %v8577_v11  ;;  %6981 = vmatprep.mubr.msk.bf16.mxu1 %vm482_vm3, %v8577_v11 }
  0x63   : > { %3366 = vperm.xlu0 %8255, %v3332_v52   ;;  %3371 = vperm.xlu1 %8256, %v3333_v53  }
  0x67   : > { %3456 = vperm.xlu0 %8255, %v3350_v54   ;;  %3461 = vperm.xlu1 %8256, %v3351_v55  }
  0x69   : > { %6972 = vmatmul.mubr.msk.bf16.vlgmr.msra.gmra.mrb[16].mxu0 %vm482_vm3, %v8258_v18  ;;  %6982 = vmatmul.mubr.msk.bf16.vlgmr.msra.gmra.mrb[16].mxu1 %vm482_vm3, %v8258_v18 }
  0x6a   : > { %6975 = vmatprep.mubr.msk.bf16.mxu0 %vm482_vm3, %v8259_v21  ;;  %6985 = vmatprep.mubr.msk.bf16.mxu1 %vm482_vm3, %v8259_v21 }
  0x6b   : > { %6990 = vmatpush3.bf16.msra.mxu0 %v908_v31  ;;  %7000 = vmatpush3.bf16.msra.mxu1 %v976_v32 }
  0x6c   : > { %7009 = vmatprep.subr.bf16.mxu0 %v8622_v33  ;;  %7033 = vmatprep.subr.bf16.mxu1 %v8622_v33 }
  0x6d   : > { %3376 = vperm.xlu0 %8255, %v3334_v56   ;;  %3381 = vperm.xlu1 %8256, %v3335_v57  }
  0x71   : > { %6976 = vmatmul.mubr.msk.bf16.gmra.mrb[20].mxu0 %vm482_vm3, %v8260_v28  ;;  %6986 = vmatmul.mubr.msk.bf16.gmra.mrb[20].mxu1 %vm482_vm3, %v8260_v28 }
  0x72   : > { %6991 = vmatprep.mubr.msk.bf16.mxu0 %vm482_vm3, %v8577_v11  ;;  %7001 = vmatprep.mubr.msk.bf16.mxu1 %vm482_vm3, %v8577_v11  ;;  %v3361_v11 = vld [vmem:[%s11454_s6 + $0xe8] sm:$0xff] }
  0x73   : > { %3466 = vperm.xlu0 %8255, %v3352_v58   ;;  %3471 = vperm.xlu1 %8256, %v3353_v59  }
  0x77   : > { %3386 = vperm.xlu0 %8255, %v3336_v60   ;;  %3391 = vperm.xlu1 %8256, %v3337_v61  }
  0x79   : > { %6992 = vmatmul.mubr.msk.bf16.vlgmr.msra.gmra.mrb[24].mxu0 %vm482_vm3, %v8258_v18  ;;  %7002 = vmatmul.mubr.msk.bf16.vlgmr.msra.gmra.mrb[24].mxu1 %vm482_vm3, %v8258_v18 }
  0x7a   : > { %6995 = vmatprep.mubr.msk.bf16.mxu0 %vm482_vm3, %v8259_v21  ;;  %7005 = vmatprep.mubr.msk.bf16.mxu1 %vm482_vm3, %v8259_v21 }
  0x7b   : > { %7010 = vmatpush3.bf16.msra.mxu0 %v8622_v33  ;;  %7034 = vmatpush3.bf16.msra.mxu1 %v8622_v33 }
  0x7c   : > { %7011 = vmatprep.subr.bf16.mxu0 %v8639_v34  ;;  %7035 = vmatprep.subr.bf16.mxu1 %v8639_v34 }
  0x7d   : > { %3476 = vperm.xlu0 %8255, %v3354_v62   ;;  %3481 = vperm.xlu1 %8256, %v3355_v63  }
  0x7f   : > { %7012 = vmatpush3.bf16.msra.mxu0 %v8639_v34  ;;  %7036 = vmatpush3.bf16.msra.mxu1 %v8639_v34 }
  0x80   : > { %7013 = vmatprep.subr.bf16.mxu0 %v8652_v35  ;;  %7037 = vmatprep.subr.bf16.mxu1 %v8652_v35 }
  0x81   : > { %6996 = vmatmul.mubr.msk.bf16.gmra.mrb[28].mxu0 %vm482_vm3, %v8260_v28  ;;  %7006 = vmatmul.mubr.msk.bf16.gmra.mrb[28].mxu1 %vm482_vm3, %v8260_v28 }
  0x82   : > { %3396 = vperm.xlu0 %8255, %v3338_v0   ;;  %3401 = vperm.xlu1 %8256, %v3339_v1  }
  0x83   : > { %7014 = vmatpush3.bf16.msra.mxu0 %v8652_v35  ;;  %7038 = vmatpush3.bf16.msra.mxu1 %v8652_v35 }
  0x84   : > { %7015 = vmatprep.subr.bf16.mxu0 %v8661_v36  ;;  %7039 = vmatprep.subr.bf16.mxu1 %v8661_v36 }
  0x86   : > { %3486 = vperm.xlu0 %8255, %v3356_v2   ;;  %3491 = vperm.xlu1 %8256, %v3357_v3  }
  0x87   : > { %7016 = vmatpush3.bf16.msra.mxu0 %v8661_v36  ;;  %7040 = vmatpush3.bf16.msra.mxu1 %v8661_v36 }
  0x88   : > { %7017 = vmatprep.subr.bf16.mxu0 %v8672_v37  ;;  %7041 = vmatprep.subr.bf16.mxu1 %v8672_v37 }
  0x8a   : > { %3406 = vperm.xlu0 %8255, %v3340_v4   ;;  %3411 = vperm.xlu1 %8256, %v3341_v5  }
  0x8b   : > { %7018 = vmatpush3.bf16.msra.mxu0 %v8672_v37  ;;  %7042 = vmatpush3.bf16.msra.mxu1 %v8672_v37 }
  0x8c   : > { %7019 = vmatprep.subr.bf16.mxu0 %v8681_v38  ;;  %7043 = vmatprep.subr.bf16.mxu1 %v8681_v38 }
  0x8e   : > { %3496 = vperm.xlu0 %8255, %v3358_v6   ;;  %3501 = vperm.xlu1 %8256, %v3359_v7  }
  0x8f   : > { %7020 = vmatpush3.bf16.msra.mxu0 %v8681_v38  ;;  %7044 = vmatpush3.bf16.msra.mxu1 %v8681_v38 }
  0x90   : > { %7021 = vmatprep.subr.bf16.mxu0 %v8690_v39  ;;  %7045 = vmatprep.subr.bf16.mxu1 %v8690_v39 }
  0x92   : > { %3416 = vperm.xlu0 %8255, %v3342_v8   ;;  %3421 = vperm.xlu1 %8256, %v3343_v9  }
  0x93   : > { %7022 = vmatpush3.bf16.msra.mxu0 %v8690_v39  ;;  %7046 = vmatpush3.bf16.msra.mxu1 %v8690_v39 }
  0x94   : > { %7023 = vmatprep.subr.bf16.mxu0 %v8701_v40  ;;  %7047 = vmatprep.subr.bf16.mxu1 %v8701_v40 }
  0x96   : > { %3506 = vperm.xlu0 %8255, %v3360_v10   ;;  %3511 = vperm.xlu1 %8256, %v3361_v11  }
  0x97   : > { %7024 = vmatpush3.bf16.msra.mxu0 %v8701_v40  ;;  %7048 = vmatpush3.bf16.msra.mxu1 %v8701_v40 }
  0x98   : > { %7057 = vmatprep.subr.bf16.mxu0 %v8622_v33  ;;  %7081 = vmatprep.subr.bf16.mxu1 %v8622_v33 }
  0x9a   : > { %3426 = vperm.xlu0 %8255, %v3344_v12   ;;  %3431 = vperm.xlu1 %8256, %v3345_v13  }
  0x9e   : > { %3516 = vperm.xlu0 %8255, %v3362_v14   ;;  %3521 = vperm.xlu1 %8256, %v3363_v15  }
  0xa2   : > { %3436 = vperm.xlu0 %8255, %v3346_v16   ;;  %3441 = vperm.xlu1 %8256, %v3347_v17  }
 0x11c   : > { %v6933_v18 = vpop.f32.mrb[0].mxu0  ;;  %v6943_v19 = vpop.f32.mrb[0].mxu1 }
 0x11d   : > { %v536_v20 = vpop.f32.mrb[1].mxu0  ;;  %v604_v21 = vpop.f32.mrb[1].mxu1 }
 0x11e   : > { %v6934_v22 = vpop.f32.mrb[2].mxu0  ;;  %v6944_v23 = vpop.f32.mrb[2].mxu1 }
 0x11f   : > { %v1044_v24 = vpack.c.bf16 %v6934_v22, %v6933_v18  ;;  %v1048_v25 = vpack.c.bf16 %v6944_v23, %v6943_v19  ;;  %v539_v26 = vpop.f32.mrb[3].mxu0  ;;  %v607_v27 = vpop.f32.mrb[3].mxu1 }
 0x120   : > { %v1043_v28 = vpack.c.bf16 %v539_v26, %v536_v20  ;;  %v1047_v29 = vpack.c.bf16 %v607_v27, %v604_v21 }
 0x122   : > { %7025 = vmatprep.mubr.bf16.mxu0 %v1043_v28  ;;  %7049 = vmatprep.mubr.bf16.mxu1 %v1047_v29 }
 0x123   : > { %7026 = vmatmul.mubr.bf16.vlgmr.msra.gmra.mrb[32].mxu0 %v1044_v24  ;;  %7050 = vmatmul.mubr.bf16.vlgmr.msra.gmra.mrb[32].mxu1 %v1048_v25 }
 0x124   : > { %7058 = vmatpush3.bf16.msra.mxu0 %v8622_v33  ;;  %7082 = vmatpush3.bf16.msra.mxu1 %v8622_v33  ;;  %v6937_v30 = vpop.f32.mrb[4].mxu0  ;;  %v6947_v31 = vpop.f32.mrb[4].mxu1 }
 0x125   : > { %v552_v32 = vpop.f32.mrb[5].mxu0  ;;  %v620_v41 = vpop.f32.mrb[5].mxu1  ;;  %7059 = vmatprep.subr.bf16.mxu0 %v8639_v34  ;;  %7083 = vmatprep.subr.bf16.mxu1 %v8639_v34 }
 0x126   : > { %v6938_v42 = vpop.f32.mrb[6].mxu0  ;;  %v6948_v43 = vpop.f32.mrb[6].mxu1 }
 0x127   : > { %v1046_v44 = vpack.c.bf16 %v6938_v42, %v6937_v30  ;;  %v1050_v45 = vpack.c.bf16 %v6948_v43, %v6947_v31  ;;  %v555_v46 = vpop.f32.mrb[7].mxu0  ;;  %v623_v47 = vpop.f32.mrb[7].mxu1 }
 0x128   : > { %v1045_v48 = vpack.c.bf16 %v555_v46, %v552_v32  ;;  %v1049_v49 = vpack.c.bf16 %v623_v47, %v620_v41  ;;  %7060 = vmatpush3.bf16.msra.mxu0 %v8639_v34  ;;  %7084 = vmatpush3.bf16.msra.mxu1 %v8639_v34 }
 0x129   : > { %7061 = vmatprep.subr.bf16.mxu0 %v8652_v35  ;;  %7085 = vmatprep.subr.bf16.mxu1 %v8652_v35 }
 0x12a   : > { %7029 = vmatprep.mubr.bf16.mxu0 %v1045_v48  ;;  %7053 = vmatprep.mubr.bf16.mxu1 %v1049_v49 }
 0x12b   : > { %7030 = vmatmul.mubr.bf16.gmra.mrb[36].mxu0 %v1046_v44  ;;  %7054 = vmatmul.mubr.bf16.gmra.mrb[36].mxu1 %v1050_v45 }
 0x12c   : > { %7062 = vmatpush3.bf16.msra.mxu0 %v8652_v35  ;;  %7086 = vmatpush3.bf16.msra.mxu1 %v8652_v35  ;;  %v6953_v50 = vpop.f32.mrb[8].mxu0  ;;  %v6963_v51 = vpop.f32.mrb[8].mxu1 }
 0x12d   : > { %7063 = vmatprep.subr.bf16.mxu0 %v8661_v36  ;;  %7087 = vmatprep.subr.bf16.mxu1 %v8661_v36  ;;  %v672_v52 = vpop.f32.mrb[9].mxu0  ;;  %v740_v53 = vpop.f32.mrb[9].mxu1 }
 0x12e   : > { %v6954_v54 = vpop.f32.mrb[10].mxu0  ;;  %v6964_v55 = vpop.f32.mrb[10].mxu1 }
 0x12f   : > { %v1052_v56 = vpack.c.bf16 %v6954_v54, %v6953_v50  ;;  %v1056_v57 = vpack.c.bf16 %v6964_v55, %v6963_v51  ;;  %v675_v58 = vpop.f32.mrb[11].mxu0  ;;  %v743_v59 = vpop.f32.mrb[11].mxu1 }
 0x130   : > { %7064 = vmatpush3.bf16.msra.mxu0 %v8661_v36  ;;  %7088 = vmatpush3.bf16.msra.mxu1 %v8661_v36  ;;  %v1051_v60 = vpack.c.bf16 %v675_v58, %v672_v52  ;;  %v1055_v61 = vpack.c.bf16 %v743_v59, %v740_v53 }
 0x131   : > { %7065 = vmatprep.subr.bf16.mxu0 %v8672_v37  ;;  %7089 = vmatprep.subr.bf16.mxu1 %v8672_v37 }
 0x132   : > { %7073 = vmatprep.mubr.bf16.mxu0 %v1051_v60  ;;  %7097 = vmatprep.mubr.bf16.mxu1 %v1055_v61 }
 0x134   : > { %7066 = vmatpush3.bf16.msra.mxu0 %v8672_v37  ;;  %7090 = vmatpush3.bf16.msra.mxu1 %v8672_v37  ;;  %v6957_v62 = vpop.f32.mrb[12].mxu0  ;;  %v6967_v63 = vpop.f32.mrb[12].mxu1 }
 0x135   : > { %7067 = vmatprep.subr.bf16.mxu0 %v8681_v38  ;;  %7091 = vmatprep.subr.bf16.mxu1 %v8681_v38  ;;  %v688_v0 = vpop.f32.mrb[13].mxu0  ;;  %v756_v1 = vpop.f32.mrb[13].mxu1 }
 0x136   : > { %v6958_v2 = vpop.f32.mrb[14].mxu0  ;;  %v6968_v3 = vpop.f32.mrb[14].mxu1 }
 0x137   : > { %v1054_v4 = vpack.c.bf16 %v6958_v2, %v6957_v62  ;;  %v1058_v5 = vpack.c.bf16 %v6968_v3, %v6967_v63  ;;  %v691_v6 = vpop.f32.mrb[15].mxu0  ;;  %v759_v7 = vpop.f32.mrb[15].mxu1 }
 0x138   : > { %7068 = vmatpush3.bf16.msra.mxu0 %v8681_v38  ;;  %7092 = vmatpush3.bf16.msra.mxu1 %v8681_v38  ;;  %v1053_v8 = vpack.c.bf16 %v691_v6, %v688_v0  ;;  %v1057_v9 = vpack.c.bf16 %v759_v7, %v756_v1 }
 0x139   : > { %7069 = vmatprep.subr.bf16.mxu0 %v8690_v39  ;;  %7093 = vmatprep.subr.bf16.mxu1 %v8690_v39 }
 0x13c   : > { %7070 = vmatpush3.bf16.msra.mxu0 %v8690_v39  ;;  %7094 = vmatpush3.bf16.msra.mxu1 %v8690_v39  ;;  %v8855_v10 = vpop.f32.mrb[16].mxu0  ;;  %v8857_v11 = vpop.f32.mrb[16].mxu1 }
 0x13d   : > { %7071 = vmatprep.subr.bf16.mxu0 %v8701_v40  ;;  %7095 = vmatprep.subr.bf16.mxu1 %v8701_v40  ;;  %v808_v12 = vpop.f32.mrb[17].mxu0  ;;  %v876_v13 = vpop.f32.mrb[17].mxu1 }
 0x13e   : > { %v8861_v14 = vpop.f32.mrb[18].mxu0  ;;  %v8863_v15 = vpop.f32.mrb[18].mxu1 }
 0x13f   : > { %v1060_v16 = vpack.c.bf16 %v8861_v14, %v8855_v10  ;;  %v1064_v17 = vpack.c.bf16 %v8863_v15, %v8857_v11  ;;  %v811_v18 = vpop.f32.mrb[19].mxu0  ;;  %v879_v19 = vpop.f32.mrb[19].mxu1 }
 0x140   : > { %7072 = vmatpush3.bf16.msra.mxu0 %v8701_v40  ;;  %7096 = vmatpush3.bf16.msra.mxu1 %v8701_v40  ;;  %v1059_v20 = vpack.c.bf16 %v811_v18, %v808_v12  ;;  %v1063_v21 = vpack.c.bf16 %v879_v19, %v876_v13 }
 0x141   : > { %7105 = vmatprep.subr.bf16.mxu0 %v8622_v33  ;;  %7129 = vmatprep.subr.bf16.mxu1 %v8622_v33 }
 0x143   : > { %7074 = vmatmul.mubr.bf16.vlgmr.msra.gmra.mrb[40].mxu0 %v1052_v56  ;;  %7098 = vmatmul.mubr.bf16.vlgmr.msra.gmra.mrb[40].mxu1 %v1056_v57 }
 0x144   : > { %7106 = vmatpush3.bf16.msra.mxu0 %v8622_v33  ;;  %7130 = vmatpush3.bf16.msra.mxu1 %v8622_v33  ;;  %v8875_v22 = vpop.f32.mrb[20].mxu0  ;;  %v8877_v23 = vpop.f32.mrb[20].mxu1 }
 0x145   : > { %7107 = vmatprep.subr.bf16.mxu0 %v8639_v34  ;;  %7131 = vmatprep.subr.bf16.mxu1 %v8639_v34  ;;  %v8881_v24 = vpop.f32.mrb[21].mxu0  ;;  %v8883_v25 = vpop.f32.mrb[21].mxu1 }
 0x146   : > { %7077 = vmatprep.mubr.bf16.mxu0 %v1053_v8  ;;  %7101 = vmatprep.mubr.bf16.mxu1 %v1057_v9  ;;  %v8885_v26 = vpop.f32.mrb[22].mxu0  ;;  %v8887_v27 = vpop.f32.mrb[22].mxu1 }
 0x147   : > { %v1062_v28 = vpack.c.bf16 %v8885_v26, %v8875_v22  ;;  %v1066_v29 = vpack.c.bf16 %v8887_v27, %v8877_v23  ;;  %v8893_v30 = vpop.f32.mrb[23].mxu0  ;;  %v8895_v31 = vpop.f32.mrb[23].mxu1 }
 0x148   : > { %7108 = vmatpush3.bf16.msra.mxu0 %v8639_v34  ;;  %7132 = vmatpush3.bf16.msra.mxu1 %v8639_v34  ;;  %v1061_v32 = vpack.c.bf16 %v8893_v30, %v8881_v24  ;;  %v1065_v41 = vpack.c.bf16 %v8895_v31, %v8883_v25 }
 0x149   : > { %7109 = vmatprep.subr.bf16.mxu0 %v8652_v35  ;;  %7133 = vmatprep.subr.bf16.mxu1 %v8652_v35 }
 0x14b   : > { %7078 = vmatmul.mubr.bf16.gmra.mrb[44].mxu0 %v1054_v4  ;;  %7102 = vmatmul.mubr.bf16.gmra.mrb[44].mxu1 %v1058_v5 }
 0x14c   : > { %7110 = vmatpush3.bf16.msra.mxu0 %v8652_v35  ;;  %7134 = vmatpush3.bf16.msra.mxu1 %v8652_v35  ;;  %v8907_v42 = vpop.f32.mrb[24].mxu0  ;;  %v8909_v43 = vpop.f32.mrb[24].mxu1 }
 0x14d   : > { %7111 = vmatprep.subr.bf16.mxu0 %v8661_v36  ;;  %7135 = vmatprep.subr.bf16.mxu1 %v8661_v36  ;;  %v944_v44 = vpop.f32.mrb[25].mxu0  ;;  %v1012_v45 = vpop.f32.mrb[25].mxu1 }
 0x14e   : > { %7121 = vmatprep.mubr.bf16.mxu0 %v1059_v20  ;;  %7145 = vmatprep.mubr.bf16.mxu1 %v1063_v21  ;;  %v8913_v46 = vpop.f32.mrb[26].mxu0  ;;  %v8915_v47 = vpop.f32.mrb[26].mxu1 }
 0x14f   : > { %v1068_v48 = vpack.c.bf16 %v8913_v46, %v8907_v42  ;;  %v1072_v49 = vpack.c.bf16 %v8915_v47, %v8909_v43  ;;  %v947_v50 = vpop.f32.mrb[27].mxu0  ;;  %v1015_v51 = vpop.f32.mrb[27].mxu1 }
 0x150   : > { %7112 = vmatpush3.bf16.msra.mxu0 %v8661_v36  ;;  %7136 = vmatpush3.bf16.msra.mxu1 %v8661_v36  ;;  %v1067_v52 = vpack.c.bf16 %v947_v50, %v944_v44  ;;  %v1071_v53 = vpack.c.bf16 %v1015_v51, %v1012_v45 }
 0x151   : > { %7113 = vmatprep.subr.bf16.mxu0 %v8672_v37  ;;  %7137 = vmatprep.subr.bf16.mxu1 %v8672_v37 }
 0x154   : > { %7114 = vmatpush3.bf16.msra.mxu0 %v8672_v37  ;;  %7138 = vmatpush3.bf16.msra.mxu1 %v8672_v37  ;;  %v8927_v54 = vpop.f32.mrb[28].mxu0  ;;  %v8929_v55 = vpop.f32.mrb[28].mxu1 }
 0x155   : > { %7115 = vmatprep.subr.bf16.mxu0 %v8681_v38  ;;  %7139 = vmatprep.subr.bf16.mxu1 %v8681_v38  ;;  %v960_v56 = vpop.f32.mrb[29].mxu0  ;;  %v1028_v57 = vpop.f32.mrb[29].mxu1 }
 0x156   : > { %v6998_v58 = vpop.f32.mrb[30].mxu0  ;;  %v7008_v59 = vpop.f32.mrb[30].mxu1 }
 0x157   : > { %v1070_v60 = vpack.c.bf16 %v6998_v58, %v8927_v54  ;;  %v1074_v61 = vpack.c.bf16 %v7008_v59, %v8929_v55  ;;  %v963_v62 = vpop.f32.mrb[31].mxu0  ;;  %v1031_v63 = vpop.f32.mrb[31].mxu1 }
 0x158   : > { %7116 = vmatpush3.bf16.msra.mxu0 %v8681_v38  ;;  %7140 = vmatpush3.bf16.msra.mxu1 %v8681_v38  ;;  %v1069_v0 = vpack.c.bf16 %v963_v62, %v960_v56  ;;  %v1073_v1 = vpack.c.bf16 %v1031_v63, %v1028_v57 }
 0x159   : > { %7117 = vmatprep.subr.bf16.mxu0 %v8690_v39  ;;  %7141 = vmatprep.subr.bf16.mxu1 %v8690_v39 }
 0x15c   : > { %7118 = vmatpush3.bf16.msra.mxu0 %v8690_v39  ;;  %7142 = vmatpush3.bf16.msra.mxu1 %v8690_v39 }
 0x15d   : > { %7119 = vmatprep.subr.bf16.mxu0 %v8701_v40  ;;  %7143 = vmatprep.subr.bf16.mxu1 %v8701_v40 }
 0x160   : > { %7120 = vmatpush3.bf16.msra.mxu0 %v8701_v40  ;;  %7144 = vmatpush3.bf16.msra.mxu1 %v8701_v40 }
 0x161   : > { %7153 = vmatprep.subr.bf16.mxu0 %v8622_v33  ;;  %7177 = vmatprep.subr.bf16.mxu1 %v8622_v33 }
 0x163   : > { %7122 = vmatmul.mubr.bf16.vlgmr.msra.gmra.mrb[48].mxu0 %v1060_v16  ;;  %7146 = vmatmul.mubr.bf16.vlgmr.msra.gmra.mrb[48].mxu1 %v1064_v17 }
 0x164   : > { %7154 = vmatpush3.bf16.msra.mxu0 %v8622_v33  ;;  %7178 = vmatpush3.bf16.msra.mxu1 %v8622_v33  ;;  %v8998_v33 = vld [vmem:[%s11453_s5] sm:$0xff]  }
 0x165   : > { %7155 = vmatprep.subr.bf16.mxu0 %v8639_v34  ;;  %7179 = vmatprep.subr.bf16.mxu1 %v8639_v34 }
 0x166   : > { %7125 = vmatprep.mubr.bf16.mxu0 %v1061_v32  ;;  %7149 = vmatprep.mubr.bf16.mxu1 %v1065_v41 }
 0x168   : > { %7156 = vmatpush3.bf16.msra.mxu0 %v8639_v34  ;;  %7180 = vmatpush3.bf16.msra.mxu1 %v8639_v34  ;;  %v9004_v34 = vpop.permute.xlu0 %1085 }
 0x169   : > { %7157 = vmatprep.subr.bf16.mxu0 %v8652_v35  ;;  %7181 = vmatprep.subr.bf16.mxu1 %v8652_v35 }
 0x16b   : > { %7126 = vmatmul.mubr.bf16.gmra.mrb[52].mxu0 %v1062_v28  ;;  %7150 = vmatmul.mubr.bf16.gmra.mrb[52].mxu1 %v1066_v29 }
 0x16c   : > { %7158 = vmatpush3.bf16.msra.mxu0 %v8652_v35  ;;  %7182 = vmatpush3.bf16.msra.mxu1 %v8652_v35  ;;  %v9006_v35 = vpop.permute.xlu1 %1095 }
 0x16d   : > { %7159 = vmatprep.subr.bf16.mxu0 %v8661_v36  ;;  %7183 = vmatprep.subr.bf16.mxu1 %v8661_v36 }
 0x16e   : > { %7169 = vmatprep.mubr.bf16.mxu0 %v1067_v52  ;;  %7193 = vmatprep.mubr.bf16.mxu1 %v1071_v53 }
 0x170   : > { %7160 = vmatpush3.bf16.msra.mxu0 %v8661_v36  ;;  %7184 = vmatpush3.bf16.msra.mxu1 %v8661_v36  ;;  %v9008_v36 = vpop.permute.xlu0 %1090 }
 0x171   : > { %7161 = vmatprep.subr.bf16.mxu0 %v8672_v37  ;;  %7185 = vmatprep.subr.bf16.mxu1 %v8672_v37 }
 0x174   : > { %7162 = vmatpush3.bf16.msra.mxu0 %v8672_v37  ;;  %7186 = vmatpush3.bf16.msra.mxu1 %v8672_v37  ;;  %v9010_v37 = vpop.permute.xlu1 %1100 }
 0x175   : > { %7163 = vmatprep.subr.bf16.mxu0 %v8681_v38  ;;  %7187 = vmatprep.subr.bf16.mxu1 %v8681_v38 }
 0x178   : > { %7164 = vmatpush3.bf16.msra.mxu0 %v8681_v38  ;;  %7188 = vmatpush3.bf16.msra.mxu1 %v8681_v38  ;;  %v9012_v38 = vpop.permute.xlu0 %1105 }
 0x179   : > { %7165 = vmatprep.subr.bf16.mxu0 %v8690_v39  ;;  %7189 = vmatprep.subr.bf16.mxu1 %v8690_v39 }
 0x17c   : > { %7166 = vmatpush3.bf16.msra.mxu0 %v8690_v39  ;;  %7190 = vmatpush3.bf16.msra.mxu1 %v8690_v39  ;;  %v9014_v39 = vpop.permute.xlu1 %1110  ;;  %v9024_v25 = vpop.permute.xlu0 %1115 }
 0x17d   : > { %7167 = vmatprep.subr.bf16.mxu0 %v8701_v40  ;;  %7191 = vmatprep.subr.bf16.mxu1 %v8701_v40 }
 0x180   : > { %7168 = vmatpush3.bf16.msra.mxu0 %v8701_v40  ;;  %7192 = vmatpush3.bf16.msra.mxu1 %v8701_v40  ;;  %v9026_v26 = vpop.permute.xlu1 %1120 }
 0x183   : > { %7170 = vmatmul.mubr.bf16.vlgmr.msra.gmra.mrb[56].mxu0 %v1068_v48  ;;  %7194 = vmatmul.mubr.bf16.vlgmr.msra.gmra.mrb[56].mxu1 %v1072_v49 }
 0x184   : > { %7173 = vmatprep.mubr.bf16.mxu0 %v1069_v0  ;;  %7197 = vmatprep.mubr.bf16.mxu1 %v1073_v1 }
 0x18b   : > { %7174 = vmatmul.mubr.bf16.gmra.mrb[60].mxu0 %v1070_v60  ;;  %7198 = vmatmul.mubr.bf16.gmra.mrb[60].mxu1 %v1074_v61 }
 0x18c   : > { %7209 = vmatprep.mubr.msk.bf16.mxu0 %vm1867_vm4, %v8998_v33  ;;  %7249 = vmatprep.mubr.msk.bf16.mxu1 %vm1867_vm4, %v8998_v33 }
 0x1f6   : > { %v7027_v40 = vpop.f32.mrb[32].mxu0  ;;  %v7051_v2 = vpop.f32.mrb[32].mxu1 }
 0x1f7   : > { %v1214_v3 = vadd.f32 %v7027_v40, %v9006_v35  ;;  %v1279_v4 = vadd.f32 %v7051_v2, %v9006_v35  ;;  %v1205_v5 = vpop.f32.mrb[33].mxu0  ;;  %v1270_v6 = vpop.f32.mrb[33].mxu1  ;;  %v9039_v2 = vld [vmem:[%s11453_s5 + $0x8] sm:$0xff]  }
 0x1f8   : > { %v1206_v7 = vadd.f32 %v1205_v5, %v9004_v34  ;;  %v1271_v8 = vadd.f32 %v1270_v6, %v9004_v34  ;;  %v7028_v9 = vpop.f32.mrb[34].mxu0  ;;  %v7052_v10 = vpop.f32.mrb[34].mxu1  ;;  %v9062_v5 = vld [vmem:[%s11453_s5 + $0x20] sm:$0xff]  }
 0x1f9   : > { %v1217_v11 = vadd.f32 %v7028_v9, %v9010_v37  ;;  %v1282_v12 = vadd.f32 %v7052_v10, %v9010_v37  ;;  %v1208_v13 = vpop.f32.mrb[35].mxu0  ;;  %v1273_v14 = vpop.f32.mrb[35].mxu1  ;;  %v1693_v17 = vmax.f32 %v1214_v3, 0.0  ;;  %v1701_v18 = vmax.f32 %v1279_v4, 0.0  ;;  %v9044_v3 = vld [vmem:[%s11453_s5 + $0x10] sm:$0xff]   ;;  %v9057_v4 = vld [vmem:[%s11453_s5 + $0x18] sm:$0xff]  }
 0x1fa   : > { %v1209_v15 = vadd.f32 %v1208_v13, %v9008_v36  ;;  %v1274_v16 = vadd.f32 %v1273_v14, %v9008_v36  ;;  %v1691_v21 = vmax.f32 %v1206_v7, 0.0  ;;  %v1699_v22 = vmax.f32 %v1271_v8, 0.0 }
 0x1fb   : > { %v1694_v19 = vmax.f32 %v1217_v11, 0.0  ;;  %v1702_v20 = vmax.f32 %v1282_v12, 0.0 }
 0x1fc   : > { %v1692_v23 = vmax.f32 %v1209_v15, 0.0  ;;  %v1700_v24 = vmax.f32 %v1274_v16, 0.0 }
 0x1fd   : > { %v1756_v27 = vpack.c.bf16 %v1694_v19, %v1693_v17  ;;  %v1760_v28 = vpack.c.bf16 %v1702_v20, %v1701_v18 }
 0x1fe   : > { %v7031_v29 = vpop.f32.mrb[36].mxu0  ;;  %v7055_v30 = vpop.f32.mrb[36].mxu1  ;;  %v1755_v31 = vpack.c.bf16 %v1692_v23, %v1691_v21  ;;  %v1759_v32 = vpack.c.bf16 %v1700_v24, %v1699_v22 }
 0x1ff   : > { %v1230_v41 = vadd.f32 %v7031_v29, %v9024_v25  ;;  %v1295_v42 = vadd.f32 %v7055_v30, %v9024_v25  ;;  %v1221_v43 = vpop.f32.mrb[37].mxu0  ;;  %v1286_v44 = vpop.f32.mrb[37].mxu1 }
 0x200   : > { %v1222_v45 = vadd.f32 %v1221_v43, %v9012_v38  ;;  %v1287_v46 = vadd.f32 %v1286_v44, %v9012_v38  ;;  %v7032_v47 = vpop.f32.mrb[38].mxu0  ;;  %v7056_v48 = vpop.f32.mrb[38].mxu1  ;;  %7201 = vmatprep.subr.bf16.mxu0 %v1755_v31  ;;  %7241 = vmatprep.subr.bf16.mxu1 %v1759_v32 }
 0x201   : > { %v1233_v49 = vadd.f32 %v7032_v47, %v9026_v26  ;;  %v1298_v50 = vadd.f32 %v7056_v48, %v9026_v26  ;;  %v1224_v51 = vpop.f32.mrb[39].mxu0  ;;  %v1289_v52 = vpop.f32.mrb[39].mxu1  ;;  %7202 = vmatpush3.bf16.msra.mxu0 %v1755_v31  ;;  %7242 = vmatpush3.bf16.msra.mxu1 %v1759_v32  ;;  %v1697_v55 = vmax.f32 %v1230_v41, 0.0  ;;  %v1705_v56 = vmax.f32 %v1295_v42, 0.0  ;;  %v9083_v32 = vld [vmem:[%s11453_s5 + $0x28] sm:$0xff]  }
 0x202   : > { %v1225_v53 = vadd.f32 %v1224_v51, %v9014_v39  ;;  %v1290_v54 = vadd.f32 %v1289_v52, %v9014_v39  ;;  %7203 = vmatprep.subr.bf16.mxu0 %v1756_v27  ;;  %7243 = vmatprep.subr.bf16.mxu1 %v1760_v28  ;;  %v1695_v59 = vmax.f32 %v1222_v45, 0.0  ;;  %v1703_v60 = vmax.f32 %v1287_v46, 0.0 }
 0x203   : > { %v1698_v57 = vmax.f32 %v1233_v49, 0.0  ;;  %v1706_v58 = vmax.f32 %v1298_v50, 0.0 }
 0x204   : > { %v1696_v61 = vmax.f32 %v1225_v53, 0.0  ;;  %v1704_v62 = vmax.f32 %v1290_v54, 0.0 }
 0x205   : > { %7204 = vmatpush3.bf16.msra.mxu0 %v1756_v27  ;;  %7244 = vmatpush3.bf16.msra.mxu1 %v1760_v28  ;;  %v1758_v63 = vpack.c.bf16 %v1698_v57, %v1697_v55  ;;  %v1762_v0 = vpack.c.bf16 %v1706_v58, %v1705_v56  ;;  %v9092_v55 = vld [vmem:[%s11453_s5 + $0x30] sm:$0xff]  }
 0x206   : > { %v1757_v1 = vpack.c.bf16 %v1696_v61, %v1695_v59  ;;  %v1761_v40 = vpack.c.bf16 %v1704_v62, %v1703_v60 }
 0x208   : > { %7205 = vmatprep.subr.bf16.mxu0 %v1757_v1  ;;  %7245 = vmatprep.subr.bf16.mxu1 %v1761_v40 }
 0x209   : > { %7206 = vmatpush3.bf16.msra.mxu0 %v1757_v1  ;;  %7246 = vmatpush3.bf16.msra.mxu1 %v1761_v40 }
 0x20a   : > { %7207 = vmatprep.subr.bf16.mxu0 %v1758_v63  ;;  %7247 = vmatprep.subr.bf16.mxu1 %v1762_v0 }
 0x20d   : > { %7208 = vmatpush3.bf16.msra.mxu0 %v1758_v63  ;;  %7248 = vmatpush3.bf16.msra.mxu1 %v1762_v0 }
 0x210   : > { %7210 = vmatmul.mubr.msk.bf16.vlgmr.msra.gmra.mrb[64].mxu0 %vm1867_vm4, %v9039_v2  ;;  %7250 = vmatmul.mubr.msk.bf16.vlgmr.msra.gmra.mrb[64].mxu1 %vm1867_vm4, %v9039_v2 }
 0x211   : > { %7213 = vmatprep.mubr.msk.bf16.mxu0 %vm1867_vm4, %v9044_v3  ;;  %7253 = vmatprep.mubr.msk.bf16.mxu1 %vm1867_vm4, %v9044_v3 }
 0x216   : > { %v7075_v6 = vpop.f32.mrb[40].mxu0  ;;  %v7099_v7 = vpop.f32.mrb[40].mxu1 }
 0x217   : > { %v1344_v8 = vadd.f32 %v7075_v6, %v9006_v35  ;;  %v1409_v9 = vadd.f32 %v7099_v7, %v9006_v35  ;;  %v1335_v10 = vpop.f32.mrb[41].mxu0  ;;  %v1400_v11 = vpop.f32.mrb[41].mxu1 }
 0x218   : > { %v1336_v12 = vadd.f32 %v1335_v10, %v9004_v34  ;;  %v1401_v13 = vadd.f32 %v1400_v11, %v9004_v34  ;;  %v7076_v14 = vpop.f32.mrb[42].mxu0  ;;  %v7100_v15 = vpop.f32.mrb[42].mxu1  ;;  %7214 = vmatmul.mubr.msk.bf16.gmra.mrb[68].mxu0 %vm1867_vm4, %v9057_v4  ;;  %7254 = vmatmul.mubr.msk.bf16.gmra.mrb[68].mxu1 %vm1867_vm4, %v9057_v4 }
 0x219   : > { %v1347_v16 = vadd.f32 %v7076_v14, %v9010_v37  ;;  %v1412_v17 = vadd.f32 %v7100_v15, %v9010_v37  ;;  %v1338_v18 = vpop.f32.mrb[43].mxu0  ;;  %v1403_v19 = vpop.f32.mrb[43].mxu1  ;;  %7217 = vmatprep.mubr.msk.bf16.mxu0 %vm1867_vm4, %v9062_v5  ;;  %7257 = vmatprep.mubr.msk.bf16.mxu1 %vm1867_vm4, %v9062_v5  ;;  %v1709_v22 = vmax.f32 %v1344_v8, 0.0  ;;  %v1717_v23 = vmax.f32 %v1409_v9, 0.0  ;;  %v9109_v9 = vld [vmem:[%s11453_s5 + $0x38] sm:$0xff]   ;;  %v9114_v14 = vld [vmem:[%s11453_s5 + $0x40] sm:$0xff]  }
 0x21a   : > { %v1339_v20 = vadd.f32 %v1338_v18, %v9008_v36  ;;  %v1404_v21 = vadd.f32 %v1403_v19, %v9008_v36  ;;  %v1707_v28 = vmax.f32 %v1336_v12, 0.0  ;;  %v1715_v29 = vmax.f32 %v1401_v13, 0.0  ;;  %v9127_v15 = vld [vmem:[%s11453_s5 + $0x48] sm:$0xff]  }
 0x21b   : > { %v1710_v24 = vmax.f32 %v1347_v16, 0.0  ;;  %v1718_v27 = vmax.f32 %v1412_v17, 0.0  ;;  %v9132_v16 = vld [vmem:[%s11453_s5 + $0x50] sm:$0xff]   ;;  %v9145_v17 = vld [vmem:[%s11453_s5 + $0x58] sm:$0xff]  }
 0x21c   : > { %v1708_v30 = vmax.f32 %v1339_v20, 0.0  ;;  %v1716_v31 = vmax.f32 %v1404_v21, 0.0  ;;  %v9150_v20 = vld [vmem:[%s11453_s5 + $0x60] sm:$0xff]  }
 0x21d   : > { %v1764_v41 = vpack.c.bf16 %v1710_v24, %v1709_v22  ;;  %v1768_v42 = vpack.c.bf16 %v1718_v27, %v1717_v23 }
 0x21e   : > { %v7079_v43 = vpop.f32.mrb[44].mxu0  ;;  %v7103_v44 = vpop.f32.mrb[44].mxu1  ;;  %v1763_v45 = vpack.c.bf16 %v1708_v30, %v1707_v28  ;;  %v1767_v46 = vpack.c.bf16 %v1716_v31, %v1715_v29 }
 0x21f   : > { %v1360_v47 = vadd.f32 %v7079_v43, %v9024_v25  ;;  %v1425_v48 = vadd.f32 %v7103_v44, %v9024_v25  ;;  %v1351_v49 = vpop.f32.mrb[45].mxu0  ;;  %v1416_v50 = vpop.f32.mrb[45].mxu1 }
 0x220   : > { %v1352_v51 = vadd.f32 %v1351_v49, %v9012_v38  ;;  %v1417_v52 = vadd.f32 %v1416_v50, %v9012_v38  ;;  %v7080_v53 = vpop.f32.mrb[46].mxu0  ;;  %v7104_v54 = vpop.f32.mrb[46].mxu1  ;;  %7281 = vmatprep.subr.bf16.mxu0 %v1763_v45  ;;  %7321 = vmatprep.subr.bf16.mxu1 %v1767_v46 }
 0x221   : > { %v1363_v56 = vadd.f32 %v7080_v53, %v9026_v26  ;;  %v1428_v57 = vadd.f32 %v7104_v54, %v9026_v26  ;;  %v1354_v58 = vpop.f32.mrb[47].mxu0  ;;  %v1419_v59 = vpop.f32.mrb[47].mxu1  ;;  %7218 = vmatmul.mubr.msk.bf16.gmra.mrb[72].mxu0 %vm1867_vm4, %v9083_v32  ;;  %7258 = vmatmul.mubr.msk.bf16.gmra.mrb[72].mxu1 %vm1867_vm4, %v9083_v32  ;;  %v1713_v62 = vmax.f32 %v1360_v47, 0.0  ;;  %v1721_v63 = vmax.f32 %v1425_v48, 0.0  ;;  %v9171_v54 = vld [vmem:[%s11453_s5 + $0x68] sm:$0xff]  }
 0x222   : > { %v1355_v60 = vadd.f32 %v1354_v58, %v9014_v39  ;;  %v1420_v61 = vadd.f32 %v1419_v59, %v9014_v39  ;;  %7282 = vmatpush3.bf16.msra.mxu0 %v1763_v45  ;;  %7322 = vmatpush3.bf16.msra.mxu1 %v1767_v46  ;;  %v1711_v40 = vmax.f32 %v1352_v51, 0.0  ;;  %v1719_v6 = vmax.f32 %v1417_v52, 0.0 }
 0x223   : > { %v1714_v0 = vmax.f32 %v1363_v56, 0.0  ;;  %v1722_v1 = vmax.f32 %v1428_v57, 0.0  ;;  %7283 = vmatprep.subr.bf16.mxu0 %v1764_v41  ;;  %7323 = vmatprep.subr.bf16.mxu1 %v1768_v42 }
 0x224   : > { %v1712_v7 = vmax.f32 %v1355_v60, 0.0  ;;  %v1720_v8 = vmax.f32 %v1420_v61, 0.0  ;;  %7221 = vmatprep.mubr.msk.bf16.mxu0 %vm1867_vm4, %v9092_v55  ;;  %7261 = vmatprep.mubr.msk.bf16.mxu1 %vm1867_vm4, %v9092_v55 }
 0x225   : > { %v1766_v10 = vpack.c.bf16 %v1714_v0, %v1713_v62  ;;  %v1770_v11 = vpack.c.bf16 %v1722_v1, %v1721_v63  ;;  %v9176_v62 = vld [vmem:[%s11453_s5 + $0x70] sm:$0xff]  }
 0x226   : > { %7284 = vmatpush3.bf16.msra.mxu0 %v1764_v41  ;;  %7324 = vmatpush3.bf16.msra.mxu1 %v1768_v42  ;;  %v1765_v12 = vpack.c.bf16 %v1712_v7, %v1711_v40  ;;  %v1769_v13 = vpack.c.bf16 %v1720_v8, %v1719_v6 }
 0x228   : > { %7285 = vmatprep.subr.bf16.mxu0 %v1765_v12  ;;  %7325 = vmatprep.subr.bf16.mxu1 %v1769_v13 }
 0x229   : > { %7222 = vmatmul.mubr.msk.bf16.gmra.mrb[76].mxu0 %vm1867_vm4, %v9109_v9  ;;  %7262 = vmatmul.mubr.msk.bf16.gmra.mrb[76].mxu1 %vm1867_vm4, %v9109_v9 }
 0x22a   : > { %7286 = vmatpush3.bf16.msra.mxu0 %v1765_v12  ;;  %7326 = vmatpush3.bf16.msra.mxu1 %v1769_v13 }
 0x22b   : > { %7287 = vmatprep.subr.bf16.mxu0 %v1766_v10  ;;  %7327 = vmatprep.subr.bf16.mxu1 %v1770_v11 }
 0x22c   : > { %7225 = vmatprep.mubr.msk.bf16.mxu0 %vm1867_vm4, %v9114_v14  ;;  %7265 = vmatprep.mubr.msk.bf16.mxu1 %vm1867_vm4, %v9114_v14 }
 0x22e   : > { %7288 = vmatpush3.bf16.msra.mxu0 %v1766_v10  ;;  %7328 = vmatpush3.bf16.msra.mxu1 %v1770_v11 }
 0x231   : > { %7226 = vmatmul.mubr.msk.bf16.gmra.mrb[80].mxu0 %vm1867_vm4, %v9127_v15  ;;  %7266 = vmatmul.mubr.msk.bf16.gmra.mrb[80].mxu1 %vm1867_vm4, %v9127_v15 }
 0x232   : > { %7229 = vmatprep.mubr.msk.bf16.mxu0 %vm1867_vm4, %v9132_v16  ;;  %7269 = vmatprep.mubr.msk.bf16.mxu1 %vm1867_vm4, %v9132_v16 }
 0x236   : > { %v7123_v18 = vpop.f32.mrb[48].mxu0  ;;  %v7147_v19 = vpop.f32.mrb[48].mxu1 }
 0x237   : > { %v1474_v21 = vadd.f32 %v7123_v18, %v9006_v35  ;;  %v1539_v22 = vadd.f32 %v7147_v19, %v9006_v35  ;;  %v1465_v23 = vpop.f32.mrb[49].mxu0  ;;  %v1530_v24 = vpop.f32.mrb[49].mxu1 }
 0x238   : > { %v1466_v27 = vadd.f32 %v1465_v23, %v9004_v34  ;;  %v1531_v28 = vadd.f32 %v1530_v24, %v9004_v34  ;;  %v7124_v29 = vpop.f32.mrb[50].mxu0  ;;  %v7148_v30 = vpop.f32.mrb[50].mxu1 }
 0x239   : > { %v1477_v31 = vadd.f32 %v7124_v29, %v9010_v37  ;;  %v1542_v41 = vadd.f32 %v7148_v30, %v9010_v37  ;;  %v1468_v42 = vpop.f32.mrb[51].mxu0  ;;  %v1533_v43 = vpop.f32.mrb[51].mxu1  ;;  %7230 = vmatmul.mubr.msk.bf16.gmra.mrb[84].mxu0 %vm1867_vm4, %v9145_v17  ;;  %7270 = vmatmul.mubr.msk.bf16.gmra.mrb[84].mxu1 %vm1867_vm4, %v9145_v17  ;;  %v1725_v46 = vmax.f32 %v1474_v21, 0.0  ;;  %v1733_v47 = vmax.f32 %v1539_v22, 0.0 }
 0x23a   : > { %v1469_v44 = vadd.f32 %v1468_v42, %v9008_v36  ;;  %v1534_v45 = vadd.f32 %v1533_v43, %v9008_v36  ;;  %7233 = vmatprep.mubr.msk.bf16.mxu0 %vm1867_vm4, %v9150_v20  ;;  %7273 = vmatprep.mubr.msk.bf16.mxu1 %vm1867_vm4, %v9150_v20  ;;  %v1723_v50 = vmax.f32 %v1466_v27, 0.0  ;;  %v1731_v51 = vmax.f32 %v1531_v28, 0.0 }
 0x23b   : > { %v1726_v48 = vmax.f32 %v1477_v31, 0.0  ;;  %v1734_v49 = vmax.f32 %v1542_v41, 0.0  ;;  %v9197_v41 = vld [vmem:[%s11453_s5 + $0x78] sm:$0xff]  }
 0x23c   : > { %v1724_v52 = vmax.f32 %v1469_v44, 0.0  ;;  %v1732_v53 = vmax.f32 %v1534_v45, 0.0 }
 0x23d   : > { %v1772_v56 = vpack.c.bf16 %v1726_v48, %v1725_v46  ;;  %v1776_v57 = vpack.c.bf16 %v1734_v49, %v1733_v47 }
 0x23e   : > { %v7127_v58 = vpop.f32.mrb[52].mxu0  ;;  %v7151_v59 = vpop.f32.mrb[52].mxu1  ;;  %v1771_v60 = vpack.c.bf16 %v1724_v52, %v1723_v50  ;;  %v1775_v61 = vpack.c.bf16 %v1732_v53, %v1731_v51 }
 0x23f   : > { %v1490_v63 = vadd.f32 %v7127_v58, %v9024_v25  ;;  %v1555_v0 = vadd.f32 %v7151_v59, %v9024_v25  ;;  %v1481_v1 = vpop.f32.mrb[53].mxu0  ;;  %v1546_v40 = vpop.f32.mrb[53].mxu1 }
 0x240   : > { %v1482_v6 = vadd.f32 %v1481_v1, %v9012_v38  ;;  %v1547_v7 = vadd.f32 %v1546_v40, %v9012_v38  ;;  %v7128_v8 = vpop.f32.mrb[54].mxu0  ;;  %v7152_v10 = vpop.f32.mrb[54].mxu1  ;;  %7361 = vmatprep.subr.bf16.mxu0 %v1771_v60  ;;  %7401 = vmatprep.subr.bf16.mxu1 %v1775_v61 }
 0x241   : > { %v1493_v11 = vadd.f32 %v7128_v8, %v9026_v26  ;;  %v1558_v12 = vadd.f32 %v7152_v10, %v9026_v26  ;;  %v1484_v13 = vpop.f32.mrb[55].mxu0  ;;  %v1549_v18 = vpop.f32.mrb[55].mxu1  ;;  %7234 = vmatmul.mubr.msk.bf16.gmra.mrb[88].mxu0 %vm1867_vm4, %v9171_v54  ;;  %7274 = vmatmul.mubr.msk.bf16.gmra.mrb[88].mxu1 %vm1867_vm4, %v9171_v54  ;;  %v1729_v22 = vmax.f32 %v1490_v63, 0.0  ;;  %v1737_v23 = vmax.f32 %v1555_v0, 0.0 }
 0x242   : > { %v1485_v19 = vadd.f32 %v1484_v13, %v9014_v39  ;;  %v1550_v21 = vadd.f32 %v1549_v18, %v9014_v39  ;;  %7237 = vmatprep.mubr.msk.bf16.mxu0 %vm1867_vm4, %v9176_v62  ;;  %7277 = vmatprep.mubr.msk.bf16.mxu1 %vm1867_vm4, %v9176_v62  ;;  %v1727_v28 = vmax.f32 %v1482_v6, 0.0  ;;  %v1735_v29 = vmax.f32 %v1547_v7, 0.0 }
 0x243   : > { %v1730_v24 = vmax.f32 %v1493_v11, 0.0  ;;  %v1738_v27 = vmax.f32 %v1558_v12, 0.0 }
 0x244   : > { %v1728_v30 = vmax.f32 %v1485_v19, 0.0  ;;  %v1736_v31 = vmax.f32 %v1550_v21, 0.0 }
 0x245   : > { %v1774_v42 = vpack.c.bf16 %v1730_v24, %v1729_v22  ;;  %v1778_v43 = vpack.c.bf16 %v1738_v27, %v1737_v23 }
 0x246   : > { %v1773_v44 = vpack.c.bf16 %v1728_v30, %v1727_v28  ;;  %v1777_v45 = vpack.c.bf16 %v1736_v31, %v1735_v29 }
 0x249   : > { %7238 = vmatmul.mubr.msk.bf16.gmra.mrb[92].mxu0 %vm1867_vm4, %v9197_v41  ;;  %7278 = vmatmul.mubr.msk.bf16.gmra.mrb[92].mxu1 %vm1867_vm4, %v9197_v41 }
 0x24a   : > { %7289 = vmatprep.mubr.msk.bf16.mxu0 %vm1867_vm4, %v8998_v33  ;;  %7329 = vmatprep.mubr.msk.bf16.mxu1 %vm1867_vm4, %v8998_v33 }
 0x251   : > { %7290 = vmatmul.mubr.msk.bf16.vlgmr.msra.gmra.mrb[96].mxu0 %vm1867_vm4, %v9039_v2  ;;  %7330 = vmatmul.mubr.msk.bf16.vlgmr.msra.gmra.mrb[96].mxu1 %vm1867_vm4, %v9039_v2 }
 0x252   : > { %7362 = vmatpush3.bf16.msra.mxu0 %v1771_v60  ;;  %7402 = vmatpush3.bf16.msra.mxu1 %v1775_v61 }
 0x253   : > { %7363 = vmatprep.subr.bf16.mxu0 %v1772_v56  ;;  %7403 = vmatprep.subr.bf16.mxu1 %v1776_v57 }
 0x254   : > { %7293 = vmatprep.mubr.msk.bf16.mxu0 %vm1867_vm4, %v9044_v3  ;;  %7333 = vmatprep.mubr.msk.bf16.mxu1 %vm1867_vm4, %v9044_v3 }
 0x256   : > { %7364 = vmatpush3.bf16.msra.mxu0 %v1772_v56  ;;  %7404 = vmatpush3.bf16.msra.mxu1 %v1776_v57  ;;  %v7171_v46 = vpop.f32.mrb[56].mxu0  ;;  %v7195_v47 = vpop.f32.mrb[56].mxu1 }
 0x257   : > { %v1604_v48 = vadd.f32 %v7171_v46, %v9006_v35  ;;  %v1669_v49 = vadd.f32 %v7195_v47, %v9006_v35  ;;  %7365 = vmatprep.subr.bf16.mxu0 %v1773_v44  ;;  %7405 = vmatprep.subr.bf16.mxu1 %v1777_v45  ;;  %v1595_v50 = vpop.f32.mrb[57].mxu0  ;;  %v1660_v51 = vpop.f32.mrb[57].mxu1 }
 0x258   : > { %v1596_v52 = vadd.f32 %v1595_v50, %v9004_v34  ;;  %v1661_v53 = vadd.f32 %v1660_v51, %v9004_v34  ;;  %v7172_v58 = vpop.f32.mrb[58].mxu0  ;;  %v7196_v59 = vpop.f32.mrb[58].mxu1 }
 0x259   : > { %v1607_v60 = vadd.f32 %v7172_v58, %v9010_v37  ;;  %v1672_v56 = vadd.f32 %v7196_v59, %v9010_v37  ;;  %v1598_v57 = vpop.f32.mrb[59].mxu0  ;;  %v1663_v61 = vpop.f32.mrb[59].mxu1  ;;  %7294 = vmatmul.mubr.msk.bf16.gmra.mrb[100].mxu0 %vm1867_vm4, %v9057_v4  ;;  %7334 = vmatmul.mubr.msk.bf16.gmra.mrb[100].mxu1 %vm1867_vm4, %v9057_v4  ;;  %v1741_v34 = vmax.f32 %v1604_v48, 0.0  ;;  %v1749_v0 = vmax.f32 %v1669_v49, 0.0  ;;  %v9369_v59 = vld [vmem:[%s11452_s4 + $0x8] sm:$0xff]  }
 0x25a   : > { %v1599_v35 = vadd.f32 %v1598_v57, %v9008_v36  ;;  %v1664_v63 = vadd.f32 %v1663_v61, %v9008_v36  ;;  %7366 = vmatpush3.bf16.msra.mxu0 %v1773_v44  ;;  %7406 = vmatpush3.bf16.msra.mxu1 %v1777_v45  ;;  %v1739_v37 = vmax.f32 %v1596_v52, 0.0  ;;  %v1747_v6 = vmax.f32 %v1661_v53, 0.0 }
 0x25b   : > { %v1742_v1 = vmax.f32 %v1607_v60, 0.0  ;;  %v1750_v40 = vmax.f32 %v1672_v56, 0.0  ;;  %7367 = vmatprep.subr.bf16.mxu0 %v1774_v42  ;;  %7407 = vmatprep.subr.bf16.mxu1 %v1778_v43 }
 0x25c   : > { %v1740_v7 = vmax.f32 %v1599_v35, 0.0  ;;  %v1748_v8 = vmax.f32 %v1664_v63, 0.0  ;;  %7297 = vmatprep.mubr.msk.bf16.mxu0 %vm1867_vm4, %v9062_v5  ;;  %7337 = vmatprep.mubr.msk.bf16.mxu1 %vm1867_vm4, %v9062_v5 }
 0x25d   : > { %v9231_v10 = vpack.c.bf16 %v1742_v1, %v1741_v34  ;;  %v9233_v36 = vpack.c.bf16 %v1750_v40, %v1749_v0 }
 0x25e   : > { %7368 = vmatpush3.bf16.msra.mxu0 %v1774_v42  ;;  %7408 = vmatpush3.bf16.msra.mxu1 %v1778_v43  ;;  %v7175_v11 = vpop.f32.mrb[60].mxu0  ;;  %v7199_v12 = vpop.f32.mrb[60].mxu1  ;;  %v1779_v13 = vpack.c.bf16 %v1740_v7, %v1739_v37  ;;  %v1783_v18 = vpack.c.bf16 %v1748_v8, %v1747_v6  ;;  %v9471_v37 = vld [vmem:[%s11452_s4 + $0x38] sm:$0xff]  }
 0x25f   : > { %v1620_v19 = vadd.f32 %v7175_v11, %v9024_v25  ;;  %v1685_v21 = vadd.f32 %v7199_v12, %v9024_v25  ;;  %v1611_v22 = vpop.f32.mrb[61].mxu0  ;;  %v1676_v23 = vpop.f32.mrb[61].mxu1 }
 0x260   : > { %v1612_v24 = vadd.f32 %v1611_v22, %v9012_v38  ;;  %v1677_v27 = vadd.f32 %v1676_v23, %v9012_v38  ;;  %v7176_v28 = vpop.f32.mrb[62].mxu0  ;;  %v7200_v29 = vpop.f32.mrb[62].mxu1  ;;  %7441 = vmatprep.subr.bf16.mxu0 %v1779_v13  ;;  %7481 = vmatprep.subr.bf16.mxu1 %v1783_v18 }
 0x261   : > { %v1623_v30 = vadd.f32 %v7176_v28, %v9026_v26  ;;  %v1688_v31 = vadd.f32 %v7200_v29, %v9026_v26  ;;  %v1614_v42 = vpop.f32.mrb[63].mxu0  ;;  %v1679_v43 = vpop.f32.mrb[63].mxu1  ;;  %7298 = vmatmul.mubr.msk.bf16.gmra.mrb[104].mxu0 %vm1867_vm4, %v9083_v32  ;;  %7338 = vmatmul.mubr.msk.bf16.gmra.mrb[104].mxu1 %vm1867_vm4, %v9083_v32  ;;  %v1745_v44 = vmax.f32 %v1620_v19, 0.0  ;;  %v1753_v26 = vmax.f32 %v1685_v21, 0.0 }
 0x262   : > { %v1615_v25 = vadd.f32 %v1614_v42, %v9014_v39  ;;  %v1680_v38 = vadd.f32 %v1679_v43, %v9014_v39  ;;  %7301 = vmatprep.mubr.msk.bf16.mxu0 %vm1867_vm4, %v9092_v55  ;;  %7341 = vmatprep.mubr.msk.bf16.mxu1 %vm1867_vm4, %v9092_v55  ;;  %v1743_v47 = vmax.f32 %v1612_v24, 0.0  ;;  %v1751_v48 = vmax.f32 %v1677_v27, 0.0  ;;  %v9310_v39 = vld [vmem:[%s11452_s4] sm:$0xff]  }
 0x263   : > { %v1746_v45 = vmax.f32 %v1623_v30, 0.0  ;;  %v1754_v46 = vmax.f32 %v1688_v31, 0.0 }
 0x264   : > { %v1744_v49 = vmax.f32 %v1615_v25, 0.0  ;;  %v1752_v50 = vmax.f32 %v1680_v38, 0.0 }
 0x265   : > { %v1782_v51 = vpack.c.bf16 %v1746_v45, %v1745_v44  ;;  %v1786_v52 = vpack.c.bf16 %v1754_v46, %v1753_v26 }
 0x266   : > { %v1781_v53 = vpack.c.bf16 %v1744_v49, %v1743_v47  ;;  %v1785_v58 = vpack.c.bf16 %v1752_v50, %v1751_v48 }
 0x269   : > { %7302 = vmatmul.mubr.msk.bf16.gmra.mrb[108].mxu0 %vm1867_vm4, %v9109_v9  ;;  %7342 = vmatmul.mubr.msk.bf16.gmra.mrb[108].mxu1 %vm1867_vm4, %v9109_v9 }
 0x26a   : > { %7305 = vmatprep.mubr.msk.bf16.mxu0 %vm1867_vm4, %v9114_v14  ;;  %7345 = vmatprep.mubr.msk.bf16.mxu1 %vm1867_vm4, %v9114_v14 }
 0x271   : > { %7306 = vmatmul.mubr.msk.bf16.gmra.mrb[112].mxu0 %vm1867_vm4, %v9127_v15  ;;  %7346 = vmatmul.mubr.msk.bf16.gmra.mrb[112].mxu1 %vm1867_vm4, %v9127_v15 }
 0x272   : > { %7309 = vmatprep.mubr.msk.bf16.mxu0 %vm1867_vm4, %v9132_v16  ;;  %7349 = vmatprep.mubr.msk.bf16.mxu1 %vm1867_vm4, %v9132_v16 }
 0x279   : > { %7310 = vmatmul.mubr.msk.bf16.gmra.mrb[116].mxu0 %vm1867_vm4, %v9145_v17  ;;  %7350 = vmatmul.mubr.msk.bf16.gmra.mrb[116].mxu1 %vm1867_vm4, %v9145_v17 }
 0x27a   : > { %7313 = vmatprep.mubr.msk.bf16.mxu0 %vm1867_vm4, %v9150_v20  ;;  %7353 = vmatprep.mubr.msk.bf16.mxu1 %vm1867_vm4, %v9150_v20 }
 0x281   : > { %7314 = vmatmul.mubr.msk.bf16.gmra.mrb[120].mxu0 %vm1867_vm4, %v9171_v54  ;;  %7354 = vmatmul.mubr.msk.bf16.gmra.mrb[120].mxu1 %vm1867_vm4, %v9171_v54 }
 0x282   : > { %7317 = vmatprep.mubr.msk.bf16.mxu0 %vm1867_vm4, %v9176_v62  ;;  %7357 = vmatprep.mubr.msk.bf16.mxu1 %vm1867_vm4, %v9176_v62 }
 0x289   : > { %7318 = vmatmul.mubr.msk.bf16.gmra.mrb[124].mxu0 %vm1867_vm4, %v9197_v41  ;;  %7358 = vmatmul.mubr.msk.bf16.gmra.mrb[124].mxu1 %vm1867_vm4, %v9197_v41 }
 0x28a   : > { %7369 = vmatprep.mubr.msk.bf16.mxu0 %vm1867_vm4, %v8998_v33  ;;  %7409 = vmatprep.mubr.msk.bf16.mxu1 %vm1867_vm4, %v8998_v33 }
 0x291   : > { %7370 = vmatmul.mubr.msk.bf16.vlgmr.msra.gmra.mrb[128].mxu0 %vm1867_vm4, %v9039_v2  ;;  %7410 = vmatmul.mubr.msk.bf16.vlgmr.msra.gmra.mrb[128].mxu1 %vm1867_vm4, %v9039_v2 }
 0x292   : > { %7442 = vmatpush3.bf16.msra.mxu0 %v1779_v13  ;;  %7482 = vmatpush3.bf16.msra.mxu1 %v1783_v18 }
 0x293   : > { %7443 = vmatprep.subr.bf16.mxu0 %v9231_v10  ;;  %7483 = vmatprep.subr.bf16.mxu1 %v9233_v36 }
 0x294   : > { %7373 = vmatprep.mubr.msk.bf16.mxu0 %vm1867_vm4, %v9044_v3  ;;  %7413 = vmatprep.mubr.msk.bf16.mxu1 %vm1867_vm4, %v9044_v3 }
 0x296   : > { %7444 = vmatpush3.bf16.msra.mxu0 %v9231_v10  ;;  %7484 = vmatpush3.bf16.msra.mxu1 %v9233_v36 }
 0x297   : > { %7445 = vmatprep.subr.bf16.mxu0 %v1781_v53  ;;  %7485 = vmatprep.subr.bf16.mxu1 %v1785_v58 }
 0x299   : > { %7374 = vmatmul.mubr.msk.bf16.gmra.mrb[132].mxu0 %vm1867_vm4, %v9057_v4  ;;  %7414 = vmatmul.mubr.msk.bf16.gmra.mrb[132].mxu1 %vm1867_vm4, %v9057_v4 }
 0x29a   : > { %7446 = vmatpush3.bf16.msra.mxu0 %v1781_v53  ;;  %7486 = vmatpush3.bf16.msra.mxu1 %v1785_v58 }
 0x29b   : > { %7447 = vmatprep.subr.bf16.mxu0 %v1782_v51  ;;  %7487 = vmatprep.subr.bf16.mxu1 %v1786_v52 }
 0x29c   : > { %7377 = vmatprep.mubr.msk.bf16.mxu0 %vm1867_vm4, %v9062_v5  ;;  %7417 = vmatprep.mubr.msk.bf16.mxu1 %vm1867_vm4, %v9062_v5 }
 0x29e   : > { %7448 = vmatpush3.bf16.msra.mxu0 %v1782_v51  ;;  %7488 = vmatpush3.bf16.msra.mxu1 %v1786_v52 }
 0x29f   : > { %7521 = vmatprep.subr.bf16.mxu0 %v9310_v39  ;;  %7569 = vmatprep.subr.bf16.mxu1 %v9310_v39 }
 0x2a1   : > { %7378 = vmatmul.mubr.msk.bf16.gmra.mrb[136].mxu0 %vm1867_vm4, %v9083_v32  ;;  %7418 = vmatmul.mubr.msk.bf16.gmra.mrb[136].mxu1 %vm1867_vm4, %v9083_v32 }
 0x2a2   : > { %7381 = vmatprep.mubr.msk.bf16.mxu0 %vm1867_vm4, %v9092_v55  ;;  %7421 = vmatprep.mubr.msk.bf16.mxu1 %vm1867_vm4, %v9092_v55 }
 0x2a9   : > { %7382 = vmatmul.mubr.msk.bf16.gmra.mrb[140].mxu0 %vm1867_vm4, %v9109_v9  ;;  %7422 = vmatmul.mubr.msk.bf16.gmra.mrb[140].mxu1 %vm1867_vm4, %v9109_v9 }
 0x2aa   : > { %7385 = vmatprep.mubr.msk.bf16.mxu0 %vm1867_vm4, %v9114_v14  ;;  %7425 = vmatprep.mubr.msk.bf16.mxu1 %vm1867_vm4, %v9114_v14 }
 0x2b1   : > { %7386 = vmatmul.mubr.msk.bf16.gmra.mrb[144].mxu0 %vm1867_vm4, %v9127_v15  ;;  %7426 = vmatmul.mubr.msk.bf16.gmra.mrb[144].mxu1 %vm1867_vm4, %v9127_v15 }
 0x2b2   : > { %7389 = vmatprep.mubr.msk.bf16.mxu0 %vm1867_vm4, %v9132_v16  ;;  %7429 = vmatprep.mubr.msk.bf16.mxu1 %vm1867_vm4, %v9132_v16 }
 0x2b9   : > { %7390 = vmatmul.mubr.msk.bf16.gmra.mrb[148].mxu0 %vm1867_vm4, %v9145_v17  ;;  %7430 = vmatmul.mubr.msk.bf16.gmra.mrb[148].mxu1 %vm1867_vm4, %v9145_v17 }
 0x2ba   : > { %7393 = vmatprep.mubr.msk.bf16.mxu0 %vm1867_vm4, %v9150_v20  ;;  %7433 = vmatprep.mubr.msk.bf16.mxu1 %vm1867_vm4, %v9150_v20 }
 0x2c1   : > { %7394 = vmatmul.mubr.msk.bf16.gmra.mrb[152].mxu0 %vm1867_vm4, %v9171_v54  ;;  %7434 = vmatmul.mubr.msk.bf16.gmra.mrb[152].mxu1 %vm1867_vm4, %v9171_v54 }
 0x2c2   : > { %7397 = vmatprep.mubr.msk.bf16.mxu0 %vm1867_vm4, %v9176_v62  ;;  %7437 = vmatprep.mubr.msk.bf16.mxu1 %vm1867_vm4, %v9176_v62 }
 0x2c9   : > { %7398 = vmatmul.mubr.msk.bf16.gmra.mrb[156].mxu0 %vm1867_vm4, %v9197_v41  ;;  %7438 = vmatmul.mubr.msk.bf16.gmra.mrb[156].mxu1 %vm1867_vm4, %v9197_v41 }
 0x2ca   : > { %7449 = vmatprep.mubr.msk.bf16.mxu0 %vm1867_vm4, %v8998_v33  ;;  %7489 = vmatprep.mubr.msk.bf16.mxu1 %vm1867_vm4, %v8998_v33  ;;  %v9386_v33 = vld [vmem:[%s11452_s4 + $0x10] sm:$0xff]  }
 0x2d1   : > { %7450 = vmatmul.mubr.msk.bf16.vlgmr.msra.gmra.mrb[160].mxu0 %vm1867_vm4, %v9039_v2  ;;  %7490 = vmatmul.mubr.msk.bf16.vlgmr.msra.gmra.mrb[160].mxu1 %vm1867_vm4, %v9039_v2  ;;  %v9395_v2 = vld [vmem:[%s11452_s4 + $0x18] sm:$0xff]  }
 0x2d2   : > { %7453 = vmatprep.mubr.msk.bf16.mxu0 %vm1867_vm4, %v9044_v3  ;;  %7493 = vmatprep.mubr.msk.bf16.mxu1 %vm1867_vm4, %v9044_v3  ;;  %v9412_v3 = vld [vmem:[%s11452_s4 + $0x20] sm:$0xff]  }
 0x2d3   : > { %7522 = vmatpush3.bf16.msra.mxu0 %v9310_v39  ;;  %7570 = vmatpush3.bf16.msra.mxu1 %v9310_v39 }
 0x2d4   : > { %7523 = vmatprep.subr.bf16.mxu0 %v9369_v59  ;;  %7571 = vmatprep.subr.bf16.mxu1 %v9369_v59 }
 0x2d7   : > { %7524 = vmatpush3.bf16.msra.mxu0 %v9369_v59  ;;  %7572 = vmatpush3.bf16.msra.mxu1 %v9369_v59 }
 0x2d8   : > { %7525 = vmatprep.subr.bf16.mxu0 %v9386_v33  ;;  %7573 = vmatprep.subr.bf16.mxu1 %v9386_v33 }
 0x2d9   : > { %7454 = vmatmul.mubr.msk.bf16.gmra.mrb[164].mxu0 %vm1867_vm4, %v9057_v4  ;;  %7494 = vmatmul.mubr.msk.bf16.gmra.mrb[164].mxu1 %vm1867_vm4, %v9057_v4  ;;  %v9421_v4 = vld [vmem:[%s11452_s4 + $0x28] sm:$0xff]  }
 0x2da   : > { %7457 = vmatprep.mubr.msk.bf16.mxu0 %vm1867_vm4, %v9062_v5  ;;  %7497 = vmatprep.mubr.msk.bf16.mxu1 %vm1867_vm4, %v9062_v5 }
 0x2db   : > { %7526 = vmatpush3.bf16.msra.mxu0 %v9386_v33  ;;  %7574 = vmatpush3.bf16.msra.mxu1 %v9386_v33 }
 0x2dc   : > { %7527 = vmatprep.subr.bf16.mxu0 %v9395_v2  ;;  %7575 = vmatprep.subr.bf16.mxu1 %v9395_v2 }
 0x2df   : > { %7528 = vmatpush3.bf16.msra.mxu0 %v9395_v2  ;;  %7576 = vmatpush3.bf16.msra.mxu1 %v9395_v2 }
 0x2e0   : > { %7529 = vmatprep.subr.bf16.mxu0 %v9412_v3  ;;  %7577 = vmatprep.subr.bf16.mxu1 %v9412_v3 }
 0x2e1   : > { %7458 = vmatmul.mubr.msk.bf16.gmra.mrb[168].mxu0 %vm1867_vm4, %v9083_v32  ;;  %7498 = vmatmul.mubr.msk.bf16.gmra.mrb[168].mxu1 %vm1867_vm4, %v9083_v32  ;;  %v9446_v32 = vld [vmem:[%s11452_s4 + $0x30] sm:$0xff]  }
 0x2e2   : > { %7461 = vmatprep.mubr.msk.bf16.mxu0 %vm1867_vm4, %v9092_v55  ;;  %7501 = vmatprep.mubr.msk.bf16.mxu1 %vm1867_vm4, %v9092_v55 }
 0x2e3   : > { %v9431_v5 = vpop.f32.mrb[64].mxu0  ;;  %v9433_v60 = vpop.f32.mrb[64].mxu1  ;;  %7530 = vmatpush3.bf16.msra.mxu0 %v9412_v3  ;;  %7578 = vmatpush3.bf16.msra.mxu1 %v9412_v3 }
 0x2e4   : > { %v9437_v56 = vpop.f32.mrb[65].mxu0  ;;  %v9439_v57 = vpop.f32.mrb[65].mxu1  ;;  %7531 = vmatprep.subr.bf16.mxu0 %v9421_v4  ;;  %7579 = vmatprep.subr.bf16.mxu1 %v9421_v4 }
 0x2e5   : > { %v9448_v55 = vpop.f32.mrb[66].mxu0  ;;  %v9450_v61 = vpop.f32.mrb[66].mxu1 }
 0x2e6   : > { %v3205_v35 = vpack.c.bf16 %v9448_v55, %v9431_v5  ;;  %v3221_v63 = vpack.c.bf16 %v9450_v61, %v9433_v60  ;;  %v9456_v34 = vpop.f32.mrb[67].mxu0  ;;  %v9458_v0 = vpop.f32.mrb[67].mxu1 }
 0x2e7   : > { %v3204_v1 = vpack.c.bf16 %v9456_v34, %v9437_v56  ;;  %v3220_v40 = vpack.c.bf16 %v9458_v0, %v9439_v57  ;;  %7532 = vmatpush3.bf16.msra.mxu0 %v9421_v4  ;;  %7580 = vmatpush3.bf16.msra.mxu1 %v9421_v4 }
 0x2e8   : > { %7533 = vmatprep.subr.bf16.mxu0 %v9446_v32  ;;  %7581 = vmatprep.subr.bf16.mxu1 %v9446_v32 }
 0x2e9   : > { %7462 = vmatmul.mubr.msk.bf16.gmra.mrb[172].mxu0 %vm1867_vm4, %v9109_v9  ;;  %7502 = vmatmul.mubr.msk.bf16.gmra.mrb[172].mxu1 %vm1867_vm4, %v9109_v9 }
 0x2ea   : > { %7465 = vmatprep.mubr.msk.bf16.mxu0 %vm1867_vm4, %v9114_v14  ;;  %7505 = vmatprep.mubr.msk.bf16.mxu1 %vm1867_vm4, %v9114_v14 }
 0x2eb   : > { %v9481_v6 = vpop.f32.mrb[68].mxu0  ;;  %v9483_v7 = vpop.f32.mrb[68].mxu1  ;;  %7534 = vmatpush3.bf16.msra.mxu0 %v9446_v32  ;;  %7582 = vmatpush3.bf16.msra.mxu1 %v9446_v32 }
 0x2ec   : > { %v9487_v8 = vpop.f32.mrb[69].mxu0  ;;  %v9489_v10 = vpop.f32.mrb[69].mxu1  ;;  %7535 = vmatprep.subr.bf16.mxu0 %v9471_v37  ;;  %7583 = vmatprep.subr.bf16.mxu1 %v9471_v37 }
 0x2ed   : > { %v9493_v9 = vpop.f32.mrb[70].mxu0  ;;  %v9495_v36 = vpop.f32.mrb[70].mxu1 }
 0x2ee   : > { %v3207_v14 = vpack.c.bf16 %v9493_v9, %v9481_v6  ;;  %v3223_v11 = vpack.c.bf16 %v9495_v36, %v9483_v7  ;;  %v9501_v12 = vpop.f32.mrb[71].mxu0  ;;  %v9503_v13 = vpop.f32.mrb[71].mxu1 }
 0x2ef   : > { %v3206_v18 = vpack.c.bf16 %v9501_v12, %v9487_v8  ;;  %v3222_v19 = vpack.c.bf16 %v9503_v13, %v9489_v10  ;;  %7536 = vmatpush3.bf16.msra.mxu0 %v9471_v37  ;;  %7584 = vmatpush3.bf16.msra.mxu1 %v9471_v37 }
 0x2f0   : > { %7617 = vmatprep.subr.bf16.mxu0 %v9310_v39  ;;  %7665 = vmatprep.subr.bf16.mxu1 %v9310_v39 }
 0x2f1   : > { %7466 = vmatmul.mubr.msk.bf16.gmra.mrb[176].mxu0 %vm1867_vm4, %v9127_v15  ;;  %7506 = vmatmul.mubr.msk.bf16.gmra.mrb[176].mxu1 %vm1867_vm4, %v9127_v15 }
 0x2f2   : > { %7469 = vmatprep.mubr.msk.bf16.mxu0 %vm1867_vm4, %v9132_v16  ;;  %7509 = vmatprep.mubr.msk.bf16.mxu1 %vm1867_vm4, %v9132_v16 }
 0x2f4   : > { %v9521_v21 = vpop.f32.mrb[72].mxu0  ;;  %v9523_v22 = vpop.f32.mrb[72].mxu1 }
 0x2f5   : > { %v9525_v23 = vpop.f32.mrb[73].mxu0  ;;  %v9527_v24 = vpop.f32.mrb[73].mxu1 }
 0x2f6   : > { %v9529_v27 = vpop.f32.mrb[74].mxu0  ;;  %v9531_v28 = vpop.f32.mrb[74].mxu1 }
 0x2f7   : > { %v9537_v30 = vpop.f32.mrb[75].mxu0  ;;  %v9539_v16 = vpop.f32.mrb[75].mxu1 }
 0x2f8   : > { %v3208_v31 = vpack.c.bf16 %v9537_v30, %v9525_v23  ;;  %v11509_v23 = vpack.c.bf16 %v9531_v28, %v9523_v22 }
 0x2f9   : > { %7470 = vmatmul.mubr.msk.bf16.gmra.mrb[180].mxu0 %vm1867_vm4, %v9145_v17  ;;  %7510 = vmatmul.mubr.msk.bf16.gmra.mrb[180].mxu1 %vm1867_vm4, %v9145_v17 }
 0x2fa   : > { %7473 = vmatprep.mubr.msk.bf16.mxu0 %vm1867_vm4, %v9150_v20  ;;  %7513 = vmatprep.mubr.msk.bf16.mxu1 %vm1867_vm4, %v9150_v20 }
 0x2fc   : > { %v9553_v43 = vpop.f32.mrb[76].mxu0  ;;  %v9555_v25 = vpop.f32.mrb[76].mxu1 }
 0x2fd   : > { %v9557_v38 = vpop.f32.mrb[77].mxu0  ;;  %v9559_v44 = vpop.f32.mrb[77].mxu1 }
 0x2fe   : > { %v9561_v26 = vpop.f32.mrb[78].mxu0  ;;  %v9563_v45 = vpop.f32.mrb[78].mxu1 }
 0x2ff   : > { %v9569_v47 = vpop.f32.mrb[79].mxu0  ;;  %v9571_v20 = vpop.f32.mrb[79].mxu1 }
 0x301   : > { %7474 = vmatmul.mubr.msk.bf16.gmra.mrb[184].mxu0 %vm1867_vm4, %v9171_v54  ;;  %7514 = vmatmul.mubr.msk.bf16.gmra.mrb[184].mxu1 %vm1867_vm4, %v9171_v54 }
 0x302   : > { %7477 = vmatprep.mubr.msk.bf16.mxu0 %vm1867_vm4, %v9176_v62  ;;  %7517 = vmatprep.mubr.msk.bf16.mxu1 %vm1867_vm4, %v9176_v62 }
 0x304   : > { %v9585_v50 = vpop.f32.mrb[80].mxu0  ;;  %v9587_v51 = vpop.f32.mrb[80].mxu1 }
 0x305   : > { %v9589_v52 = vpop.f32.mrb[81].mxu0  ;;  %v9591_v53 = vpop.f32.mrb[81].mxu1 }
 0x306   : > { %v9593_v58 = vpop.f32.mrb[82].mxu0  ;;  %v9595_v46 = vpop.f32.mrb[82].mxu1 }
 0x307   : > { %v9601_v49 = vpop.f32.mrb[83].mxu0  ;;  %v9603_v62 = vpop.f32.mrb[83].mxu1 }
 0x309   : > { %7478 = vmatmul.mubr.msk.bf16.gmra.mrb[188].mxu0 %vm1867_vm4, %v9197_v41  ;;  %7518 = vmatmul.mubr.msk.bf16.gmra.mrb[188].mxu1 %vm1867_vm4, %v9197_v41 }
 0x30a   : > { %7537 = vmatprep.mubr.bf16.mxu0 %v3204_v1  ;;  %7585 = vmatprep.mubr.bf16.mxu1 %v3220_v40 }
 0x30c   : > { %v9619_v17 = vpop.f32.mrb[84].mxu0  ;;  %v9621_v54 = vpop.f32.mrb[84].mxu1 }
 0x30d   : > { %v9623_v48 = vpop.f32.mrb[85].mxu0  ;;  %v9625_v29 = vpop.f32.mrb[85].mxu1 }
 0x30e   : > { %v9627_v15 = vpop.f32.mrb[86].mxu0  ;;  %v9629_v42 = vpop.f32.mrb[86].mxu1 }
 0x30f   : > { %v3215_v41 = vpack.c.bf16 %v9627_v15, %v9619_v17  ;;  %v3231_v56 = vpack.c.bf16 %v9629_v42, %v9621_v54  ;;  %v9635_v57 = vpop.f32.mrb[87].mxu0  ;;  %v9637_v34 = vpop.f32.mrb[87].mxu1 }
 0x310   : > { %v3214_v0 = vpack.c.bf16 %v9635_v57, %v9623_v48  ;;  %v3230_v1 = vpack.c.bf16 %v9637_v34, %v9625_v29 }
 0x311   : > { %7538 = vmatmul.mubr.bf16.vlgmr.msra.gmra.mrb[192].mxu0 %v3205_v35  ;;  %7586 = vmatmul.mubr.bf16.vlgmr.msra.gmra.mrb[192].mxu1 %v3221_v63 }
 0x312   : > { %7541 = vmatprep.mubr.bf16.mxu0 %v3206_v18  ;;  %7589 = vmatprep.mubr.bf16.mxu1 %v3222_v19  ;;  %v11507_v19 = vpack.c.bf16 %v9539_v16, %v9527_v24  ;;  %v11511_v16 = vpack.c.bf16 %v9571_v20, %v9559_v44  ;;  %v11514_v44 = vpack.c.bf16 %v9601_v49, %v9589_v52 }
 0x313   : > { %7618 = vmatpush3.bf16.msra.mxu0 %v9310_v39  ;;  %7666 = vmatpush3.bf16.msra.mxu1 %v9310_v39 }
 0x314   : > { %v9657_v40 = vpop.f32.mrb[88].mxu0  ;;  %v9659_v5 = vpop.f32.mrb[88].mxu1  ;;  %7619 = vmatprep.subr.bf16.mxu0 %v9369_v59  ;;  %7667 = vmatprep.subr.bf16.mxu1 %v9369_v59 }
 0x315   : > { %v9663_v60 = vpop.f32.mrb[89].mxu0  ;;  %v9665_v55 = vpop.f32.mrb[89].mxu1 }
 0x316   : > { %v9667_v61 = vpop.f32.mrb[90].mxu0  ;;  %v9669_v35 = vpop.f32.mrb[90].mxu1 }
 0x317   : > { %v3217_v63 = vpack.c.bf16 %v9667_v61, %v9657_v40  ;;  %v9675_v10 = vpop.f32.mrb[91].mxu0  ;;  %v9677_v12 = vpop.f32.mrb[91].mxu1  ;;  %7620 = vmatpush3.bf16.msra.mxu0 %v9369_v59  ;;  %7668 = vmatpush3.bf16.msra.mxu1 %v9369_v59 }
 0x318   : > { %v3216_v13 = vpack.c.bf16 %v9675_v10, %v9663_v60  ;;  %v3232_v18 = vpack.c.bf16 %v9677_v12, %v9665_v55  ;;  %7621 = vmatprep.subr.bf16.mxu0 %v9386_v33  ;;  %7669 = vmatprep.subr.bf16.mxu1 %v9386_v33  ;;  %v11518_v12 = vpack.c.bf16 %v9669_v35, %v9659_v5 }
 0x319   : > { %7542 = vmatmul.mubr.bf16.gmra.mrb[196].mxu0 %v3207_v14  ;;  %7590 = vmatmul.mubr.bf16.gmra.mrb[196].mxu1 %v3223_v11  ;;  %v11510_v11 = vpack.c.bf16 %v9569_v47, %v9557_v38  ;;  %v11513_v47 = vpack.c.bf16 %v9563_v45, %v9555_v25 }
 0x31a   : > { %7545 = vmatprep.mubr.bf16.mxu0 %v3208_v31  ;;  %7593 = vmatprep.mubr.bf16.mxu1 %v11507_v19  ;;  %v11508_v19 = vpack.c.bf16 %v9529_v27, %v9521_v21 }
 0x31b   : > { %7622 = vmatpush3.bf16.msra.mxu0 %v9386_v33  ;;  %7670 = vmatpush3.bf16.msra.mxu1 %v9386_v33 }
 0x31c   : > { %v9701_v8 = vpop.f32.mrb[92].mxu0  ;;  %v9703_v6 = vpop.f32.mrb[92].mxu1  ;;  %7623 = vmatprep.subr.bf16.mxu0 %v9395_v2  ;;  %7671 = vmatprep.subr.bf16.mxu1 %v9395_v2 }
 0x31d   : > { %v9707_v7 = vpop.f32.mrb[93].mxu0  ;;  %v9709_v9 = vpop.f32.mrb[93].mxu1 }
 0x31e   : > { %v9711_v36 = vpop.f32.mrb[94].mxu0  ;;  %v9713_v14 = vpop.f32.mrb[94].mxu1 }
 0x31f   : > { %v9719_v24 = vpop.f32.mrb[95].mxu0  ;;  %v9721_v30 = vpop.f32.mrb[95].mxu1  ;;  %7624 = vmatpush3.bf16.msra.mxu0 %v9395_v2  ;;  %7672 = vmatpush3.bf16.msra.mxu1 %v9395_v2 }
 0x320   : > { %7625 = vmatprep.subr.bf16.mxu0 %v9412_v3  ;;  %7673 = vmatprep.subr.bf16.mxu1 %v9412_v3 }
 0x321   : > { %7546 = vmatmul.mubr.bf16.gmra.mrb[200].mxu0 %v11508_v19  ;;  %7594 = vmatmul.mubr.bf16.gmra.mrb[200].mxu1 %v11509_v23  ;;  %v11512_v19 = vpack.c.bf16 %v9561_v26, %v9553_v43  ;;  %v11515_v23 = vpack.c.bf16 %v9603_v62, %v9591_v53  ;;  %v11517_v53 = vpack.c.bf16 %v9595_v46, %v9587_v51 }
 0x322   : > { %7549 = vmatprep.mubr.bf16.mxu0 %v11510_v11  ;;  %7597 = vmatprep.mubr.bf16.mxu1 %v11511_v16 }
 0x323   : > { %7626 = vmatpush3.bf16.msra.mxu0 %v9412_v3  ;;  %7674 = vmatpush3.bf16.msra.mxu1 %v9412_v3 }
 0x324   : > { %v9745_v31 = vpop.f32.mrb[96].mxu0  ;;  %v9747_v21 = vpop.f32.mrb[96].mxu1  ;;  %7627 = vmatprep.subr.bf16.mxu0 %v9421_v4  ;;  %7675 = vmatprep.subr.bf16.mxu1 %v9421_v4 }
 0x325   : > { %v9751_v22 = vpop.f32.mrb[97].mxu0  ;;  %v9753_v27 = vpop.f32.mrb[97].mxu1 }
 0x326   : > { %v9755_v28 = vpop.f32.mrb[98].mxu0  ;;  %v9757_v38 = vpop.f32.mrb[98].mxu1 }
 0x327   : > { %v9763_v20 = vpop.f32.mrb[99].mxu0  ;;  %v9765_v11 = vpop.f32.mrb[99].mxu1  ;;  %7628 = vmatpush3.bf16.msra.mxu0 %v9421_v4  ;;  %7676 = vmatpush3.bf16.msra.mxu1 %v9421_v4 }
 0x328   : > { %7629 = vmatprep.subr.bf16.mxu0 %v9446_v32  ;;  %7677 = vmatprep.subr.bf16.mxu1 %v9446_v32 }
 0x329   : > { %7550 = vmatmul.mubr.bf16.gmra.mrb[204].mxu0 %v11512_v19  ;;  %7598 = vmatmul.mubr.bf16.gmra.mrb[204].mxu1 %v11513_v47  ;;  %v11516_v19 = vpack.c.bf16 %v9593_v58, %v9585_v50 }
 0x32a   : > { %7553 = vmatprep.mubr.bf16.mxu0 %v11514_v44  ;;  %7601 = vmatprep.mubr.bf16.mxu1 %v11515_v23 }
 0x32b   : > { %7630 = vmatpush3.bf16.msra.mxu0 %v9446_v32  ;;  %7678 = vmatpush3.bf16.msra.mxu1 %v9446_v32 }
 0x32c   : > { %v9789_v16 = vpop.f32.mrb[100].mxu0  ;;  %v9791_v43 = vpop.f32.mrb[100].mxu1  ;;  %7631 = vmatprep.subr.bf16.mxu0 %v9471_v37  ;;  %7679 = vmatprep.subr.bf16.mxu1 %v9471_v37 }
 0x32d   : > { %v9795_v25 = vpop.f32.mrb[101].mxu0  ;;  %v9797_v26 = vpop.f32.mrb[101].mxu1 }
 0x32e   : > { %v9799_v45 = vpop.f32.mrb[102].mxu0  ;;  %v9801_v49 = vpop.f32.mrb[102].mxu1 }
 0x32f   : > { %v9807_v62 = vpop.f32.mrb[103].mxu0  ;;  %v9809_v44 = vpop.f32.mrb[103].mxu1  ;;  %7632 = vmatpush3.bf16.msra.mxu0 %v9471_v37  ;;  %7680 = vmatpush3.bf16.msra.mxu1 %v9471_v37 }
 0x330   : > { %7713 = vmatprep.subr.bf16.mxu0 %v9310_v39  ;;  %7761 = vmatprep.subr.bf16.mxu1 %v9310_v39 }
 0x331   : > { %7554 = vmatmul.mubr.bf16.gmra.mrb[208].mxu0 %v11516_v19  ;;  %7602 = vmatmul.mubr.bf16.gmra.mrb[208].mxu1 %v11517_v53 }
 0x332   : > { %7557 = vmatprep.mubr.bf16.mxu0 %v3214_v0  ;;  %7605 = vmatprep.mubr.bf16.mxu1 %v3230_v1 }
 0x334   : > { %v9831_v52 = vpop.f32.mrb[104].mxu0  ;;  %v9833_v23 = vpop.f32.mrb[104].mxu1 }
 0x335   : > { %v9835_v47 = vpop.f32.mrb[105].mxu0  ;;  %v9837_v50 = vpop.f32.mrb[105].mxu1 }
 0x336   : > { %v9839_v58 = vpop.f32.mrb[106].mxu0  ;;  %v9841_v46 = vpop.f32.mrb[106].mxu1 }
 0x337   : > { %v3241_v48 = vpack.c.bf16 %v9839_v58, %v9831_v52  ;;  %v3257_v51 = vpack.c.bf16 %v9841_v46, %v9833_v23  ;;  %v9847_v29 = vpop.f32.mrb[107].mxu0  ;;  %v9849_v57 = vpop.f32.mrb[107].mxu1 }
 0x338   : > { %v3240_v34 = vpack.c.bf16 %v9847_v29, %v9835_v47  ;;  %v3256_v0 = vpack.c.bf16 %v9849_v57, %v9837_v50 }
 0x339   : > { %7558 = vmatmul.mubr.bf16.gmra.mrb[212].mxu0 %v3215_v41  ;;  %7606 = vmatmul.mubr.bf16.gmra.mrb[212].mxu1 %v3231_v56 }
 0x33a   : > { %7561 = vmatprep.mubr.bf16.mxu0 %v3216_v13  ;;  %7609 = vmatprep.mubr.bf16.mxu1 %v3232_v18  ;;  %v11519_v13 = vpack.c.bf16 %v9719_v24, %v9707_v7  ;;  %v11520_v18 = vpack.c.bf16 %v9721_v30, %v9709_v9 }
 0x33c   : > { %v9867_v1 = vpop.f32.mrb[108].mxu0  ;;  %v9869_v53 = vpop.f32.mrb[108].mxu1 }
 0x33d   : > { %v9871_v19 = vpop.f32.mrb[109].mxu0  ;;  %v9873_v15 = vpop.f32.mrb[109].mxu1 }
 0x33e   : > { %v9875_v17 = vpop.f32.mrb[110].mxu0  ;;  %v9877_v42 = vpop.f32.mrb[110].mxu1 }
 0x33f   : > { %v9883_v56 = vpop.f32.mrb[111].mxu0  ;;  %v9885_v60 = vpop.f32.mrb[111].mxu1 }
 0x340   : > { %v3242_v55 = vpack.c.bf16 %v9883_v56, %v9871_v19  ;;  %v11533_v19 = vpack.c.bf16 %v9877_v42, %v9869_v53 }
 0x341   : > { %7562 = vmatmul.mubr.bf16.gmra.mrb[216].mxu0 %v3217_v63  ;;  %7610 = vmatmul.mubr.bf16.gmra.mrb[216].mxu1 %v11518_v12  ;;  %v11521_v12 = vpack.c.bf16 %v9711_v36, %v9701_v8  ;;  %v11524_v63 = vpack.c.bf16 %v9765_v11, %v9753_v27 }
 0x342   : > { %7565 = vmatprep.mubr.bf16.mxu0 %v11519_v13  ;;  %7613 = vmatprep.mubr.bf16.mxu1 %v11520_v18  ;;  %v11522_v13 = vpack.c.bf16 %v9713_v14, %v9703_v6  ;;  %v11523_v18 = vpack.c.bf16 %v9763_v20, %v9751_v22  ;;  %v11528_v22 = vpack.c.bf16 %v9809_v44, %v9797_v26 }
 0x344   : > { %v9903_v41 = vpop.f32.mrb[112].mxu0  ;;  %v9905_v54 = vpop.f32.mrb[112].mxu1 }
 0x345   : > { %v9907_v10 = vpop.f32.mrb[113].mxu0  ;;  %v9909_v40 = vpop.f32.mrb[113].mxu1 }
 0x346   : > { %v9911_v61 = vpop.f32.mrb[114].mxu0  ;;  %v9913_v5 = vpop.f32.mrb[114].mxu1 }
 0x347   : > { %v9919_v7 = vpop.f32.mrb[115].mxu0  ;;  %v9921_v9 = vpop.f32.mrb[115].mxu1 }
 0x349   : > { %7566 = vmatmul.mubr.bf16.gmra.mrb[220].mxu0 %v11521_v12  ;;  %7614 = vmatmul.mubr.bf16.gmra.mrb[220].mxu1 %v11522_v13  ;;  %v11525_v12 = vpack.c.bf16 %v9755_v28, %v9745_v31  ;;  %v11526_v13 = vpack.c.bf16 %v9757_v38, %v9747_v21 }
 0x34a   : > { %7633 = vmatprep.mubr.bf16.mxu0 %v11523_v18  ;;  %7681 = vmatprep.mubr.bf16.mxu1 %v11524_v63  ;;  %v11527_v18 = vpack.c.bf16 %v9807_v62, %v9795_v25  ;;  %v11530_v62 = vpack.c.bf16 %v9801_v49, %v9791_v43 }
 0x34c   : > { %v9939_v35 = vpop.f32.mrb[116].mxu0  ;;  %v9941_v24 = vpop.f32.mrb[116].mxu1 }
 0x34d   : > { %v9943_v30 = vpop.f32.mrb[117].mxu0  ;;  %v9945_v8 = vpop.f32.mrb[117].mxu1 }
 0x34e   : > { %v9947_v36 = vpop.f32.mrb[118].mxu0  ;;  %v9949_v6 = vpop.f32.mrb[118].mxu1 }
 0x34f   : > { %v9955_v27 = vpop.f32.mrb[119].mxu0  ;;  %v9957_v20 = vpop.f32.mrb[119].mxu1 }
 0x350   : > { %v3246_v11 = vpack.c.bf16 %v9955_v27, %v9943_v30  ;;  %v3262_v63 = vpack.c.bf16 %v9957_v20, %v9945_v8 }
 0x351   : > { %7634 = vmatmul.mubr.bf16.vlgmr.msra.gmra.mrb[224].mxu0 %v11525_v12  ;;  %7682 = vmatmul.mubr.bf16.vlgmr.msra.gmra.mrb[224].mxu1 %v11526_v13 }
 0x352   : > { %7637 = vmatprep.mubr.bf16.mxu0 %v11527_v18  ;;  %7685 = vmatprep.mubr.bf16.mxu1 %v11528_v22  ;;  %v11529_v18 = vpack.c.bf16 %v9799_v45, %v9789_v16 }
 0x353   : > { %7714 = vmatpush3.bf16.msra.mxu0 %v9310_v39  ;;  %7762 = vmatpush3.bf16.msra.mxu1 %v9310_v39 }
 0x354   : > { %v9977_v14 = vpop.f32.mrb[120].mxu0  ;;  %v9979_v31 = vpop.f32.mrb[120].mxu1  ;;  %7715 = vmatprep.subr.bf16.mxu0 %v9369_v59  ;;  %7763 = vmatprep.subr.bf16.mxu1 %v9369_v59 }
 0x355   : > { %v9983_v21 = vpop.f32.mrb[121].mxu0  ;;  %v9985_v28 = vpop.f32.mrb[121].mxu1 }
 0x356   : > { %v9987_v38 = vpop.f32.mrb[122].mxu0  ;;  %v9989_v25 = vpop.f32.mrb[122].mxu1 }
 0x357   : > { %v9995_v44 = vpop.f32.mrb[123].mxu0  ;;  %v9997_v22 = vpop.f32.mrb[123].mxu1  ;;  %7716 = vmatpush3.bf16.msra.mxu0 %v9369_v59  ;;  %7764 = vmatpush3.bf16.msra.mxu1 %v9369_v59 }
 0x358   : > { %v3248_v12 = vpack.c.bf16 %v9995_v44, %v9983_v21  ;;  %v3264_v13 = vpack.c.bf16 %v9997_v22, %v9985_v28  ;;  %7717 = vmatprep.subr.bf16.mxu0 %v9386_v33  ;;  %7765 = vmatprep.subr.bf16.mxu1 %v9386_v33  ;;  %v10225_v21 = vpop.permute.xlu1 %3451 }
 0x359   : > { %7638 = vmatmul.mubr.bf16.gmra.mrb[228].mxu0 %v11529_v18  ;;  %7686 = vmatmul.mubr.bf16.gmra.mrb[228].mxu1 %v11530_v62  ;;  %v11531_v18 = vpack.c.bf16 %v9885_v60, %v9873_v15  ;;  %v11535_v60 = vpack.c.bf16 %v9921_v9, %v9909_v40  ;;  %11543 = vst [vmem:[#allocation10_spill] sm:$0xff] %v10225_v21 }
 0x35a   : > { %7641 = vmatprep.mubr.bf16.mxu0 %v3240_v34  ;;  %7689 = vmatprep.mubr.bf16.mxu1 %v3256_v0 }
 0x35b   : > { %7718 = vmatpush3.bf16.msra.mxu0 %v9386_v33  ;;  %7766 = vmatpush3.bf16.msra.mxu1 %v9386_v33 }
 0x35c   : > { %v10021_v26 = vpop.f32.mrb[124].mxu0  ;;  %v10023_v16 = vpop.f32.mrb[124].mxu1  ;;  %7719 = vmatprep.subr.bf16.mxu0 %v9395_v2  ;;  %7767 = vmatprep.subr.bf16.mxu1 %v9395_v2 }
 0x35d   : > { %v10027_v43 = vpop.f32.mrb[125].mxu0  ;;  %v10029_v45 = vpop.f32.mrb[125].mxu1 }
 0x35e   : > { %v10031_v49 = vpop.f32.mrb[126].mxu0  ;;  %v10033_v47 = vpop.f32.mrb[126].mxu1 }
 0x35f   : > { %v3251_v50 = vpack.c.bf16 %v10031_v49, %v10021_v26  ;;  %v10039_v57 = vpop.f32.mrb[127].mxu0  ;;  %v10041_v34 = vpop.f32.mrb[127].mxu1  ;;  %7720 = vmatpush3.bf16.msra.mxu0 %v9395_v2  ;;  %7768 = vmatpush3.bf16.msra.mxu1 %v9395_v2 }
 0x360   : > { %v3250_v0 = vpack.c.bf16 %v10039_v57, %v10027_v43  ;;  %v3266_v62 = vpack.c.bf16 %v10041_v34, %v10029_v45  ;;  %7721 = vmatprep.subr.bf16.mxu0 %v9412_v3  ;;  %7769 = vmatprep.subr.bf16.mxu1 %v9412_v3 }
 0x361   : > { %7642 = vmatmul.mubr.bf16.gmra.mrb[232].mxu0 %v3241_v48  ;;  %7690 = vmatmul.mubr.bf16.gmra.mrb[232].mxu1 %v3257_v51  ;;  %v11534_v51 = vpack.c.bf16 %v9919_v7, %v9907_v10  ;;  %v11537_v7 = vpack.c.bf16 %v9913_v5, %v9905_v54 }
 0x362   : > { %7645 = vmatprep.mubr.bf16.mxu0 %v3242_v55  ;;  %7693 = vmatprep.mubr.bf16.mxu1 %v11531_v18  ;;  %v11532_v18 = vpack.c.bf16 %v9875_v17, %v9867_v1 }
 0x363   : > { %7722 = vmatpush3.bf16.msra.mxu0 %v9412_v3  ;;  %7770 = vmatpush3.bf16.msra.mxu1 %v9412_v3 }
 0x364   : > { %v10065_v29 = vpop.f32.mrb[128].mxu0  ;;  %v10067_v52 = vpop.f32.mrb[128].mxu1  ;;  %7723 = vmatprep.subr.bf16.mxu0 %v9421_v4  ;;  %7771 = vmatprep.subr.bf16.mxu1 %v9421_v4 }
 0x365   : > { %v10071_v23 = vpop.f32.mrb[129].mxu0  ;;  %v10073_v58 = vpop.f32.mrb[129].mxu1 }
 0x366   : > { %v10075_v46 = vpop.f32.mrb[130].mxu0  ;;  %v10077_v48 = vpop.f32.mrb[130].mxu1 }
 0x367   : > { %v10083_v15 = vpop.f32.mrb[131].mxu0  ;;  %v10085_v56 = vpop.f32.mrb[131].mxu1  ;;  %7724 = vmatpush3.bf16.msra.mxu0 %v9421_v4  ;;  %7772 = vmatpush3.bf16.msra.mxu1 %v9421_v4 }
 0x368   : > { %7725 = vmatprep.subr.bf16.mxu0 %v9446_v32  ;;  %7773 = vmatprep.subr.bf16.mxu1 %v9446_v32  ;;  %v11545_v57 = vpack.c.bf16 %v10083_v15, %v10071_v23  ;;  %v11546_v45 = vpack.c.bf16 %v10085_v56, %v10073_v58  ;;  %v11549_v23 = vpack.c.bf16 %v10077_v48, %v10067_v52 }
 0x369   : > { %7646 = vmatmul.mubr.bf16.gmra.mrb[236].mxu0 %v11532_v18  ;;  %7694 = vmatmul.mubr.bf16.gmra.mrb[236].mxu1 %v11533_v19  ;;  %v11536_v18 = vpack.c.bf16 %v9911_v61, %v9903_v41 }
 0x36a   : > { %7649 = vmatprep.mubr.bf16.mxu0 %v11534_v51  ;;  %7697 = vmatprep.mubr.bf16.mxu1 %v11535_v60 }
 0x36b   : > { %7726 = vmatpush3.bf16.msra.mxu0 %v9446_v32  ;;  %7774 = vmatpush3.bf16.msra.mxu1 %v9446_v32 }
 0x36c   : > { %v10109_v55 = vpop.f32.mrb[132].mxu0  ;;  %v10111_v1 = vpop.f32.mrb[132].mxu1  ;;  %7727 = vmatprep.subr.bf16.mxu0 %v9471_v37  ;;  %7775 = vmatprep.subr.bf16.mxu1 %v9471_v37 }
 0x36d   : > { %v10115_v53 = vpop.f32.mrb[133].mxu0  ;;  %v10117_v17 = vpop.f32.mrb[133].mxu1 }
 0x36e   : > { %v10119_v42 = vpop.f32.mrb[134].mxu0  ;;  %v10121_v10 = vpop.f32.mrb[134].mxu1 }
 0x36f   : > { %v10127_v9 = vpop.f32.mrb[135].mxu0  ;;  %v10129_v51 = vpop.f32.mrb[135].mxu1  ;;  %7728 = vmatpush3.bf16.msra.mxu0 %v9471_v37  ;;  %7776 = vmatpush3.bf16.msra.mxu1 %v9471_v37 }
 0x370   : > { %7809 = vmatprep.subr.bf16.mxu0 %v9310_v39  ;;  %7857 = vmatprep.subr.bf16.mxu1 %v9310_v39  ;;  %v11550_v58 = vpack.c.bf16 %v10127_v9, %v10115_v53  ;;  %v11551_v22 = vpack.c.bf16 %v10129_v51, %v10117_v17 }
 0x371   : > { %7650 = vmatmul.mubr.bf16.gmra.mrb[240].mxu0 %v11536_v18  ;;  %7698 = vmatmul.mubr.bf16.gmra.mrb[240].mxu1 %v11537_v7  ;;  %v11539_v7 = vpack.c.bf16 %v9949_v6, %v9941_v24 }
 0x372   : > { %7653 = vmatprep.mubr.bf16.mxu0 %v3246_v11  ;;  %7701 = vmatprep.mubr.bf16.mxu1 %v3262_v63  ;;  %v11538_v63 = vpack.c.bf16 %v9947_v36, %v9939_v35 }
 0x374   : > { %v10151_v40 = vpop.f32.mrb[136].mxu0  ;;  %v10153_v60 = vpop.f32.mrb[136].mxu1 }
 0x375   : > { %v10155_v19 = vpop.f32.mrb[137].mxu0  ;;  %v10157_v41 = vpop.f32.mrb[137].mxu1 }
 0x376   : > { %v10159_v61 = vpop.f32.mrb[138].mxu0  ;;  %v10161_v54 = vpop.f32.mrb[138].mxu1 }
 0x377   : > { %v10167_v8 = vpop.f32.mrb[139].mxu0  ;;  %v10169_v27 = vpop.f32.mrb[139].mxu1 }
 0x378   : > { %v3272_v20 = vpack.c.bf16 %v10167_v8, %v10155_v19 }
 0x379   : > { %7654 = vmatmul.mubr.bf16.gmra.mrb[244].mxu0 %v11538_v63  ;;  %7702 = vmatmul.mubr.bf16.gmra.mrb[244].mxu1 %v11539_v7  ;;  %v11541_v63 = vpack.c.bf16 %v9989_v25, %v9979_v31  ;;  %v10223_v7 = vpop.permute.xlu0 %3446 }
 0x37a   : > { %7657 = vmatprep.mubr.bf16.mxu0 %v3248_v12  ;;  %7705 = vmatprep.mubr.bf16.mxu1 %v3264_v13  ;;  %v11540_v13 = vpack.c.bf16 %v9987_v38, %v9977_v14  ;;  %11542 = vst [vmem:[#allocation9_spill] sm:$0xff] %v10223_v7  ;;  %v10265_v12 = vpop.permute.xlu1 %3371 }
 0x37c   : > { %v10187_v18 = vpop.f32.mrb[140].mxu0  ;;  %v10189_v30 = vpop.f32.mrb[140].mxu1 }
 0x37d   : > { %v10191_v5 = vpop.f32.mrb[141].mxu0  ;;  %v10193_v35 = vpop.f32.mrb[141].mxu1 }
 0x37e   : > { %v10195_v36 = vpop.f32.mrb[142].mxu0  ;;  %v10197_v24 = vpop.f32.mrb[142].mxu1 }
 0x37f   : > { %v10203_v28 = vpop.f32.mrb[143].mxu0  ;;  %v10205_v44 = vpop.f32.mrb[143].mxu1 }
 0x380   : > { %v10305_v11 = vpop.permute.xlu1 %3461  ;;  %v11562_v8 = vpack.c.bf16 %v10205_v44, %v10193_v35 }
 0x381   : > { %7658 = vmatmul.mubr.bf16.gmra.mrb[248].mxu0 %v11540_v13  ;;  %7706 = vmatmul.mubr.bf16.gmra.mrb[248].mxu1 %v11541_v63  ;;  %v11544_v63 = vpack.c.bf16 %v10033_v47, %v10023_v16  ;;  %11553 = vst [vmem:[#allocation13_spill] sm:$0xff] %v10305_v11 }
 0x382   : > { %7661 = vmatprep.mubr.bf16.mxu0 %v3250_v0  ;;  %7709 = vmatprep.mubr.bf16.mxu1 %v3266_v62  ;;  %v10263_v62 = vpop.permute.xlu0 %3366 }
 0x383   : > { %11547 = vst [vmem:[#allocation11_spill] sm:$0xff] %v10263_v62 }
 0x384   : > { %v10227_v6 = vpop.f32.mrb[144].mxu0  ;;  %v10229_v14 = vpop.f32.mrb[144].mxu1 }
 0x385   : > { %v10231_v38 = vpop.f32.mrb[145].mxu0  ;;  %v10233_v31 = vpop.f32.mrb[145].mxu1 }
 0x386   : > { %v10235_v25 = vpop.f32.mrb[146].mxu0  ;;  %v10237_v43 = vpop.f32.mrb[146].mxu1 }
 0x387   : > { %v10243_v34 = vpop.f32.mrb[147].mxu0  ;;  %v10245_v0 = vpop.f32.mrb[147].mxu1 }
 0x389   : > { %7662 = vmatmul.mubr.bf16.gmra.mrb[252].mxu0 %v3251_v50  ;;  %7710 = vmatmul.mubr.bf16.gmra.mrb[252].mxu1 %v11544_v63  ;;  %v11548_v63 = vpack.c.bf16 %v10075_v46, %v10065_v29 }
 0x38a   : > { %7729 = vmatprep.mubr.bf16.mxu0 %v11545_v57  ;;  %7777 = vmatprep.mubr.bf16.mxu1 %v11546_v45  ;;  %v10303_v45 = vpop.permute.xlu0 %3456 }
 0x38b   : > { %11552 = vst [vmem:[#allocation12_spill] sm:$0xff] %v10303_v45 }
 0x38c   : > { %v10267_v13 = vpop.f32.mrb[148].mxu0  ;;  %v10269_v26 = vpop.f32.mrb[148].mxu1 }
 0x38d   : > { %v10271_v49 = vpop.f32.mrb[149].mxu0  ;;  %v10273_v16 = vpop.f32.mrb[149].mxu1 }
 0x38e   : > { %v10275_v47 = vpop.f32.mrb[150].mxu0  ;;  %v10277_v50 = vpop.f32.mrb[150].mxu1 }
 0x38f   : > { %v10283_v15 = vpop.f32.mrb[151].mxu0  ;;  %v10285_v56 = vpop.f32.mrb[151].mxu1 }
 0x390   : > { %v3294_v57 = vpack.c.bf16 %v10285_v56, %v10273_v16  ;;  %v10351_v9 = vpop.permute.xlu0 %3376  ;;  %v11575_v16 = vpack.c.bf16 %v10277_v50, %v10269_v26 }
 0x391   : > { %7730 = vmatmul.mubr.bf16.vlgmr.msra.gmra.mrb[0].mxu0 %v11548_v63  ;;  %7778 = vmatmul.mubr.bf16.vlgmr.msra.gmra.mrb[0].mxu1 %v11549_v23  ;;  %v11554_v63 = vpack.c.bf16 %v10119_v42, %v10109_v55  ;;  %11557 = vst [vmem:[#allocation14_spill] sm:$0xff] %v10351_v9 }
 0x392   : > { %7733 = vmatprep.mubr.bf16.mxu0 %v11550_v58  ;;  %7781 = vmatprep.mubr.bf16.mxu1 %v11551_v22  ;;  %v10353_v58 = vpop.permute.xlu1 %3381 }
 0x393   : > { %7810 = vmatpush3.bf16.msra.mxu0 %v9310_v39  ;;  %7858 = vmatpush3.bf16.msra.mxu1 %v9310_v39  ;;  %v11555_v39 = vpack.c.bf16 %v10121_v10, %v10111_v1  ;;  %11558 = vst [vmem:[#allocation15_spill] sm:$0xff] %v10353_v58 }
 0x394   : > { %v10309_v29 = vpop.f32.mrb[152].mxu0  ;;  %v10311_v52 = vpop.f32.mrb[152].mxu1  ;;  %7811 = vmatprep.subr.bf16.mxu0 %v9369_v59  ;;  %7859 = vmatprep.subr.bf16.mxu1 %v9369_v59 }
 0x395   : > { %v10315_v46 = vpop.f32.mrb[153].mxu0  ;;  %v10317_v48 = vpop.f32.mrb[153].mxu1 }
 0x396   : > { %v10319_v53 = vpop.f32.mrb[154].mxu0  ;;  %v10321_v17 = vpop.f32.mrb[154].mxu1 }
 0x397   : > { %v10327_v51 = vpop.f32.mrb[155].mxu0  ;;  %v10329_v22 = vpop.f32.mrb[155].mxu1  ;;  %7812 = vmatpush3.bf16.msra.mxu0 %v9369_v59  ;;  %7860 = vmatpush3.bf16.msra.mxu1 %v9369_v59  ;;  %v11556_v59 = vpack.c.bf16 %v10169_v27, %v10157_v41 }
 0x398   : > { %v3280_v23 = vpack.c.bf16 %v10327_v51, %v10315_v46  ;;  %7813 = vmatprep.subr.bf16.mxu0 %v9386_v33  ;;  %7861 = vmatprep.subr.bf16.mxu1 %v9386_v33 }
 0x399   : > { %7734 = vmatmul.mubr.bf16.gmra.mrb[4].mxu0 %v11554_v63  ;;  %7782 = vmatmul.mubr.bf16.gmra.mrb[4].mxu1 %v11555_v39  ;;  %v10399_v63 = vpop.permute.xlu0 %3466  ;;  %v10401_v39 = vpop.permute.xlu1 %3471 }
 0x39a   : > { %7737 = vmatprep.mubr.bf16.mxu0 %v3272_v20  ;;  %7785 = vmatprep.mubr.bf16.mxu1 %v11556_v59  ;;  %v11559_v59 = vpack.c.bf16 %v10159_v61, %v10151_v40  ;;  %11563 = vst [vmem:[#allocation16_spill] sm:$0xff] %v10399_v63  ;;  %11564 = vst [vmem:[#allocation17_spill] sm:$0xff] %v10401_v39 }
 0x39b   : > { %7814 = vmatpush3.bf16.msra.mxu0 %v9386_v33  ;;  %7862 = vmatpush3.bf16.msra.mxu1 %v9386_v33  ;;  %v11560_v33 = vpack.c.bf16 %v10161_v54, %v10153_v60 }
 0x39c   : > { %v10357_v55 = vpop.f32.mrb[156].mxu0  ;;  %v10359_v1 = vpop.f32.mrb[156].mxu1  ;;  %7815 = vmatprep.subr.bf16.mxu0 %v9395_v2  ;;  %7863 = vmatprep.subr.bf16.mxu1 %v9395_v2 }
 0x39d   : > { %v10363_v42 = vpop.f32.mrb[157].mxu0  ;;  %v10365_v10 = vpop.f32.mrb[157].mxu1 }
 0x39e   : > { %v10367_v19 = vpop.f32.mrb[158].mxu0  ;;  %v10369_v41 = vpop.f32.mrb[158].mxu1 }
 0x39f   : > { %v10375_v27 = vpop.f32.mrb[159].mxu0  ;;  %v10377_v20 = vpop.f32.mrb[159].mxu1  ;;  %7816 = vmatpush3.bf16.msra.mxu0 %v9395_v2  ;;  %7864 = vmatpush3.bf16.msra.mxu1 %v9395_v2  ;;  %v11561_v2 = vpack.c.bf16 %v10203_v28, %v10191_v5  ;;  %v11568_v28 = vpack.c.bf16 %v10245_v0, %v10233_v31 }
 0x3a0   : > { %7817 = vmatprep.subr.bf16.mxu0 %v9412_v3  ;;  %7865 = vmatprep.subr.bf16.mxu1 %v9412_v3  ;;  %v11579_v51 = vpack.c.bf16 %v10375_v27, %v10363_v42 }
 0x3a1   : > { %7738 = vmatmul.mubr.bf16.gmra.mrb[8].mxu0 %v11559_v59  ;;  %7786 = vmatmul.mubr.bf16.gmra.mrb[8].mxu1 %v11560_v33  ;;  %v8293_v33 = vld [vmem:[%s11452_s4 + $0x28] sm:$0xff]   ;;  %v10451_v59 = vpop.permute.xlu1 %3391 }
 0x3a2   : > { %7741 = vmatprep.mubr.bf16.mxu0 %v11561_v2  ;;  %7789 = vmatprep.mubr.bf16.mxu1 %v11562_v8  ;;  %v10449_v2 = vpop.permute.xlu0 %3386 }
 0x3a3   : > { %7818 = vmatpush3.bf16.msra.mxu0 %v9412_v3  ;;  %7866 = vmatpush3.bf16.msra.mxu1 %v9412_v3  ;;  %v11565_v3 = vpack.c.bf16 %v10195_v36, %v10187_v18 }
 0x3a4   : > { %v10405_v40 = vpop.f32.mrb[160].mxu0  ;;  %v10407_v60 = vpop.f32.mrb[160].mxu1  ;;  %7819 = vmatprep.subr.bf16.mxu0 %v9421_v4  ;;  %7867 = vmatprep.subr.bf16.mxu1 %v9421_v4 }
 0x3a5   : > { %v10411_v61 = vpop.f32.mrb[161].mxu0  ;;  %v10413_v54 = vpop.f32.mrb[161].mxu1 }
 0x3a6   : > { %v10415_v5 = vpop.f32.mrb[162].mxu0  ;;  %v10417_v35 = vpop.f32.mrb[162].mxu1 }
 0x3a7   : > { %v10423_v44 = vpop.f32.mrb[163].mxu0  ;;  %v10425_v8 = vpop.f32.mrb[163].mxu1  ;;  %7820 = vmatpush3.bf16.msra.mxu0 %v9421_v4  ;;  %7868 = vmatpush3.bf16.msra.mxu1 %v8293_v33  ;;  %v11566_v4 = vpack.c.bf16 %v10197_v24, %v10189_v30  ;;  %v11567_v33 = vpack.c.bf16 %v10243_v34, %v10231_v38  ;;  %v11570_v34 = vpack.c.bf16 %v10237_v43, %v10229_v14 }
 0x3a8   : > { %7821 = vmatprep.subr.bf16.mxu0 %v9446_v32  ;;  %7869 = vmatprep.subr.bf16.mxu1 %v9446_v32  ;;  %v11585_v27 = vpack.c.bf16 %v10423_v44, %v10411_v61 }
 0x3a9   : > { %7742 = vmatmul.mubr.bf16.gmra.mrb[12].mxu0 %v11565_v3  ;;  %7790 = vmatmul.mubr.bf16.gmra.mrb[12].mxu1 %v11566_v4  ;;  %v8294_v3 = vld [vmem:[%s11452_s4 + $0x38] sm:$0xff]   ;;  %v10499_v4 = vpop.permute.xlu1 %3481 }
 0x3aa   : > { %7745 = vmatprep.mubr.bf16.mxu0 %v11567_v33  ;;  %7793 = vmatprep.mubr.bf16.mxu1 %v11568_v28  ;;  %11573 = vst [vmem:[#allocation19_spill] sm:$0xff] %v10499_v4  ;;  %v11580_v4 = vpack.c.bf16 %v10377_v20, %v10365_v10  ;;  %v11584_v10 = vpack.c.bf16 %v10369_v41, %v10359_v1 }
 0x3ab   : > { %7822 = vmatpush3.bf16.msra.mxu0 %v9446_v32  ;;  %7870 = vmatpush3.bf16.msra.mxu1 %v9446_v32  ;;  %v11569_v32 = vpack.c.bf16 %v10235_v25, %v10227_v6 }
 0x3ac   : > { %v10455_v18 = vpop.f32.mrb[164].mxu0  ;;  %v10457_v30 = vpop.f32.mrb[164].mxu1  ;;  %7823 = vmatprep.subr.bf16.mxu0 %v9471_v37  ;;  %7871 = vmatprep.subr.bf16.mxu1 %v9471_v37 }
 0x3ad   : > { %v10461_v36 = vpop.f32.mrb[165].mxu0  ;;  %v10463_v24 = vpop.f32.mrb[165].mxu1 }
 0x3ae   : > { %v10465_v38 = vpop.f32.mrb[166].mxu0  ;;  %v10467_v31 = vpop.f32.mrb[166].mxu1 }
 0x3af   : > { %v10473_v0 = vpop.f32.mrb[167].mxu0  ;;  %v10475_v28 = vpop.f32.mrb[167].mxu1  ;;  %7824 = vmatpush3.bf16.msra.mxu0 %v9471_v37  ;;  %7872 = vmatpush3.bf16.msra.mxu1 %v8294_v3  ;;  %v11571_v37 = vpack.c.bf16 %v10283_v15, %v10271_v49  ;;  %v11576_v15 = vpack.c.bf16 %v10329_v22, %v10317_v48  ;;  %v11578_v48 = vpack.c.bf16 %v10321_v17, %v10311_v52 }
 0x3b0   : > { %v10497_v3 = vpop.permute.xlu0 %3476  ;;  %v10539_v39 = vpop.permute.xlu1 %3401 }
 0x3b1   : > { %7746 = vmatmul.mubr.bf16.gmra.mrb[16].mxu0 %v11569_v32  ;;  %7794 = vmatmul.mubr.bf16.gmra.mrb[16].mxu1 %v11570_v34  ;;  %11572 = vst [vmem:[#allocation18_spill] sm:$0xff] %v10497_v3  ;;  %v11590_v3 = vpack.c.bf16 %v10475_v28, %v10463_v24  ;;  %v11594_v24 = vpack.c.bf16 %v10467_v31, %v10457_v30 }
 0x3b2   : > { %7749 = vmatprep.mubr.bf16.mxu0 %v11571_v37  ;;  %7797 = vmatprep.mubr.bf16.mxu1 %v3294_v57  ;;  %v11574_v37 = vpack.c.bf16 %v10275_v47, %v10267_v13 }
 0x3b4   : > { %v10501_v33 = vpop.f32.mrb[168].mxu0  ;;  %v10503_v6 = vpop.f32.mrb[168].mxu1 }
 0x3b5   : > { %v10505_v25 = vpop.f32.mrb[169].mxu0  ;;  %v10507_v14 = vpop.f32.mrb[169].mxu1 }
 0x3b6   : > { %v10509_v43 = vpop.f32.mrb[170].mxu0  ;;  %v10511_v49 = vpop.f32.mrb[170].mxu1 }
 0x3b7   : > { %v10517_v56 = vpop.f32.mrb[171].mxu0  ;;  %v10519_v57 = vpop.f32.mrb[171].mxu1 }
 0x3b8   : > { %v10537_v34 = vpop.permute.xlu0 %3396  ;;  %v10579_v63 = vpop.permute.xlu1 %3491 }
 0x3b9   : > { %7750 = vmatmul.mubr.bf16.gmra.mrb[20].mxu0 %v11574_v37  ;;  %7798 = vmatmul.mubr.bf16.gmra.mrb[20].mxu1 %v11575_v16  ;;  %v11577_v37 = vpack.c.bf16 %v10319_v53, %v10309_v29  ;;  %11582 = vst [vmem:[#allocation21_spill] sm:$0xff] %v10579_v63  ;;  %v11586_v63 = vpack.c.bf16 %v10425_v8, %v10413_v54 }
 0x3ba   : > { %7753 = vmatprep.mubr.bf16.mxu0 %v3280_v23  ;;  %7801 = vmatprep.mubr.bf16.mxu1 %v11576_v15  ;;  %v11588_v54 = vpack.c.bf16 %v10417_v35, %v10407_v60 }
 0x3bc   : > { %v10541_v32 = vpop.f32.mrb[172].mxu0  ;;  %v10543_v13 = vpop.f32.mrb[172].mxu1 }
 0x3bd   : > { %v10545_v47 = vpop.f32.mrb[173].mxu0  ;;  %v10547_v26 = vpop.f32.mrb[173].mxu1 }
 0x3be   : > { %v10549_v50 = vpop.f32.mrb[174].mxu0  ;;  %v10551_v46 = vpop.f32.mrb[174].mxu1 }
 0x3bf   : > { %v10557_v22 = vpop.f32.mrb[175].mxu0  ;;  %v10559_v23 = vpop.f32.mrb[175].mxu1 }
 0x3c0   : > { %v10577_v16 = vpop.permute.xlu0 %3486 }
 0x3c1   : > { %7754 = vmatmul.mubr.bf16.gmra.mrb[24].mxu0 %v11577_v37  ;;  %7802 = vmatmul.mubr.bf16.gmra.mrb[24].mxu1 %v11578_v48  ;;  %11581 = vst [vmem:[#allocation20_spill] sm:$0xff] %v10577_v16  ;;  %v11583_v37 = vpack.c.bf16 %v10367_v19, %v10357_v55  ;;  %v10619_v16 = vpop.permute.xlu1 %3411 }
 0x3c2   : > { %7757 = vmatprep.mubr.bf16.mxu0 %v11579_v51  ;;  %7805 = vmatprep.mubr.bf16.mxu1 %v11580_v4 }
 0x3c4   : > { %v10581_v15 = vpop.f32.mrb[176].mxu0  ;;  %v10583_v29 = vpop.f32.mrb[176].mxu1 }
 0x3c5   : > { %v10585_v53 = vpop.f32.mrb[177].mxu0  ;;  %v10587_v52 = vpop.f32.mrb[177].mxu1 }
 0x3c6   : > { %v10589_v17 = vpop.f32.mrb[178].mxu0  ;;  %v10591_v42 = vpop.f32.mrb[178].mxu1 }
 0x3c7   : > { %v10597_v20 = vpop.f32.mrb[179].mxu0  ;;  %v10599_v4 = vpop.f32.mrb[179].mxu1 }
 0x3c8   : > { %v10617_v48 = vpop.permute.xlu0 %3406  ;;  %v10659_v21 = vpop.permute.xlu1 %3501 }
 0x3c9   : > { %7758 = vmatmul.mubr.bf16.gmra.mrb[28].mxu0 %v11583_v37  ;;  %7806 = vmatmul.mubr.bf16.gmra.mrb[28].mxu1 %v11584_v10  ;;  %v11587_v37 = vpack.c.bf16 %v10415_v5, %v10405_v40  ;;  %11592 = vst [vmem:[#allocation23_spill] sm:$0xff] %v10659_v21  ;;  %v11596_v21 = vpack.c.bf16 %v10519_v57, %v10507_v14 }
 0x3ca   : > { %7825 = vmatprep.mubr.bf16.mxu0 %v11585_v27  ;;  %7873 = vmatprep.mubr.bf16.mxu1 %v11586_v63  ;;  %v11589_v63 = vpack.c.bf16 %v10473_v0, %v10461_v36  ;;  %v11595_v0 = vpack.c.bf16 %v10517_v56, %v10505_v25  ;;  %v11602_v14 = vpack.c.bf16 %v10511_v49, %v10503_v6 }
 0x3cc   : > { %v10621_v51 = vpop.f32.mrb[180].mxu0  ;;  %v10623_v55 = vpop.f32.mrb[180].mxu1 }
 0x3cd   : > { %v10625_v19 = vpop.f32.mrb[181].mxu0  ;;  %v10627_v1 = vpop.f32.mrb[181].mxu1 }
 0x3ce   : > { %v10629_v41 = vpop.f32.mrb[182].mxu0  ;;  %v10631_v61 = vpop.f32.mrb[182].mxu1 }
 0x3cf   : > { %v10637_v44 = vpop.f32.mrb[183].mxu0  ;;  %v10639_v8 = vpop.f32.mrb[183].mxu1 }
 0x3d0   : > { %v10657_v10 = vpop.permute.xlu0 %3496 }
 0x3d1   : > { %7826 = vmatmul.mubr.bf16.vlgmr.msra.gmra.mrb[32].mxu0 %v11587_v37  ;;  %7874 = vmatmul.mubr.bf16.vlgmr.msra.gmra.mrb[32].mxu1 %v11588_v54  ;;  %11591 = vst [vmem:[#allocation22_spill] sm:$0xff] %v10657_v10  ;;  %v11593_v37 = vpack.c.bf16 %v10465_v38, %v10455_v18  ;;  %v10699_v10 = vpop.permute.xlu1 %3421 }
 0x3d2   : > { %7829 = vmatprep.mubr.bf16.mxu0 %v11589_v63  ;;  %7877 = vmatprep.mubr.bf16.mxu1 %v11590_v3 }
 0x3d4   : > { %v10661_v27 = vpop.f32.mrb[184].mxu0  ;;  %v10663_v40 = vpop.f32.mrb[184].mxu1 }
 0x3d5   : > { %v10665_v5 = vpop.f32.mrb[185].mxu0  ;;  %v10667_v60 = vpop.f32.mrb[185].mxu1 }
 0x3d6   : > { %v10669_v35 = vpop.f32.mrb[186].mxu0  ;;  %v10671_v36 = vpop.f32.mrb[186].mxu1 }
 0x3d7   : > { %v10677_v28 = vpop.f32.mrb[187].mxu0  ;;  %v10679_v3 = vpop.f32.mrb[187].mxu1 }
 0x3d8   : > { %v10697_v54 = vpop.permute.xlu0 %3416 }
 0x3d9   : > { %7830 = vmatmul.mubr.bf16.gmra.mrb[36].mxu0 %v11593_v37  ;;  %7878 = vmatmul.mubr.bf16.gmra.mrb[36].mxu1 %v11594_v24  ;;  %v11601_v37 = vpack.c.bf16 %v10509_v43, %v10501_v33 }
 0x3da   : > { %7833 = vmatprep.mubr.bf16.mxu0 %v11595_v0  ;;  %7881 = vmatprep.mubr.bf16.mxu1 %v11596_v21  ;;  %v11603_v21 = vpack.c.bf16 %v10557_v22, %v10545_v47 }
 0x3dc   : > { %v10701_v63 = vpop.f32.mrb[188].mxu0  ;;  %v10703_v18 = vpop.f32.mrb[188].mxu1 }
 0x3dd   : > { %11597 = vst [vmem:[#allocation24_spill] sm:$0xff] %v10701_v63  ;;  %11598 = vst [vmem:[#allocation25_spill] sm:$0xff] %v10703_v18  ;;  %v10705_v38 = vpop.f32.mrb[189].mxu0  ;;  %v10707_v30 = vpop.f32.mrb[189].mxu1  ;;  %v11604_v18 = vpack.c.bf16 %v10559_v23, %v10547_v26 }
 0x3de   : > { %v10709_v31 = vpop.f32.mrb[190].mxu0  ;;  %v10711_v25 = vpop.f32.mrb[190].mxu1 }
 0x3df   : > { %11599 = vst [vmem:[#allocation26_spill] sm:$0xff] %v10709_v31  ;;  %11600 = vst [vmem:[#allocation27_spill] sm:$0xff] %v10711_v25  ;;  %v10717_v56 = vpop.f32.mrb[191].mxu0  ;;  %v10719_v57 = vpop.f32.mrb[191].mxu1 }
 0x3e0   : > { %v10737_v24 = vpop.permute.xlu0 %3506  ;;  %v10739_v25 = vpop.permute.xlu1 %3511 }
 0x3e1   : > { %7834 = vmatmul.mubr.bf16.gmra.mrb[40].mxu0 %v11601_v37  ;;  %7882 = vmatmul.mubr.bf16.gmra.mrb[40].mxu1 %v11602_v14  ;;  %11605 = vst [vmem:[#allocation28_spill] sm:$0xff] %v10737_v24  ;;  %11606 = vst [vmem:[#allocation29_spill] sm:$0xff] %v10739_v25 }
 0x3e2   : > { %7837 = vmatprep.mubr.bf16.mxu0 %v11603_v21  ;;  %7885 = vmatprep.mubr.bf16.mxu1 %v11604_v18 }
 0x3e4   : > { %v7539_v0 = vpop.f32.mrb[192].mxu0  ;;  %v7587_v63 = vpop.f32.mrb[192].mxu1 }
 0x3e5   : > { %v3615_v33 = vadd.f32 %v7539_v0, %v10351_v9  ;;  %v3776_v43 = vadd.f32 %v7587_v63, %v10351_v9  ;;  %v3606_v6 = vpop.f32.mrb[193].mxu0  ;;  %v3767_v49 = vpop.f32.mrb[193].mxu1 }
 0x3e6   : > { %v3607_v14 = vadd.f32 %v3606_v6, %v10263_v62  ;;  %v3768_v47 = vadd.f32 %v3767_v49, %v10263_v62  ;;  %v7540_v22 = vpop.f32.mrb[194].mxu0  ;;  %v7588_v21 = vpop.f32.mrb[194].mxu1  ;;  %v11607_v6 = vpack.c.bf16 %v10549_v50, %v10541_v32  ;;  %v11608_v49 = vpack.c.bf16 %v10551_v46, %v10543_v13 }
 0x3e7   : > { %v3618_v26 = vadd.f32 %v7540_v22, %v10353_v58  ;;  %v3779_v23 = vadd.f32 %v7588_v21, %v10353_v58  ;;  %v3609_v18 = vpop.f32.mrb[195].mxu0  ;;  %v3770_v37 = vpop.f32.mrb[195].mxu1  ;;  %v4862_v24 = vmax.f32 %v3615_v33, 0.0  ;;  %v4894_v63 = vmax.f32 %v3776_v43, 0.0 }
 0x3e8   : > { %v3610_v25 = vadd.f32 %v3609_v18, %v10265_v12  ;;  %v3771_v0 = vadd.f32 %v3770_v37, %v10265_v12  ;;  %v4860_v22 = vmax.f32 %v3607_v14, 0.0  ;;  %v4892_v21 = vmax.f32 %v3768_v47, 0.0  ;;  %v10761_v43 = vpop.permute.xlu0 %3426  ;;  %v10763_v32 = vpop.permute.xlu1 %3431 }
 0x3e9   : > { %v4863_v9 = vmax.f32 %v3618_v26, 0.0  ;;  %v4895_v31 = vmax.f32 %v3779_v23, 0.0  ;;  %7838 = vmatmul.mubr.bf16.gmra.mrb[44].mxu0 %v11607_v6  ;;  %7886 = vmatmul.mubr.bf16.gmra.mrb[44].mxu1 %v11608_v49  ;;  %v11609_v18 = vpack.c.bf16 %v10597_v20, %v10585_v53  ;;  %v11610_v33 = vpack.c.bf16 %v10599_v4, %v10587_v52 }
 0x3ea   : > { %v4861_v58 = vmax.f32 %v3610_v25, 0.0  ;;  %v4893_v62 = vmax.f32 %v3771_v0, 0.0 }
 0x3eb   : > { %7841 = vmatprep.mubr.bf16.mxu0 %v11609_v18  ;;  %7889 = vmatprep.mubr.bf16.mxu1 %v11610_v33  ;;  %v10765_v50 = vpack.c.bf16 %v4863_v9, %v4862_v24  ;;  %v10767_v13 = vpack.c.bf16 %v4895_v31, %v4894_v63  ;;  %v11611_v18 = vpack.c.bf16 %v10589_v17, %v10581_v15 }
 0x3ec   : > { %v10769_v46 = vpack.c.bf16 %v4861_v58, %v4860_v22  ;;  %v10771_v25 = vpack.c.bf16 %v4893_v62, %v4892_v21  ;;  %v7543_v14 = vpop.f32.mrb[196].mxu0  ;;  %v7591_v47 = vpop.f32.mrb[196].mxu1  ;;  %v11612_v33 = vpack.c.bf16 %v10591_v42, %v10583_v29 }
 0x3ed   : > { %v3631_v53 = vadd.f32 %v7543_v14, %v10537_v34  ;;  %v3792_v20 = vadd.f32 %v7591_v47, %v10537_v34  ;;  %v3622_v52 = vpop.f32.mrb[197].mxu0  ;;  %v3783_v4 = vpop.f32.mrb[197].mxu1 }
 0x3ee   : > { %v3623_v26 = vadd.f32 %v3622_v52, %v10449_v2  ;;  %v3784_v23 = vadd.f32 %v3783_v4, %v10449_v2  ;;  %v7544_v9 = vpop.f32.mrb[198].mxu0  ;;  %v7592_v24 = vpop.f32.mrb[198].mxu1 }
 0x3ef   : > { %v3634_v31 = vadd.f32 %v7544_v9, %v10539_v39  ;;  %v3795_v58 = vadd.f32 %v7592_v24, %v10539_v39  ;;  %v3625_v62 = vpop.f32.mrb[199].mxu0  ;;  %v3786_v37 = vpop.f32.mrb[199].mxu1  ;;  %v4866_v6 = vmax.f32 %v3631_v53, 0.0  ;;  %v4898_v49 = vmax.f32 %v3792_v20, 0.0 }
 0x3f0   : > { %v3626_v0 = vadd.f32 %v3625_v62, %v10451_v59  ;;  %v3787_v63 = vadd.f32 %v3786_v37, %v10451_v59  ;;  %v4864_v14 = vmax.f32 %v3623_v26, 0.0  ;;  %v4896_v47 = vmax.f32 %v3784_v23, 0.0  ;;  %v10793_v20 = vpop.permute.xlu0 %3516  ;;  %v10795_v15 = vpop.permute.xlu1 %3521 }
 0x3f1   : > { %v4867_v22 = vmax.f32 %v3634_v31, 0.0  ;;  %v4899_v21 = vmax.f32 %v3795_v58, 0.0  ;;  %7842 = vmatmul.mubr.bf16.gmra.mrb[48].mxu0 %v11611_v18  ;;  %7890 = vmatmul.mubr.bf16.gmra.mrb[48].mxu1 %v11612_v33  ;;  %v11613_v9 = vpack.c.bf16 %v10637_v44, %v10625_v19  ;;  %v11614_v53 = vpack.c.bf16 %v10639_v8, %v10627_v1  ;;  %11615 = vst [vmem:[#allocation30_spill] sm:$0xff] %v10795_v15 }
 0x3f2   : > { %v4865_v52 = vmax.f32 %v3626_v0, 0.0  ;;  %v4897_v4 = vmax.f32 %v3787_v63, 0.0 }
 0x3f3   : > { %7845 = vmatprep.mubr.bf16.mxu0 %v11613_v9  ;;  %7893 = vmatprep.mubr.bf16.mxu1 %v11614_v53  ;;  %v10797_v17 = vpack.c.bf16 %v4867_v22, %v4866_v6  ;;  %v10799_v29 = vpack.c.bf16 %v4899_v21, %v4898_v49 }
 0x3f4   : > { %v10801_v42 = vpack.c.bf16 %v4865_v52, %v4864_v14  ;;  %v10803_v26 = vpack.c.bf16 %v4897_v4, %v4896_v47  ;;  %v7547_v23 = vpop.f32.mrb[200].mxu0  ;;  %v7595_v24 = vpop.f32.mrb[200].mxu1  ;;  %v11616_v52 = vpack.c.bf16 %v10629_v41, %v10621_v51  ;;  %v11617_v4 = vpack.c.bf16 %v10631_v61, %v10623_v55 }
 0x3f5   : > { %v3647_v19 = vadd.f32 %v7547_v23, %v10697_v54  ;;  %v3808_v44 = vadd.f32 %v7595_v24, %v10697_v54  ;;  %v3638_v1 = vpop.f32.mrb[201].mxu0  ;;  %v3799_v8 = vpop.f32.mrb[201].mxu1 }
 0x3f6   : > { %v3639_v31 = vadd.f32 %v3638_v1, %v10617_v48  ;;  %v3800_v58 = vadd.f32 %v3799_v8, %v10617_v48  ;;  %v7548_v62 = vpop.f32.mrb[202].mxu0  ;;  %v7596_v37 = vpop.f32.mrb[202].mxu1  ;;  %v11618_v1 = vpack.c.bf16 %v10677_v28, %v10665_v5 }
 0x3f7   : > { %v3650_v0 = vadd.f32 %v7548_v62, %v10699_v10  ;;  %v3811_v63 = vadd.f32 %v7596_v37, %v10699_v10  ;;  %v3641_v6 = vpop.f32.mrb[203].mxu0  ;;  %v3802_v49 = vpop.f32.mrb[203].mxu1  ;;  %v4870_v18 = vmax.f32 %v3647_v19, 0.0  ;;  %v4902_v33 = vmax.f32 %v3808_v44, 0.0 }
 0x3f8   : > { %v3642_v22 = vadd.f32 %v3641_v6, %v10619_v16  ;;  %v3803_v21 = vadd.f32 %v3802_v49, %v10619_v16  ;;  %v4868_v9 = vmax.f32 %v3639_v31, 0.0  ;;  %v4900_v53 = vmax.f32 %v3800_v58, 0.0  ;;  %v10825_v44 = vpop.permute.xlu0 %3436  ;;  %v10827_v51 = vpop.permute.xlu1 %3441 }
 0x3f9   : > { %v4871_v14 = vmax.f32 %v3650_v0, 0.0  ;;  %v4903_v47 = vmax.f32 %v3811_v63, 0.0  ;;  %7846 = vmatmul.mubr.bf16.gmra.mrb[52].mxu0 %v11616_v52  ;;  %7894 = vmatmul.mubr.bf16.gmra.mrb[52].mxu1 %v11617_v4  ;;  %v11619_v19 = vpack.c.bf16 %v10679_v3, %v10667_v60 }
 0x3fa   : > { %v4869_v23 = vmax.f32 %v3642_v22, 0.0  ;;  %v4901_v24 = vmax.f32 %v3803_v21, 0.0  ;;  %7849 = vmatprep.mubr.bf16.mxu0 %v11618_v1 }
 0x3fb   : > { %7897 = vmatprep.mubr.bf16.mxu1 %v11619_v19  ;;  %v10829_v41 = vpack.c.bf16 %v4871_v14, %v4870_v18  ;;  %v10831_v55 = vpack.c.bf16 %v4903_v47, %v4902_v33 }
 0x3fc   : > { %v10833_v61 = vpack.c.bf16 %v4869_v23, %v4868_v9  ;;  %v10835_v8 = vpack.c.bf16 %v4901_v24, %v4900_v53  ;;  %v7551_v31 = vpop.f32.mrb[204].mxu0  ;;  %v7599_v58 = vpop.f32.mrb[204].mxu1  ;;  %v11620_v9 = vpack.c.bf16 %v10669_v35, %v10661_v27  ;;  %v11621_v53 = vpack.c.bf16 %v10671_v36, %v10663_v40 }
 0x3fd   : > { %v3663_v5 = vadd.f32 %v7551_v31, %v10825_v44  ;;  %v3824_v28 = vadd.f32 %v7599_v58, %v10825_v44  ;;  %v3654_v60 = vpop.f32.mrb[205].mxu0  ;;  %v3815_v3 = vpop.f32.mrb[205].mxu1  ;;  %v11622_v31 = vpack.c.bf16 %v10717_v56, %v10705_v38  ;;  %v11623_v58 = vpack.c.bf16 %v10719_v57, %v10707_v30 }
 0x3fe   : > { %v3655_v62 = vadd.f32 %v3654_v60, %v10761_v43  ;;  %v3816_v37 = vadd.f32 %v3815_v3, %v10761_v43  ;;  %v7552_v0 = vpop.f32.mrb[206].mxu0  ;;  %v7600_v63 = vpop.f32.mrb[206].mxu1 }
 0x3ff   : > { %v3666_v6 = vadd.f32 %v7552_v0, %v10827_v51  ;;  %v3827_v49 = vadd.f32 %v7600_v63, %v10827_v51  ;;  %v3657_v22 = vpop.f32.mrb[207].mxu0  ;;  %v3818_v21 = vpop.f32.mrb[207].mxu1  ;;  %v4874_v14 = vmax.f32 %v3663_v5, 0.0  ;;  %v4906_v47 = vmax.f32 %v3824_v28, 0.0 }
 0x400   : > { %v3658_v18 = vadd.f32 %v3657_v22, %v10763_v32  ;;  %v3819_v33 = vadd.f32 %v3818_v21, %v10763_v32  ;;  %v4872_v23 = vmax.f32 %v3655_v62, 0.0  ;;  %v4904_v24 = vmax.f32 %v3816_v37, 0.0  ;;  %v11624_v22 = vld [vmem:[#allocation10_spill] sm:$0xff] }
 0x401   : > { %v4875_v52 = vmax.f32 %v3666_v6, 0.0  ;;  %v4907_v4 = vmax.f32 %v3827_v49, 0.0  ;;  %7850 = vmatmul.mubr.bf16.gmra.mrb[56].mxu0 %v11620_v9  ;;  %7898 = vmatmul.mubr.bf16.gmra.mrb[56].mxu1 %v11621_v53  ;;  %v11626_v9 = vld [vmem:[#allocation24_spill] sm:$0xff] }
 0x402   : > { %v4873_v1 = vmax.f32 %v3658_v18, 0.0  ;;  %v4905_v19 = vmax.f32 %v3819_v33, 0.0  ;;  %7853 = vmatprep.mubr.bf16.mxu0 %v11622_v31  ;;  %7901 = vmatprep.mubr.bf16.mxu1 %v11623_v58 }
 0x403   : > { %v10857_v5 = vpack.c.bf16 %v4875_v52, %v4874_v14  ;;  %v10859_v27 = vpack.c.bf16 %v4907_v4, %v4906_v47  ;;  %v11625_v4 = vld [vmem:[#allocation26_spill] sm:$0xff] }
 0x404   : > { %v10861_v35 = vpack.c.bf16 %v4873_v1, %v4872_v23  ;;  %v10863_v40 = vpack.c.bf16 %v4905_v19, %v4904_v24  ;;  %v7555_v36 = vpop.f32.mrb[208].mxu0  ;;  %v7603_v28 = vpop.f32.mrb[208].mxu1  ;;  %v11627_v53 = vpack.c.bf16 %v11625_v4, %v11626_v9  ;;  %v11628_v23 = vld [vmem:[#allocation27_spill] sm:$0xff]  ;;  %v11629_v24 = vld [vmem:[#allocation25_spill] sm:$0xff] }
 0x405   : > { %v3679_v60 = vadd.f32 %v7555_v36, %v10303_v45  ;;  %v3840_v3 = vadd.f32 %v7603_v28, %v10303_v45  ;;  %v3670_v38 = vpop.f32.mrb[209].mxu0  ;;  %v3831_v56 = vpop.f32.mrb[209].mxu1  ;;  %v11630_v1 = vpack.c.bf16 %v11628_v23, %v11629_v24  ;;  %v11480_v28 = vmov 0.00390625   ;;  %v11634_v23 = vld [vmem:[#allocation17_spill] sm:$0xff] }
 0x406   : > { %v3671_v62 = vadd.f32 %v3670_v38, %v10223_v7  ;;  %v3832_v30 = vadd.f32 %v3831_v56, %v10223_v7  ;;  %v7556_v57 = vpop.f32.mrb[210].mxu0  ;;  %v7604_v37 = vpop.f32.mrb[210].mxu1 }
 0x407   : > { %v3682_v0 = vadd.f32 %v7556_v57, %v10305_v11  ;;  %v3843_v63 = vadd.f32 %v7604_v37, %v10305_v11  ;;  %v3673_v6 = vpop.f32.mrb[211].mxu0  ;;  %v3834_v49 = vpop.f32.mrb[211].mxu1  ;;  %v4878_v33 = vmax.f32 %v3679_v60, 0.0  ;;  %v4910_v14 = vmax.f32 %v3840_v3, 0.0 }
 0x408   : > { %v3674_v21 = vadd.f32 %v3673_v6, %v11624_v22  ;;  %v3835_v18 = vadd.f32 %v3834_v49, %v11624_v22  ;;  %v4876_v19 = vmax.f32 %v3671_v62, 0.0  ;;  %v4908_v31 = vmax.f32 %v3832_v30, 0.0  ;;  %v11632_v30 = vld [vmem:[#allocation16_spill] sm:$0xff] }
 0x409   : > { %v4879_v47 = vmax.f32 %v3682_v0, 0.0  ;;  %v4911_v52 = vmax.f32 %v3843_v63, 0.0  ;;  %7854 = vmatmul.mubr.bf16.gmra.mrb[60].mxu0 %v11627_v53  ;;  %7902 = vmatmul.mubr.bf16.gmra.mrb[60].mxu1 %v11630_v1  ;;  %v11631_v0 = vld [vmem:[#allocation18_spill] sm:$0xff] }
 0x40a   : > { %v4877_v58 = vmax.f32 %v3674_v21, 0.0  ;;  %v4909_v36 = vmax.f32 %v3835_v18, 0.0  ;;  %6689 = vmatprep.mubr.f32.mxu0 %v11480_v28  ;;  %6723 = vmatprep.mubr.f32.mxu1 %v11480_v28  ;;  %v11635_v28 = vld [vmem:[#allocation22_spill] sm:$0xff] }
 0x40b   : > { %v7909_v60 = vpack.c.bf16 %v4879_v47, %v4878_v33  ;;  %v7941_v3 = vpack.c.bf16 %v4911_v52, %v4910_v14  ;;  %v11633_v33 = vld [vmem:[#allocation19_spill] sm:$0xff] }
 0x40c   : > { %v7905_v38 = vpack.c.bf16 %v4877_v58, %v4876_v19  ;;  %v7937_v56 = vpack.c.bf16 %v4909_v36, %v4908_v31  ;;  %v7559_v57 = vpop.f32.mrb[212].mxu0  ;;  %v7607_v37 = vpop.f32.mrb[212].mxu1 }
 0x40d   : > { %v3695_v63 = vadd.f32 %v7559_v57, %v11631_v0  ;;  %v3856_v6 = vadd.f32 %v7607_v37, %v11631_v0  ;;  %v3686_v49 = vpop.f32.mrb[213].mxu0  ;;  %v3847_v62 = vpop.f32.mrb[213].mxu1 }
 0x40e   : > { %v3687_v21 = vadd.f32 %v3686_v49, %v11632_v30  ;;  %v3848_v18 = vadd.f32 %v3847_v62, %v11632_v30  ;;  %v7560_v4 = vpop.f32.mrb[214].mxu0  ;;  %v7608_v9 = vpop.f32.mrb[214].mxu1  ;;  %7906 = vmatprep.subr.bf16.mxu0 %v7905_v38  ;;  %7938 = vmatprep.subr.bf16.mxu1 %v7937_v56 }
 0x40f   : > { %v3698_v14 = vadd.f32 %v7560_v4, %v11633_v33  ;;  %v3859_v47 = vadd.f32 %v7608_v9, %v11633_v33  ;;  %v3689_v52 = vpop.f32.mrb[215].mxu0  ;;  %v3850_v53 = vpop.f32.mrb[215].mxu1  ;;  %7908 = vmatpush3.bf16.xpose.msra.mxu0 %v10769_v46  ;;  %7940 = vmatpush3.bf16.xpose.msra.mxu1 %v10771_v25  ;;  %v4882_v19 = vmax.f32 %v3695_v63, 0.0  ;;  %v4914_v31 = vmax.f32 %v3856_v6, 0.0  ;;  %v11636_v63 = vld [vmem:[#allocation20_spill] sm:$0xff] }
 0x410   : > { %v3690_v24 = vadd.f32 %v3689_v52, %v11634_v23  ;;  %v3851_v1 = vadd.f32 %v3850_v53, %v11634_v23  ;;  %7910 = vmatprep.subr.bf16.mxu0 %v7909_v60  ;;  %7942 = vmatprep.subr.bf16.mxu1 %v7941_v3  ;;  %v4880_v38 = vmax.f32 %v3687_v21, 0.0  ;;  %v4912_v56 = vmax.f32 %v3848_v18, 0.0 }
 0x411   : > { %v4883_v58 = vmax.f32 %v3698_v14, 0.0  ;;  %v4915_v36 = vmax.f32 %v3859_v47, 0.0  ;;  %v11637_v47 = vld [vmem:[#allocation23_spill] sm:$0xff] }
 0x412   : > { %v4881_v57 = vmax.f32 %v3690_v24, 0.0  ;;  %v4913_v37 = vmax.f32 %v3851_v1, 0.0 }
 0x413   : > { %v7917_v49 = vpack.c.bf16 %v4883_v58, %v4882_v19  ;;  %v7949_v62 = vpack.c.bf16 %v4915_v36, %v4914_v31  ;;  %v11638_v58 = vld [vmem:[#allocation21_spill] sm:$0xff] }
 0x414   : > { %v7913_v4 = vpack.c.bf16 %v4881_v57, %v4880_v38  ;;  %v7945_v46 = vpack.c.bf16 %v4913_v37, %v4912_v56  ;;  %v7563_v9 = vpop.f32.mrb[216].mxu0  ;;  %v7611_v25 = vpop.f32.mrb[216].mxu1 }
 0x415   : > { %v3711_v52 = vadd.f32 %v7563_v9, %v11635_v28  ;;  %v3872_v53 = vadd.f32 %v7611_v25, %v11635_v28  ;;  %v3702_v60 = vpop.f32.mrb[217].mxu0  ;;  %v3863_v3 = vpop.f32.mrb[217].mxu1 }
 0x416   : > { %v3703_v6 = vadd.f32 %v3702_v60, %v11636_v63  ;;  %v3864_v14 = vadd.f32 %v3863_v3, %v11636_v63  ;;  %v7564_v21 = vpop.f32.mrb[218].mxu0  ;;  %v7612_v18 = vpop.f32.mrb[218].mxu1 }
 0x417   : > { %v3714_v24 = vadd.f32 %v7564_v21, %v11637_v47  ;;  %v3875_v1 = vadd.f32 %v7612_v18, %v11637_v47  ;;  %v3705_v19 = vpop.f32.mrb[219].mxu0  ;;  %v3866_v31 = vpop.f32.mrb[219].mxu1  ;;  %7912 = vmatpush3.bf16.xpose.msra.mxu0 %v10765_v50  ;;  %7944 = vmatpush3.bf16.xpose.msra.mxu1 %v10767_v13  ;;  %v4886_v56 = vmax.f32 %v3711_v52, 0.0  ;;  %v4918_v57 = vmax.f32 %v3872_v53, 0.0  ;;  %v11639_v53 = vld [vmem:[#allocation28_spill] sm:$0xff] }
 0x418   : > { %v3706_v36 = vadd.f32 %v3705_v19, %v11638_v58  ;;  %v3867_v38 = vadd.f32 %v3866_v31, %v11638_v58  ;;  %7914 = vmatprep.subr.bf16.mxu0 %v7913_v4  ;;  %7946 = vmatprep.subr.bf16.mxu1 %v7945_v46  ;;  %v4884_v25 = vmax.f32 %v3703_v6, 0.0  ;;  %v4916_v60 = vmax.f32 %v3864_v14, 0.0 }
 0x419   : > { %v4887_v37 = vmax.f32 %v3714_v24, 0.0  ;;  %v4919_v9 = vmax.f32 %v3875_v1, 0.0 }
 0x41a   : > { %v4885_v3 = vmax.f32 %v3706_v36, 0.0  ;;  %v4917_v21 = vmax.f32 %v3867_v38, 0.0 }
 0x41b   : > { %v10901_v18 = vpack.c.bf16 %v4887_v37, %v4886_v56  ;;  %v10903_v47 = vpack.c.bf16 %v4919_v9, %v4918_v57 }
 0x41c   : > { %v7921_v50 = vpack.c.bf16 %v4885_v3, %v4884_v25  ;;  %v7953_v13 = vpack.c.bf16 %v4917_v21, %v4916_v60  ;;  %v7567_v63 = vpop.f32.mrb[220].mxu0  ;;  %v7615_v19 = vpop.f32.mrb[220].mxu1 }
 0x41d   : > { %v3727_v31 = vadd.f32 %v7567_v63, %v10793_v20  ;;  %v3888_v4 = vadd.f32 %v7615_v19, %v10793_v20  ;;  %v3718_v46 = vpop.f32.mrb[221].mxu0  ;;  %v3879_v52 = vpop.f32.mrb[221].mxu1  ;;  %v11640_v63 = vld [vmem:[#allocation29_spill] sm:$0xff] }
 0x41e   : > { %v3719_v24 = vadd.f32 %v3718_v46, %v11639_v53  ;;  %v3880_v6 = vadd.f32 %v3879_v52, %v11639_v53  ;;  %v7568_v14 = vpop.f32.mrb[222].mxu0  ;;  %v7616_v1 = vpop.f32.mrb[222].mxu1 }
 0x41f   : > { %v3730_v36 = vadd.f32 %v7568_v14, %v10795_v15  ;;  %v3891_v38 = vadd.f32 %v7616_v1, %v10795_v15  ;;  %v3721_v56 = vpop.f32.mrb[223].mxu0  ;;  %v3882_v57 = vpop.f32.mrb[223].mxu1  ;;  %7916 = vmatpush3.bf16.xpose.msra.mxu0 %v10801_v42  ;;  %7948 = vmatpush3.bf16.xpose.msra.mxu1 %v10803_v26  ;;  %v4890_v25 = vmax.f32 %v3727_v31, 0.0  ;;  %v4922_v60 = vmax.f32 %v3888_v4, 0.0 }
 0x420   : > { %v3722_v37 = vadd.f32 %v3721_v56, %v11640_v63  ;;  %v3883_v9 = vadd.f32 %v3882_v57, %v11640_v63  ;;  %7918 = vmatprep.subr.bf16.mxu0 %v7917_v49  ;;  %7950 = vmatprep.subr.bf16.mxu1 %v7949_v62  ;;  %v4888_v19 = vmax.f32 %v3719_v24, 0.0  ;;  %v4920_v46 = vmax.f32 %v3880_v6, 0.0  ;;  %v11641_v49 = vld [vmem:[#allocation14_spill] sm:$0xff]  ;;  %v11642_v24 = vld [vmem:[#allocation11_spill] sm:$0xff] }
 0x421   : > { %v4891_v3 = vmax.f32 %v3730_v36, 0.0  ;;  %v4923_v21 = vmax.f32 %v3891_v38, 0.0 }
 0x422   : > { %v4889_v52 = vmax.f32 %v3722_v37, 0.0  ;;  %v4921_v14 = vmax.f32 %v3883_v9, 0.0 }
 0x423   : > { %v10915_v1 = vpack.c.bf16 %v4891_v3, %v4890_v25  ;;  %v10917_v15 = vpack.c.bf16 %v4923_v21, %v4922_v60  ;;  %v11643_v25 = vld [vmem:[#allocation15_spill] sm:$0xff] }
 0x424   : > { %v10919_v42 = vpack.c.bf16 %v4889_v52, %v4888_v19  ;;  %v10921_v26 = vpack.c.bf16 %v4921_v14, %v4920_v46  ;;  %v7635_v56 = vpop.f32.mrb[224].mxu0  ;;  %v7683_v57 = vpop.f32.mrb[224].mxu1 }
 0x425   : > { %v3937_v62 = vadd.f32 %v7635_v56, %v11641_v49  ;;  %v4098_v31 = vadd.f32 %v7683_v57, %v11641_v49  ;;  %v3928_v4 = vpop.f32.mrb[225].mxu0  ;;  %v4089_v36 = vpop.f32.mrb[225].mxu1 }
 0x426   : > { %v3929_v6 = vadd.f32 %v3928_v4, %v11642_v24  ;;  %v4090_v38 = vadd.f32 %v4089_v36, %v11642_v24  ;;  %v7636_v37 = vpop.f32.mrb[226].mxu0  ;;  %v7684_v9 = vpop.f32.mrb[226].mxu1 }
 0x427   : > { %v3940_v60 = vadd.f32 %v7636_v37, %v11643_v25  ;;  %v4101_v3 = vadd.f32 %v7684_v9, %v11643_v25  ;;  %v3931_v21 = vpop.f32.mrb[227].mxu0  ;;  %v4092_v19 = vpop.f32.mrb[227].mxu1  ;;  %7920 = vmatpush3.bf16.xpose.msra.mxu0 %v10797_v17  ;;  %7952 = vmatpush3.bf16.xpose.msra.mxu1 %v10799_v29  ;;  %v4926_v14 = vmax.f32 %v3937_v62, 0.0  ;;  %v4958_v56 = vmax.f32 %v4098_v31, 0.0 }
 0x428   : > { %v3932_v46 = vadd.f32 %v3931_v21, %v10265_v12  ;;  %v4093_v52 = vadd.f32 %v4092_v19, %v10265_v12  ;;  %7922 = vmatprep.subr.bf16.mxu0 %v7921_v50  ;;  %7954 = vmatprep.subr.bf16.mxu1 %v7953_v13  ;;  %v4924_v36 = vmax.f32 %v3929_v6, 0.0  ;;  %v4956_v37 = vmax.f32 %v4090_v38, 0.0 }
 0x429   : > { %v4927_v57 = vmax.f32 %v3940_v60, 0.0  ;;  %v4959_v4 = vmax.f32 %v4101_v3, 0.0 }
 0x42a   : > { %v4925_v24 = vmax.f32 %v3932_v46, 0.0  ;;  %v4957_v9 = vmax.f32 %v4093_v52, 0.0 }
 0x42b   : > { %v10933_v25 = vpack.c.bf16 %v4927_v57, %v4926_v14  ;;  %v10935_v49 = vpack.c.bf16 %v4959_v4, %v4958_v56 }
 0x42c   : > { %v10937_v17 = vpack.c.bf16 %v4925_v24, %v4924_v36  ;;  %v10939_v29 = vpack.c.bf16 %v4957_v9, %v4956_v37  ;;  %v7639_v21 = vpop.f32.mrb[228].mxu0  ;;  %v7687_v19 = vpop.f32.mrb[228].mxu1 }
 0x42d   : > { %v3953_v50 = vadd.f32 %v7639_v21, %v10537_v34  ;;  %v4114_v13 = vadd.f32 %v7687_v19, %v10537_v34  ;;  %v3944_v62 = vpop.f32.mrb[229].mxu0  ;;  %v4105_v31 = vpop.f32.mrb[229].mxu1 }
 0x42e   : > { %v3945_v6 = vadd.f32 %v3944_v62, %v10449_v2  ;;  %v4106_v38 = vadd.f32 %v4105_v31, %v10449_v2  ;;  %v7640_v60 = vpop.f32.mrb[230].mxu0  ;;  %v7688_v3 = vpop.f32.mrb[230].mxu1 }
 0x42f   : > { %v3956_v46 = vadd.f32 %v7640_v60, %v10539_v39  ;;  %v4117_v24 = vadd.f32 %v7688_v3, %v10539_v39  ;;  %v3947_v52 = vpop.f32.mrb[231].mxu0  ;;  %v4108_v14 = vpop.f32.mrb[231].mxu1  ;;  %7924 = vmatpush3.bf16.xpose.msra.mxu0 %v10833_v61  ;;  %7956 = vmatpush3.bf16.xpose.msra.mxu1 %v10835_v8  ;;  %v4930_v4 = vmax.f32 %v3953_v50, 0.0  ;;  %v4962_v36 = vmax.f32 %v4114_v13, 0.0 }
 0x430   : > { %v3948_v56 = vadd.f32 %v3947_v52, %v10451_v59  ;;  %v4109_v57 = vadd.f32 %v4108_v14, %v10451_v59  ;;  %7926 = vmatprep.subr.bf16.mxu0 %v10901_v18  ;;  %7958 = vmatprep.subr.bf16.mxu1 %v10903_v47  ;;  %v4928_v21 = vmax.f32 %v3945_v6, 0.0  ;;  %v4960_v19 = vmax.f32 %v4106_v38, 0.0 }
 0x431   : > { %v4931_v37 = vmax.f32 %v3956_v46, 0.0  ;;  %v4963_v9 = vmax.f32 %v4117_v24, 0.0 }
 0x432   : > { %v4929_v62 = vmax.f32 %v3948_v56, 0.0  ;;  %v4961_v31 = vmax.f32 %v4109_v57, 0.0 }
 0x433   : > { %v10953_v60 = vpack.c.bf16 %v4931_v37, %v4930_v4  ;;  %v10955_v61 = vpack.c.bf16 %v4963_v9, %v4962_v36 }
 0x434   : > { %v10957_v8 = vpack.c.bf16 %v4929_v62, %v4928_v21  ;;  %v10959_v3 = vpack.c.bf16 %v4961_v31, %v4960_v19  ;;  %v7643_v52 = vpop.f32.mrb[232].mxu0  ;;  %v7691_v18 = vpop.f32.mrb[232].mxu1 }
 0x435   : > { %v3969_v47 = vadd.f32 %v7643_v52, %v10697_v54  ;;  %v4130_v50 = vadd.f32 %v7691_v18, %v10697_v54  ;;  %v3960_v13 = vpop.f32.mrb[233].mxu0  ;;  %v4121_v46 = vpop.f32.mrb[233].mxu1 }
 0x436   : > { %v3961_v6 = vadd.f32 %v3960_v13, %v10617_v48  ;;  %v4122_v38 = vadd.f32 %v4121_v46, %v10617_v48  ;;  %v7644_v24 = vpop.f32.mrb[234].mxu0  ;;  %v7692_v14 = vpop.f32.mrb[234].mxu1 }
 0x437   : > { %v3972_v56 = vadd.f32 %v7644_v24, %v10699_v10  ;;  %v4133_v57 = vadd.f32 %v7692_v14, %v10699_v10  ;;  %v3963_v4 = vpop.f32.mrb[235].mxu0  ;;  %v4124_v36 = vpop.f32.mrb[235].mxu1  ;;  %7928 = vmatpush3.bf16.xpose.msra.mxu0 %v10829_v41  ;;  %7960 = vmatpush3.bf16.xpose.msra.mxu1 %v10831_v55  ;;  %v4934_v21 = vmax.f32 %v3969_v47, 0.0  ;;  %v4966_v19 = vmax.f32 %v4130_v50, 0.0 }
 0x438   : > { %v3964_v37 = vadd.f32 %v3963_v4, %v10619_v16  ;;  %v4125_v9 = vadd.f32 %v4124_v36, %v10619_v16  ;;  %7930 = vmatprep.subr.bf16.mxu0 %v10919_v42  ;;  %7962 = vmatprep.subr.bf16.mxu1 %v10921_v26  ;;  %v4932_v52 = vmax.f32 %v3961_v6, 0.0  ;;  %v4964_v18 = vmax.f32 %v4122_v38, 0.0 }
 0x439   : > { %v4935_v62 = vmax.f32 %v3972_v56, 0.0  ;;  %v4967_v31 = vmax.f32 %v4133_v57, 0.0 }
 0x43a   : > { %v4933_v13 = vmax.f32 %v3964_v37, 0.0  ;;  %v4965_v46 = vmax.f32 %v4125_v9, 0.0 }
 0x43b   : > { %v10973_v24 = vpack.c.bf16 %v4935_v62, %v4934_v21  ;;  %v10975_v41 = vpack.c.bf16 %v4967_v31, %v4966_v19 }
 0x43c   : > { %v10977_v55 = vpack.c.bf16 %v4933_v13, %v4932_v52  ;;  %v10979_v14 = vpack.c.bf16 %v4965_v46, %v4964_v18  ;;  %v7647_v4 = vpop.f32.mrb[236].mxu0  ;;  %v7695_v42 = vpop.f32.mrb[236].mxu1 }
 0x43d   : > { %v3985_v26 = vadd.f32 %v7647_v4, %v10825_v44  ;;  %v4146_v47 = vadd.f32 %v7695_v42, %v10825_v44  ;;  %v3976_v50 = vpop.f32.mrb[237].mxu0  ;;  %v4137_v56 = vpop.f32.mrb[237].mxu1 }
 0x43e   : > { %v3977_v6 = vadd.f32 %v3976_v50, %v10761_v43  ;;  %v4138_v38 = vadd.f32 %v4137_v56, %v10761_v43  ;;  %v7648_v57 = vpop.f32.mrb[238].mxu0  ;;  %v7696_v36 = vpop.f32.mrb[238].mxu1 }
 0x43f   : > { %v3988_v37 = vadd.f32 %v7648_v57, %v10827_v51  ;;  %v4149_v9 = vadd.f32 %v7696_v36, %v10827_v51  ;;  %v3979_v21 = vpop.f32.mrb[239].mxu0  ;;  %v4140_v19 = vpop.f32.mrb[239].mxu1  ;;  %7932 = vmatpush3.bf16.xpose.msra.mxu0 %v10861_v35  ;;  %7964 = vmatpush3.bf16.xpose.msra.mxu1 %v10863_v40  ;;  %v4938_v52 = vmax.f32 %v3985_v26, 0.0  ;;  %v4970_v18 = vmax.f32 %v4146_v47, 0.0 }
 0x440   : > { %v3980_v62 = vadd.f32 %v3979_v21, %v10763_v32  ;;  %v4141_v31 = vadd.f32 %v4140_v19, %v10763_v32  ;;  %7934 = vmatprep.subr.bf16.mxu0 %v10915_v1  ;;  %7966 = vmatprep.subr.bf16.mxu1 %v10917_v15  ;;  %v4936_v4 = vmax.f32 %v3977_v6, 0.0  ;;  %v4968_v42 = vmax.f32 %v4138_v38, 0.0 }
 0x441   : > { %v4939_v13 = vmax.f32 %v3988_v37, 0.0  ;;  %v4971_v46 = vmax.f32 %v4149_v9, 0.0 }
 0x442   : > { %v4937_v50 = vmax.f32 %v3980_v62, 0.0  ;;  %v4969_v56 = vmax.f32 %v4141_v31, 0.0 }
 0x443   : > { %v10993_v57 = vpack.c.bf16 %v4939_v13, %v4938_v52  ;;  %v10995_v35 = vpack.c.bf16 %v4971_v46, %v4970_v18 }
 0x444   : > { %v10997_v40 = vpack.c.bf16 %v4937_v50, %v4936_v4  ;;  %v10999_v36 = vpack.c.bf16 %v4969_v56, %v4968_v42  ;;  %v7651_v21 = vpop.f32.mrb[240].mxu0  ;;  %v7699_v1 = vpop.f32.mrb[240].mxu1 }
 0x445   : > { %11644 = vst [vmem:[#allocation26_spill] sm:$0xff] %v10993_v57  ;;  %11645 = vst [vmem:[#allocation24_spill] sm:$0xff] %v10995_v35  ;;  %v4001_v15 = vadd.f32 %v7651_v21, %v10303_v45  ;;  %v4162_v26 = vadd.f32 %v7699_v1, %v10303_v45  ;;  %v3992_v47 = vpop.f32.mrb[241].mxu0  ;;  %v4153_v37 = vpop.f32.mrb[241].mxu1 }
 0x446   : > { %v3993_v6 = vadd.f32 %v3992_v47, %v10223_v7  ;;  %v4154_v38 = vadd.f32 %v4153_v37, %v10223_v7  ;;  %v7652_v9 = vpop.f32.mrb[242].mxu0  ;;  %v7700_v19 = vpop.f32.mrb[242].mxu1 }
 0x447   : > { %v4004_v62 = vadd.f32 %v7652_v9, %v10305_v11  ;;  %v4165_v31 = vadd.f32 %v7700_v19, %v10305_v11  ;;  %v3995_v52 = vpop.f32.mrb[243].mxu0  ;;  %v4156_v18 = vpop.f32.mrb[243].mxu1  ;;  %7936 = vmatpush3.bf16.xpose.msra.mxu0 %v10857_v5  ;;  %7968 = vmatpush3.bf16.xpose.msra.mxu1 %v10859_v27  ;;  %v4942_v4 = vmax.f32 %v4001_v15, 0.0  ;;  %v4974_v42 = vmax.f32 %v4162_v26, 0.0 }
 0x448   : > { %v3996_v13 = vadd.f32 %v3995_v52, %v11624_v22  ;;  %v4157_v46 = vadd.f32 %v4156_v18, %v11624_v22  ;;  %v4940_v21 = vmax.f32 %v3993_v6, 0.0  ;;  %v4972_v1 = vmax.f32 %v4154_v38, 0.0 }
 0x449   : > { %v4943_v50 = vmax.f32 %v4004_v62, 0.0  ;;  %v4975_v56 = vmax.f32 %v4165_v31, 0.0 }
 0x44a   : > { %v4941_v47 = vmax.f32 %v3996_v13, 0.0  ;;  %v4973_v37 = vmax.f32 %v4157_v46, 0.0 }
 0x44b   : > { %v7973_v9 = vpack.c.bf16 %v4943_v50, %v4942_v4  ;;  %v8005_v19 = vpack.c.bf16 %v4975_v56, %v4974_v42  ;;  %v11646_v4 = vmov 0.00390625  }
 0x44c   : > { %v7969_v35 = vpack.c.bf16 %v4941_v47, %v4940_v21  ;;  %v8001_v57 = vpack.c.bf16 %v4973_v37, %v4972_v1  ;;  %v7655_v11 = vpop.f32.mrb[244].mxu0  ;;  %v7703_v5 = vpop.f32.mrb[244].mxu1 }
 0x44d   : > { %v4017_v27 = vadd.f32 %v7655_v11, %v11631_v0  ;;  %v4178_v52 = vadd.f32 %v7703_v5, %v11631_v0  ;;  %v4008_v7 = vpop.f32.mrb[245].mxu0  ;;  %v4169_v18 = vpop.f32.mrb[245].mxu1 }
 0x44e   : > { %v4009_v15 = vadd.f32 %v4008_v7, %v11632_v30  ;;  %v4170_v26 = vadd.f32 %v4169_v18, %v11632_v30  ;;  %v7656_v6 = vpop.f32.mrb[246].mxu0  ;;  %v7704_v38 = vpop.f32.mrb[246].mxu1  ;;  %7970 = vmatprep.subr.bf16.mxu0 %v7969_v35  ;;  %8002 = vmatprep.subr.bf16.mxu1 %v8001_v57 }
 0x44f   : > { %v4020_v62 = vadd.f32 %v7656_v6, %v11633_v33  ;;  %v4181_v31 = vadd.f32 %v7704_v38, %v11633_v33  ;;  %v4011_v13 = vpop.f32.mrb[247].mxu0  ;;  %v4172_v46 = vpop.f32.mrb[247].mxu1  ;;  %6690 = vmatmul.mubr.f32.vlgmr.msra.gmra.mrb[64].mxu0 %v11646_v4  ;;  %6724 = vmatmul.mubr.f32.vlgmr.msra.gmra.mrb[64].mxu1 %v11646_v4  ;;  %v4946_v35 = vmax.f32 %v4017_v27, 0.0  ;;  %v4978_v57 = vmax.f32 %v4178_v52, 0.0 }
 0x450   : > { %v4012_v11 = vadd.f32 %v4011_v13, %v11634_v23  ;;  %v4173_v7 = vadd.f32 %v4172_v46, %v11634_v23  ;;  %7972 = vmatpush3.bf16.xpose.msra.mxu0 %v10937_v17  ;;  %8004 = vmatpush3.bf16.xpose.msra.mxu1 %v10939_v29  ;;  %v4944_v56 = vmax.f32 %v4009_v15, 0.0  ;;  %v4976_v21 = vmax.f32 %v4170_v26, 0.0  ;;  %v11647_v15 = vld [vmem:[#allocation20_spill] sm:$0xff]  ;;  %v11648_v13 = vld [vmem:[#allocation23_spill] sm:$0xff] }
 0x451   : > { %v4947_v42 = vmax.f32 %v4020_v62, 0.0  ;;  %v4979_v50 = vmax.f32 %v4181_v31, 0.0  ;;  %7974 = vmatprep.subr.bf16.mxu0 %v7973_v9  ;;  %8006 = vmatprep.subr.bf16.mxu1 %v8005_v19 }
 0x452   : > { %v4945_v1 = vmax.f32 %v4012_v11, 0.0  ;;  %v4977_v47 = vmax.f32 %v4173_v7, 0.0  ;;  %6757 = vmatprep.mubr.f32.mxu0 %v11646_v4  ;;  %6791 = vmatprep.mubr.f32.mxu1 %v11646_v4 }
 0x453   : > { %v7981_v37 = vpack.c.bf16 %v4947_v42, %v4946_v35  ;;  %v8013_v5 = vpack.c.bf16 %v4979_v50, %v4978_v57 }
 0x454   : > { %v7977_v18 = vpack.c.bf16 %v4945_v1, %v4944_v56  ;;  %v8009_v17 = vpack.c.bf16 %v4977_v47, %v4976_v21  ;;  %v7659_v6 = vpop.f32.mrb[248].mxu0  ;;  %v7707_v29 = vpop.f32.mrb[248].mxu1 }
 0x455   : > { %v4033_v27 = vadd.f32 %v7659_v6, %v11635_v28  ;;  %v4194_v52 = vadd.f32 %v7707_v29, %v11635_v28  ;;  %v4024_v9 = vpop.f32.mrb[249].mxu0  ;;  %v4185_v19 = vpop.f32.mrb[249].mxu1 }
 0x456   : > { %v4025_v26 = vadd.f32 %v4024_v9, %v11647_v15  ;;  %v4186_v38 = vadd.f32 %v4185_v19, %v11647_v15  ;;  %v7660_v62 = vpop.f32.mrb[250].mxu0  ;;  %v7708_v31 = vpop.f32.mrb[250].mxu1 }
 0x457   : > { %v4036_v46 = vadd.f32 %v7660_v62, %v11648_v13  ;;  %v4197_v11 = vadd.f32 %v7708_v31, %v11648_v13  ;;  %v4027_v7 = vpop.f32.mrb[251].mxu0  ;;  %v4188_v35 = vpop.f32.mrb[251].mxu1  ;;  %v4950_v50 = vmax.f32 %v4033_v27, 0.0  ;;  %v4982_v56 = vmax.f32 %v4194_v52, 0.0 }
 0x458   : > { %v4028_v57 = vadd.f32 %v4027_v7, %v11638_v58  ;;  %v4189_v42 = vadd.f32 %v4188_v35, %v11638_v58  ;;  %7976 = vmatpush3.bf16.xpose.msra.mxu0 %v10933_v25  ;;  %8008 = vmatpush3.bf16.xpose.msra.mxu1 %v10935_v49  ;;  %v4948_v47 = vmax.f32 %v4025_v26, 0.0  ;;  %v4980_v6 = vmax.f32 %v4186_v38, 0.0 }
 0x459   : > { %v4951_v21 = vmax.f32 %v4036_v46, 0.0  ;;  %v4983_v1 = vmax.f32 %v4197_v11, 0.0  ;;  %7978 = vmatprep.subr.bf16.mxu0 %v7977_v18  ;;  %8010 = vmatprep.subr.bf16.mxu1 %v8009_v17  ;;  %v11649_v11 = vld [vmem:[#allocation30_spill] sm:$0xff] }
 0x45a   : > { %v4949_v29 = vmax.f32 %v4028_v57, 0.0  ;;  %v4981_v9 = vmax.f32 %v4189_v42, 0.0 }
 0x45b   : > { %v11035_v19 = vpack.c.bf16 %v4951_v21, %v4950_v50  ;;  %v11037_v62 = vpack.c.bf16 %v4983_v1, %v4982_v56 }
 0x45c   : > { %v7985_v31 = vpack.c.bf16 %v4949_v29, %v4948_v47  ;;  %v8017_v7 = vpack.c.bf16 %v4981_v9, %v4980_v6  ;;  %v7663_v35 = vpop.f32.mrb[252].mxu0  ;;  %v7711_v25 = vpop.f32.mrb[252].mxu1 }
 0x45d   : > { %v4049_v49 = vadd.f32 %v7663_v35, %v10793_v20  ;;  %v4210_v27 = vadd.f32 %v7711_v25, %v10793_v20  ;;  %v4040_v52 = vpop.f32.mrb[253].mxu0  ;;  %v4201_v46 = vpop.f32.mrb[253].mxu1 }
 0x45e   : > { %v4041_v18 = vadd.f32 %v4040_v52, %v11639_v53  ;;  %v4202_v17 = vadd.f32 %v4201_v46, %v11639_v53  ;;  %v7664_v26 = vpop.f32.mrb[254].mxu0  ;;  %v7712_v38 = vpop.f32.mrb[254].mxu1 }
 0x45f   : > { %v4052_v57 = vadd.f32 %v7664_v26, %v11649_v11  ;;  %v4213_v42 = vadd.f32 %v7712_v38, %v11649_v11  ;;  %v4043_v50 = vpop.f32.mrb[255].mxu0  ;;  %v4204_v56 = vpop.f32.mrb[255].mxu1  ;;  %v4954_v47 = vmax.f32 %v4049_v49, 0.0  ;;  %v4986_v6 = vmax.f32 %v4210_v27, 0.0  ;;  %v11650_v49 = vld [vmem:[#allocation14_spill] sm:$0xff] }
 0x460   : > { %v4044_v21 = vadd.f32 %v4043_v50, %v11640_v63  ;;  %v4205_v1 = vadd.f32 %v4204_v56, %v11640_v63  ;;  %7980 = vmatpush3.bf16.xpose.msra.mxu0 %v10957_v8  ;;  %8012 = vmatpush3.bf16.xpose.msra.mxu1 %v10959_v3  ;;  %v4952_v35 = vmax.f32 %v4041_v18, 0.0  ;;  %v4984_v25 = vmax.f32 %v4202_v17, 0.0  ;;  %v11651_v18 = vld [vmem:[#allocation11_spill] sm:$0xff] }
 0x461   : > { %v4955_v29 = vmax.f32 %v4052_v57, 0.0  ;;  %v4987_v9 = vmax.f32 %v4213_v42, 0.0  ;;  %7982 = vmatprep.subr.bf16.mxu0 %v7981_v37  ;;  %8014 = vmatprep.subr.bf16.mxu1 %v8013_v5 }
 0x462   : > { %v4953_v52 = vmax.f32 %v4044_v21, 0.0  ;;  %v4985_v46 = vmax.f32 %v4205_v1, 0.0 }
 0x463   : > { %v11049_v26 = vpack.c.bf16 %v4955_v29, %v4954_v47  ;;  %v11051_v38 = vpack.c.bf16 %v4987_v9, %v4986_v6  ;;  %v11652_v47 = vld [vmem:[#allocation15_spill] sm:$0xff] }
 0x464   : > { %v11053_v50 = vpack.c.bf16 %v4953_v52, %v4952_v35  ;;  %v11055_v56 = vpack.c.bf16 %v4985_v46, %v4984_v25  ;;  %v7731_v8 = vpop.f32.mrb[0].mxu0  ;;  %v7779_v3 = vpop.f32.mrb[0].mxu1 }
 0x465   : > { %v4259_v27 = vadd.f32 %v7731_v8, %v11650_v49  ;;  %v4420_v57 = vadd.f32 %v7779_v3, %v11650_v49  ;;  %v4250_v37 = vpop.f32.mrb[1].mxu0  ;;  %v4411_v5 = vpop.f32.mrb[1].mxu1 }
 0x466   : > { %v4251_v17 = vadd.f32 %v4250_v37, %v11651_v18  ;;  %v4412_v42 = vadd.f32 %v4411_v5, %v11651_v18  ;;  %v7732_v21 = vpop.f32.mrb[2].mxu0  ;;  %v7780_v1 = vpop.f32.mrb[2].mxu1 }
 0x467   : > { %v4262_v6 = vadd.f32 %v7732_v21, %v11652_v47  ;;  %v4423_v29 = vadd.f32 %v7780_v1, %v11652_v47  ;;  %v4253_v9 = vpop.f32.mrb[3].mxu0  ;;  %v4414_v35 = vpop.f32.mrb[3].mxu1  ;;  %v4990_v46 = vmax.f32 %v4259_v27, 0.0  ;;  %v5022_v8 = vmax.f32 %v4420_v57, 0.0 }
 0x468   : > { %v4254_v25 = vadd.f32 %v4253_v9, %v10265_v12  ;;  %v4415_v52 = vadd.f32 %v4414_v35, %v10265_v12  ;;  %7984 = vmatpush3.bf16.xpose.msra.mxu0 %v10953_v60  ;;  %8016 = vmatpush3.bf16.xpose.msra.mxu1 %v10955_v61  ;;  %v4988_v5 = vmax.f32 %v4251_v17, 0.0  ;;  %v5020_v21 = vmax.f32 %v4412_v42, 0.0 }
 0x469   : > { %v4991_v3 = vmax.f32 %v4262_v6, 0.0  ;;  %v5023_v37 = vmax.f32 %v4423_v29, 0.0  ;;  %7986 = vmatprep.subr.bf16.mxu0 %v7985_v31  ;;  %8018 = vmatprep.subr.bf16.mxu1 %v8017_v7 }
 0x46a   : > { %v4989_v18 = vmax.f32 %v4254_v25, 0.0  ;;  %v5021_v1 = vmax.f32 %v4415_v52, 0.0 }
 0x46b   : > { %v11067_v47 = vpack.c.bf16 %v4991_v3, %v4990_v46  ;;  %v11069_v49 = vpack.c.bf16 %v5023_v37, %v5022_v8 }
 0x46c   : > { %v11071_v9 = vpack.c.bf16 %v4989_v18, %v4988_v5  ;;  %v11073_v35 = vpack.c.bf16 %v5021_v1, %v5020_v21  ;;  %v7735_v60 = vpop.f32.mrb[4].mxu0  ;;  %v7783_v61 = vpop.f32.mrb[4].mxu1 }
 0x46d   : > { %v4275_v27 = vadd.f32 %v7735_v60, %v10537_v34  ;;  %v4436_v57 = vadd.f32 %v7783_v61, %v10537_v34  ;;  %v4266_v31 = vpop.f32.mrb[5].mxu0  ;;  %v4427_v7 = vpop.f32.mrb[5].mxu1 }
 0x46e   : > { %v4267_v17 = vadd.f32 %v4266_v31, %v10449_v2  ;;  %v4428_v42 = vadd.f32 %v4427_v7, %v10449_v2  ;;  %v7736_v6 = vpop.f32.mrb[6].mxu0  ;;  %v7784_v29 = vpop.f32.mrb[6].mxu1 }
 0x46f   : > { %v4278_v25 = vadd.f32 %v7736_v6, %v10539_v39  ;;  %v4439_v18 = vadd.f32 %v7784_v29, %v10539_v39  ;;  %v4269_v52 = vpop.f32.mrb[7].mxu0  ;;  %v4430_v46 = vpop.f32.mrb[7].mxu1  ;;  %v4994_v37 = vmax.f32 %v4275_v27, 0.0  ;;  %v5026_v5 = vmax.f32 %v4436_v57, 0.0 }
 0x470   : > { %v4270_v8 = vadd.f32 %v4269_v52, %v10451_v59  ;;  %v4431_v3 = vadd.f32 %v4430_v46, %v10451_v59  ;;  %7988 = vmatpush3.bf16.xpose.msra.mxu0 %v10977_v55  ;;  %8020 = vmatpush3.bf16.xpose.msra.mxu1 %v10979_v14  ;;  %v4992_v60 = vmax.f32 %v4267_v17, 0.0  ;;  %v5024_v61 = vmax.f32 %v4428_v42, 0.0 }
 0x471   : > { %v4995_v21 = vmax.f32 %v4278_v25, 0.0  ;;  %v5027_v1 = vmax.f32 %v4439_v18, 0.0  ;;  %7990 = vmatprep.subr.bf16.mxu0 %v11035_v19  ;;  %8022 = vmatprep.subr.bf16.mxu1 %v11037_v62 }
 0x472   : > { %v4993_v31 = vmax.f32 %v4270_v8, 0.0  ;;  %v5025_v7 = vmax.f32 %v4431_v3, 0.0 }
 0x473   : > { %v11087_v6 = vpack.c.bf16 %v4995_v21, %v4994_v37  ;;  %v11089_v29 = vpack.c.bf16 %v5027_v1, %v5026_v5 }
 0x474   : > { %v11091_v52 = vpack.c.bf16 %v4993_v31, %v4992_v60  ;;  %v11093_v55 = vpack.c.bf16 %v5025_v7, %v5024_v61  ;;  %v7739_v14 = vpop.f32.mrb[8].mxu0  ;;  %v7787_v27 = vpop.f32.mrb[8].mxu1 }
 0x475   : > { %v4291_v57 = vadd.f32 %v7739_v14, %v10697_v54  ;;  %v4452_v19 = vadd.f32 %v7787_v27, %v10697_v54  ;;  %v4282_v25 = vpop.f32.mrb[9].mxu0  ;;  %v4443_v62 = vpop.f32.mrb[9].mxu1 }
 0x476   : > { %v4283_v17 = vadd.f32 %v4282_v25, %v10617_v48  ;;  %v4444_v42 = vadd.f32 %v4443_v62, %v10617_v48  ;;  %v7740_v18 = vpop.f32.mrb[10].mxu0  ;;  %v7788_v46 = vpop.f32.mrb[10].mxu1 }
 0x477   : > { %v4294_v8 = vadd.f32 %v7740_v18, %v10699_v10  ;;  %v4455_v3 = vadd.f32 %v7788_v46, %v10699_v10  ;;  %v4285_v37 = vpop.f32.mrb[11].mxu0  ;;  %v4446_v5 = vpop.f32.mrb[11].mxu1  ;;  %v4998_v60 = vmax.f32 %v4291_v57, 0.0  ;;  %v5030_v61 = vmax.f32 %v4452_v19, 0.0 }
 0x478   : > { %v4286_v21 = vadd.f32 %v4285_v37, %v10619_v16  ;;  %v4447_v1 = vadd.f32 %v4446_v5, %v10619_v16  ;;  %7992 = vmatpush3.bf16.xpose.msra.mxu0 %v10973_v24  ;;  %8024 = vmatpush3.bf16.xpose.msra.mxu1 %v10975_v41  ;;  %v4996_v14 = vmax.f32 %v4283_v17, 0.0  ;;  %v5028_v27 = vmax.f32 %v4444_v42, 0.0 }
 0x479   : > { %v4999_v31 = vmax.f32 %v4294_v8, 0.0  ;;  %v5031_v7 = vmax.f32 %v4455_v3, 0.0  ;;  %7994 = vmatprep.subr.bf16.mxu0 %v11053_v50  ;;  %8026 = vmatprep.subr.bf16.mxu1 %v11055_v56 }
 0x47a   : > { %v4997_v25 = vmax.f32 %v4286_v21, 0.0  ;;  %v5029_v62 = vmax.f32 %v4447_v1, 0.0 }
 0x47b   : > { %v11107_v18 = vpack.c.bf16 %v4999_v31, %v4998_v60  ;;  %v11109_v46 = vpack.c.bf16 %v5031_v7, %v5030_v61 }
 0x47c   : > { %v11111_v37 = vpack.c.bf16 %v4997_v25, %v4996_v14  ;;  %v11113_v24 = vpack.c.bf16 %v5029_v62, %v5028_v27  ;;  %v7743_v41 = vpop.f32.mrb[12].mxu0  ;;  %v7791_v57 = vpop.f32.mrb[12].mxu1 }
 0x47d   : > { %v4307_v19 = vadd.f32 %v7743_v41, %v10825_v44  ;;  %v4468_v50 = vadd.f32 %v7791_v57, %v10825_v44  ;;  %v4298_v8 = vpop.f32.mrb[13].mxu0  ;;  %v4459_v56 = vpop.f32.mrb[13].mxu1 }
 0x47e   : > { %v4299_v17 = vadd.f32 %v4298_v8, %v10761_v43  ;;  %v4460_v42 = vadd.f32 %v4459_v56, %v10761_v43  ;;  %v7744_v3 = vpop.f32.mrb[14].mxu0  ;;  %v7792_v5 = vpop.f32.mrb[14].mxu1 }
 0x47f   : > { %v4310_v21 = vadd.f32 %v7744_v3, %v10827_v51  ;;  %v4471_v1 = vadd.f32 %v7792_v5, %v10827_v51  ;;  %v4301_v60 = vpop.f32.mrb[15].mxu0  ;;  %v4462_v61 = vpop.f32.mrb[15].mxu1  ;;  %v5002_v14 = vmax.f32 %v4307_v19, 0.0  ;;  %v5034_v27 = vmax.f32 %v4468_v50, 0.0 }
 0x480   : > { %v4302_v31 = vadd.f32 %v4301_v60, %v10763_v32  ;;  %v4463_v7 = vadd.f32 %v4462_v61, %v10763_v32  ;;  %7996 = vmatpush3.bf16.xpose.msra.mxu0 %v10997_v40  ;;  %8028 = vmatpush3.bf16.xpose.msra.mxu1 %v10999_v36  ;;  %v5000_v41 = vmax.f32 %v4299_v17, 0.0  ;;  %v5032_v57 = vmax.f32 %v4460_v42, 0.0  ;;  %v11657_v17 = vld [vmem:[#allocation9_spill] sm:$0xff] }
 0x481   : > { %v5003_v25 = vmax.f32 %v4310_v21, 0.0  ;;  %v5035_v62 = vmax.f32 %v4471_v1, 0.0  ;;  %7998 = vmatprep.subr.bf16.mxu0 %v11049_v26  ;;  %8030 = vmatprep.subr.bf16.mxu1 %v11051_v38 }
 0x482   : > { %v5001_v8 = vmax.f32 %v4302_v31, 0.0  ;;  %v5033_v56 = vmax.f32 %v4463_v7, 0.0  ;;  %v11658_v7 = vld [vmem:[#allocation13_spill] sm:$0xff] }
 0x483   : > { %v11127_v3 = vpack.c.bf16 %v5003_v25, %v5002_v14  ;;  %v11129_v5 = vpack.c.bf16 %v5035_v62, %v5034_v27 }
 0x484   : > { %v11131_v60 = vpack.c.bf16 %v5001_v8, %v5000_v41  ;;  %v11133_v40 = vpack.c.bf16 %v5033_v56, %v5032_v57  ;;  %v7747_v36 = vpop.f32.mrb[16].mxu0  ;;  %v7795_v19 = vpop.f32.mrb[16].mxu1  ;;  %v11659_v8 = vld [vmem:[#allocation26_spill] sm:$0xff]  ;;  %v11660_v56 = vld [vmem:[#allocation24_spill] sm:$0xff] }
 0x485   : > { %11653 = vst [vmem:[#allocation27_spill] sm:$0xff] %v11127_v3  ;;  %11654 = vst [vmem:[#allocation25_spill] sm:$0xff] %v11129_v5  ;;  %v4323_v50 = vadd.f32 %v7747_v36, %v10303_v45  ;;  %v4484_v26 = vadd.f32 %v7795_v19, %v10303_v45  ;;  %v4314_v21 = vpop.f32.mrb[17].mxu0  ;;  %v4475_v38 = vpop.f32.mrb[17].mxu1 }
 0x486   : > { %11655 = vst [vmem:[#allocation18_spill] sm:$0xff] %v11131_v60  ;;  %11656 = vst [vmem:[#allocation16_spill] sm:$0xff] %v11133_v40  ;;  %v4315_v42 = vadd.f32 %v4314_v21, %v11657_v17  ;;  %v4476_v1 = vadd.f32 %v4475_v38, %v11657_v17  ;;  %v7748_v61 = vpop.f32.mrb[18].mxu0  ;;  %v7796_v31 = vpop.f32.mrb[18].mxu1 }
 0x487   : > { %v4326_v14 = vadd.f32 %v7748_v61, %v11658_v7  ;;  %v4487_v27 = vadd.f32 %v7796_v31, %v11658_v7  ;;  %v4317_v25 = vpop.f32.mrb[19].mxu0  ;;  %v4478_v62 = vpop.f32.mrb[19].mxu1  ;;  %v5006_v36 = vmax.f32 %v4323_v50, 0.0  ;;  %v5038_v19 = vmax.f32 %v4484_v26, 0.0 }
 0x488   : > { %v4318_v41 = vadd.f32 %v4317_v25, %v11624_v22  ;;  %v4479_v57 = vadd.f32 %v4478_v62, %v11624_v22  ;;  %8000 = vmatpush3.bf16.xpose.msra.mxu0 %v11659_v8  ;;  %8032 = vmatpush3.bf16.xpose.msra.mxu1 %v11660_v56  ;;  %v5004_v5 = vmax.f32 %v4315_v42, 0.0  ;;  %v5036_v3 = vmax.f32 %v4476_v1, 0.0 }
 0x489   : > { %v5007_v21 = vmax.f32 %v4326_v14, 0.0  ;;  %v5039_v38 = vmax.f32 %v4487_v27, 0.0 }
 0x48a   : > { %v5005_v17 = vmax.f32 %v4318_v41, 0.0  ;;  %v5037_v61 = vmax.f32 %v4479_v57, 0.0 }
 0x48b   : > { %v8037_v45 = vpack.c.bf16 %v5007_v21, %v5006_v36  ;;  %v8069_v31 = vpack.c.bf16 %v5039_v38, %v5038_v19 }
 0x48c   : > { %v8033_v7 = vpack.c.bf16 %v5005_v17, %v5004_v5  ;;  %v8065_v40 = vpack.c.bf16 %v5037_v61, %v5036_v3  ;;  %v7751_v60 = vpop.f32.mrb[20].mxu0  ;;  %v7799_v25 = vpop.f32.mrb[20].mxu1 }
 0x48d   : > { %v4339_v62 = vadd.f32 %v7751_v60, %v11631_v0  ;;  %v4500_v8 = vadd.f32 %v7799_v25, %v11631_v0  ;;  %v4330_v22 = vpop.f32.mrb[21].mxu0  ;;  %v4491_v56 = vpop.f32.mrb[21].mxu1 }
 0x48e   : > { %v4331_v50 = vadd.f32 %v4330_v22, %v11632_v30  ;;  %v4492_v26 = vadd.f32 %v4491_v56, %v11632_v30  ;;  %v7752_v42 = vpop.f32.mrb[22].mxu0  ;;  %v7800_v1 = vpop.f32.mrb[22].mxu1  ;;  %8034 = vmatprep.subr.bf16.mxu0 %v8033_v7  ;;  %8066 = vmatprep.subr.bf16.mxu1 %v8065_v40 }
 0x48f   : > { %v4342_v14 = vadd.f32 %v7752_v42, %v11633_v33  ;;  %v4503_v3 = vadd.f32 %v7800_v1, %v11633_v33  ;;  %v4333_v5 = vpop.f32.mrb[23].mxu0  ;;  %v4494_v17 = vpop.f32.mrb[23].mxu1  ;;  %6758 = vmatmul.mubr.f32.vlgmr.msra.gmra.mrb[66].mxu0 %v11646_v4  ;;  %6792 = vmatmul.mubr.f32.vlgmr.msra.gmra.mrb[66].mxu1 %v11646_v4  ;;  %v5010_v7 = vmax.f32 %v4339_v62, 0.0  ;;  %v5042_v40 = vmax.f32 %v4500_v8, 0.0 }
 0x490   : > { %v4334_v60 = vadd.f32 %v4333_v5, %v11634_v23  ;;  %v4495_v22 = vadd.f32 %v4494_v17, %v11634_v23  ;;  %8036 = vmatpush3.bf16.xpose.msra.mxu0 %v11071_v9  ;;  %8068 = vmatpush3.bf16.xpose.msra.mxu1 %v11073_v35  ;;  %v5008_v57 = vmax.f32 %v4331_v50, 0.0  ;;  %v5040_v36 = vmax.f32 %v4492_v26, 0.0 }
 0x491   : > { %v5011_v27 = vmax.f32 %v4342_v14, 0.0  ;;  %v5043_v41 = vmax.f32 %v4503_v3, 0.0  ;;  %8038 = vmatprep.subr.bf16.mxu0 %v8037_v45  ;;  %8070 = vmatprep.subr.bf16.mxu1 %v8069_v31 }
 0x492   : > { %v5009_v19 = vmax.f32 %v4334_v60, 0.0  ;;  %v5041_v21 = vmax.f32 %v4495_v22, 0.0  ;;  %6825 = vmatprep.mubr.f32.mxu0 %v11646_v4  ;;  %6859 = vmatprep.mubr.f32.mxu1 %v11646_v4 }
 0x493   : > { %v8045_v38 = vpack.c.bf16 %v5011_v27, %v5010_v7  ;;  %v8077_v61 = vpack.c.bf16 %v5043_v41, %v5042_v40 }
 0x494   : > { %v8041_v25 = vpack.c.bf16 %v5009_v19, %v5008_v57  ;;  %v8073_v9 = vpack.c.bf16 %v5041_v21, %v5040_v36  ;;  %v7755_v56 = vpop.f32.mrb[24].mxu0  ;;  %v7803_v35 = vpop.f32.mrb[24].mxu1 }
 0x495   : > { %v4355_v62 = vadd.f32 %v7755_v56, %v11635_v28  ;;  %v4516_v8 = vadd.f32 %v7803_v35, %v11635_v28  ;;  %v4346_v45 = vpop.f32.mrb[25].mxu0  ;;  %v4507_v31 = vpop.f32.mrb[25].mxu1 }
 0x496   : > { %v4347_v50 = vadd.f32 %v4346_v45, %v11647_v15  ;;  %v4508_v26 = vadd.f32 %v4507_v31, %v11647_v15  ;;  %v7756_v42 = vpop.f32.mrb[26].mxu0  ;;  %v7804_v1 = vpop.f32.mrb[26].mxu1 }
 0x497   : > { %v4358_v14 = vadd.f32 %v7756_v42, %v11648_v13  ;;  %v4519_v3 = vadd.f32 %v7804_v1, %v11648_v13  ;;  %v4349_v5 = vpop.f32.mrb[27].mxu0  ;;  %v4510_v17 = vpop.f32.mrb[27].mxu1  ;;  %v5014_v7 = vmax.f32 %v4355_v62, 0.0  ;;  %v5046_v40 = vmax.f32 %v4516_v8, 0.0 }
 0x498   : > { %v4350_v60 = vadd.f32 %v4349_v5, %v11638_v58  ;;  %v4511_v22 = vadd.f32 %v4510_v17, %v11638_v58  ;;  %8040 = vmatpush3.bf16.xpose.msra.mxu0 %v11067_v47  ;;  %8072 = vmatpush3.bf16.xpose.msra.mxu1 %v11069_v49  ;;  %v5012_v57 = vmax.f32 %v4347_v50, 0.0  ;;  %v5044_v36 = vmax.f32 %v4508_v26, 0.0 }
 0x499   : > { %v5015_v27 = vmax.f32 %v4358_v14, 0.0  ;;  %v5047_v41 = vmax.f32 %v4519_v3, 0.0  ;;  %8042 = vmatprep.subr.bf16.mxu0 %v8041_v25  ;;  %8074 = vmatprep.subr.bf16.mxu1 %v8073_v9 }
 0x49a   : > { %v5013_v19 = vmax.f32 %v4350_v60, 0.0  ;;  %v5045_v21 = vmax.f32 %v4511_v22, 0.0 }
 0x49b   : > { %v11169_v56 = vpack.c.bf16 %v5015_v27, %v5014_v7  ;;  %v11171_v35 = vpack.c.bf16 %v5047_v41, %v5046_v40 }
 0x49c   : > { %v8049_v45 = vpack.c.bf16 %v5013_v19, %v5012_v57  ;;  %v8081_v31 = vpack.c.bf16 %v5045_v21, %v5044_v36  ;;  %v7759_v42 = vpop.f32.mrb[28].mxu0  ;;  %v7807_v47 = vpop.f32.mrb[28].mxu1 }
 0x49d   : > { %v4371_v49 = vadd.f32 %v7759_v42, %v10793_v20  ;;  %v4532_v62 = vadd.f32 %v7807_v47, %v10793_v20  ;;  %v4362_v8 = vpop.f32.mrb[29].mxu0  ;;  %v4523_v1 = vpop.f32.mrb[29].mxu1 }
 0x49e   : > { %v4363_v25 = vadd.f32 %v4362_v8, %v11639_v53  ;;  %v4524_v9 = vadd.f32 %v4523_v1, %v11639_v53  ;;  %v7760_v50 = vpop.f32.mrb[30].mxu0  ;;  %v7808_v26 = vpop.f32.mrb[30].mxu1 }
 0x49f   : > { %v4374_v14 = vadd.f32 %v7760_v50, %v11649_v11  ;;  %v4535_v3 = vadd.f32 %v7808_v26, %v11649_v11  ;;  %v4365_v5 = vpop.f32.mrb[31].mxu0  ;;  %v4526_v17 = vpop.f32.mrb[31].mxu1  ;;  %v5018_v7 = vmax.f32 %v4371_v49, 0.0  ;;  %v5050_v40 = vmax.f32 %v4532_v62, 0.0  ;;  %v11661_v49 = vld [vmem:[#allocation14_spill] sm:$0xff] }
 0x4a0   : > { %v4366_v60 = vadd.f32 %v4365_v5, %v11640_v63  ;;  %v4527_v22 = vadd.f32 %v4526_v17, %v11640_v63  ;;  %8044 = vmatpush3.bf16.xpose.msra.mxu0 %v11091_v52  ;;  %8076 = vmatpush3.bf16.xpose.msra.mxu1 %v11093_v55  ;;  %v5016_v57 = vmax.f32 %v4363_v25, 0.0  ;;  %v5048_v36 = vmax.f32 %v4524_v9, 0.0  ;;  %v11662_v25 = vld [vmem:[#allocation11_spill] sm:$0xff] }
 0x4a1   : > { %v5019_v27 = vmax.f32 %v4374_v14, 0.0  ;;  %v5051_v41 = vmax.f32 %v4535_v3, 0.0  ;;  %8046 = vmatprep.subr.bf16.mxu0 %v8045_v38  ;;  %8078 = vmatprep.subr.bf16.mxu1 %v8077_v61  ;;  %v11663_v5 = vld [vmem:[#allocation15_spill] sm:$0xff] }
 0x4a2   : > { %v5017_v19 = vmax.f32 %v4366_v60, 0.0  ;;  %v5049_v21 = vmax.f32 %v4527_v22, 0.0 }
 0x4a3   : > { %v11183_v42 = vpack.c.bf16 %v5019_v27, %v5018_v7  ;;  %v11185_v47 = vpack.c.bf16 %v5051_v41, %v5050_v40 }
 0x4a4   : > { %v11187_v8 = vpack.c.bf16 %v5017_v19, %v5016_v57  ;;  %v11189_v1 = vpack.c.bf16 %v5049_v21, %v5048_v36  ;;  %v7827_v52 = vpop.f32.mrb[32].mxu0  ;;  %v7875_v55 = vpop.f32.mrb[32].mxu1 }
 0x4a5   : > { %v4581_v62 = vadd.f32 %v7827_v52, %v11661_v49  ;;  %v4742_v50 = vadd.f32 %v7875_v55, %v11661_v49  ;;  %v4572_v38 = vpop.f32.mrb[33].mxu0  ;;  %v4733_v61 = vpop.f32.mrb[33].mxu1 }
 0x4a6   : > { %v4573_v9 = vadd.f32 %v4572_v38, %v11662_v25  ;;  %v4734_v26 = vadd.f32 %v4733_v61, %v11662_v25  ;;  %v7828_v14 = vpop.f32.mrb[34].mxu0  ;;  %v7876_v3 = vpop.f32.mrb[34].mxu1 }
 0x4a7   : > { %v4584_v17 = vadd.f32 %v7828_v14, %v11663_v5  ;;  %v4745_v60 = vadd.f32 %v7876_v3, %v11663_v5  ;;  %v4575_v22 = vpop.f32.mrb[35].mxu0  ;;  %v4736_v7 = vpop.f32.mrb[35].mxu1  ;;  %v5054_v41 = vmax.f32 %v4581_v62, 0.0  ;;  %v5086_v57 = vmax.f32 %v4742_v50, 0.0 }
 0x4a8   : > { %v4576_v40 = vadd.f32 %v4575_v22, %v10265_v12  ;;  %v4737_v27 = vadd.f32 %v4736_v7, %v10265_v12  ;;  %8048 = vmatpush3.bf16.xpose.msra.mxu0 %v11087_v6  ;;  %8080 = vmatpush3.bf16.xpose.msra.mxu1 %v11089_v29  ;;  %v5052_v21 = vmax.f32 %v4573_v9, 0.0  ;;  %v5084_v52 = vmax.f32 %v4734_v26, 0.0 }
 0x4a9   : > { %v5055_v36 = vmax.f32 %v4584_v17, 0.0  ;;  %v5087_v19 = vmax.f32 %v4745_v60, 0.0  ;;  %8050 = vmatprep.subr.bf16.mxu0 %v8049_v45  ;;  %8082 = vmatprep.subr.bf16.mxu1 %v8081_v31 }
 0x4aa   : > { %v5053_v55 = vmax.f32 %v4576_v40, 0.0  ;;  %v5085_v49 = vmax.f32 %v4737_v27, 0.0 }
 0x4ab   : > { %v11201_v38 = vpack.c.bf16 %v5055_v36, %v5054_v41  ;;  %v11203_v61 = vpack.c.bf16 %v5087_v19, %v5086_v57 }
 0x4ac   : > { %v11205_v25 = vpack.c.bf16 %v5053_v55, %v5052_v21  ;;  %v11207_v12 = vpack.c.bf16 %v5085_v49, %v5084_v52  ;;  %v7831_v6 = vpop.f32.mrb[36].mxu0  ;;  %v7879_v29 = vpop.f32.mrb[36].mxu1 }
 0x4ad   : > { %v4597_v62 = vadd.f32 %v7831_v6, %v10537_v34  ;;  %v4758_v50 = vadd.f32 %v7879_v29, %v10537_v34  ;;  %v4588_v45 = vpop.f32.mrb[37].mxu0  ;;  %v4749_v31 = vpop.f32.mrb[37].mxu1 }
 0x4ae   : > { %v4589_v9 = vadd.f32 %v4588_v45, %v10449_v2  ;;  %v4750_v26 = vadd.f32 %v4749_v31, %v10449_v2  ;;  %v7832_v14 = vpop.f32.mrb[38].mxu0  ;;  %v7880_v3 = vpop.f32.mrb[38].mxu1 }
 0x4af   : > { %v4600_v5 = vadd.f32 %v7832_v14, %v10539_v39  ;;  %v4761_v17 = vadd.f32 %v7880_v3, %v10539_v39  ;;  %v4591_v60 = vpop.f32.mrb[39].mxu0  ;;  %v4752_v22 = vpop.f32.mrb[39].mxu1  ;;  %v5058_v34 = vmax.f32 %v4597_v62, 0.0  ;;  %v5090_v27 = vmax.f32 %v4758_v50, 0.0 }
 0x4b0   : > { %v4592_v7 = vadd.f32 %v4591_v60, %v10451_v59  ;;  %v4753_v40 = vadd.f32 %v4752_v22, %v10451_v59  ;;  %8052 = vmatpush3.bf16.xpose.msra.mxu0 %v11111_v37  ;;  %8084 = vmatpush3.bf16.xpose.msra.mxu1 %v11113_v24  ;;  %v5056_v57 = vmax.f32 %v4589_v9, 0.0  ;;  %v5088_v39 = vmax.f32 %v4750_v26, 0.0 }
 0x4b1   : > { %v5059_v41 = vmax.f32 %v4600_v5, 0.0  ;;  %v5091_v2 = vmax.f32 %v4761_v17, 0.0  ;;  %8054 = vmatprep.subr.bf16.mxu0 %v11169_v56  ;;  %8086 = vmatprep.subr.bf16.mxu1 %v11171_v35 }
 0x4b2   : > { %v5057_v36 = vmax.f32 %v4592_v7, 0.0  ;;  %v5089_v19 = vmax.f32 %v4753_v40, 0.0 }
 0x4b3   : > { %v11221_v21 = vpack.c.bf16 %v5059_v41, %v5058_v34  ;;  %v11223_v52 = vpack.c.bf16 %v5091_v2, %v5090_v27 }
 0x4b4   : > { %v11225_v59 = vpack.c.bf16 %v5057_v36, %v5056_v57  ;;  %v11227_v37 = vpack.c.bf16 %v5089_v19, %v5088_v39  ;;  %v7835_v24 = vpop.f32.mrb[40].mxu0  ;;  %v7883_v55 = vpop.f32.mrb[40].mxu1 }
 0x4b5   : > { %v4613_v49 = vadd.f32 %v7835_v24, %v10697_v54  ;;  %v4774_v56 = vadd.f32 %v7883_v55, %v10697_v54  ;;  %v4604_v6 = vpop.f32.mrb[41].mxu0  ;;  %v4765_v35 = vpop.f32.mrb[41].mxu1 }
 0x4b6   : > { %v4605_v29 = vadd.f32 %v4604_v6, %v10617_v48  ;;  %v4766_v62 = vadd.f32 %v4765_v35, %v10617_v48  ;;  %v7836_v50 = vpop.f32.mrb[42].mxu0  ;;  %v7884_v45 = vpop.f32.mrb[42].mxu1 }
 0x4b7   : > { %v4616_v31 = vadd.f32 %v7836_v50, %v10699_v10  ;;  %v4777_v9 = vadd.f32 %v7884_v45, %v10699_v10  ;;  %v4607_v26 = vpop.f32.mrb[43].mxu0  ;;  %v4768_v14 = vpop.f32.mrb[43].mxu1  ;;  %v5062_v54 = vmax.f32 %v4613_v49, 0.0  ;;  %v5094_v17 = vmax.f32 %v4774_v56, 0.0 }
 0x4b8   : > { %v4608_v3 = vadd.f32 %v4607_v26, %v10619_v16  ;;  %v4769_v5 = vadd.f32 %v4768_v14, %v10619_v16  ;;  %8056 = vmatpush3.bf16.xpose.msra.mxu0 %v11107_v18  ;;  %8088 = vmatpush3.bf16.xpose.msra.mxu1 %v11109_v46  ;;  %v5060_v22 = vmax.f32 %v4605_v29, 0.0  ;;  %v5092_v10 = vmax.f32 %v4766_v62, 0.0  ;;  %v11664_v62 = vld [vmem:[#allocation18_spill] sm:$0xff] }
 0x4b9   : > { %v5063_v60 = vmax.f32 %v4616_v31, 0.0  ;;  %v5095_v48 = vmax.f32 %v4777_v9, 0.0  ;;  %8058 = vmatprep.subr.bf16.mxu0 %v11187_v8  ;;  %8090 = vmatprep.subr.bf16.mxu1 %v11189_v1 }
 0x4ba   : > { %v5061_v7 = vmax.f32 %v4608_v3, 0.0  ;;  %v5093_v40 = vmax.f32 %v4769_v5, 0.0 }
 0x4bb   : > { %v11241_v34 = vpack.c.bf16 %v5063_v60, %v5062_v54  ;;  %v11243_v27 = vpack.c.bf16 %v5095_v48, %v5094_v17  ;;  %v11666_v48 = vld [vmem:[#allocation12_spill] sm:$0xff] }
 0x4bc   : > { %v11245_v16 = vpack.c.bf16 %v5061_v7, %v5060_v22  ;;  %v11247_v18 = vpack.c.bf16 %v5093_v40, %v5092_v10  ;;  %v7839_v46 = vpop.f32.mrb[44].mxu0  ;;  %v7887_v41 = vpop.f32.mrb[44].mxu1  ;;  %v11667_v7 = vld [vmem:[#allocation9_spill] sm:$0xff] }
 0x4bd   : > { %v4629_v2 = vadd.f32 %v7839_v46, %v10825_v44  ;;  %v4790_v8 = vadd.f32 %v7887_v41, %v10825_v44  ;;  %v4620_v57 = vpop.f32.mrb[45].mxu0  ;;  %v4781_v1 = vpop.f32.mrb[45].mxu1  ;;  %v11665_v44 = vld [vmem:[#allocation16_spill] sm:$0xff] }
 0x4be   : > { %v4621_v39 = vadd.f32 %v4620_v57, %v10761_v43  ;;  %v4782_v36 = vadd.f32 %v4781_v1, %v10761_v43  ;;  %v7840_v19 = vpop.f32.mrb[46].mxu0  ;;  %v7888_v24 = vpop.f32.mrb[46].mxu1 }
 0x4bf   : > { %v4632_v55 = vadd.f32 %v7840_v19, %v10827_v51  ;;  %v4793_v49 = vadd.f32 %v7888_v24, %v10827_v51  ;;  %v4623_v56 = vpop.f32.mrb[47].mxu0  ;;  %v4784_v6 = vpop.f32.mrb[47].mxu1  ;;  %v5066_v50 = vmax.f32 %v4629_v2, 0.0  ;;  %v5098_v45 = vmax.f32 %v4790_v8, 0.0  ;;  %v11668_v8 = vld [vmem:[#allocation13_spill] sm:$0xff]  ;;  %v11669_v19 = vld [vmem:[#allocation10_spill] sm:$0xff] }
 0x4c0   : > { %v4624_v35 = vadd.f32 %v4623_v56, %v10763_v32  ;;  %v4785_v29 = vadd.f32 %v4784_v6, %v10763_v32  ;;  %8060 = vmatpush3.bf16.xpose.msra.mxu0 %v11664_v62  ;;  %8092 = vmatpush3.bf16.xpose.msra.mxu1 %v11665_v44  ;;  %v5064_v9 = vmax.f32 %v4621_v39, 0.0  ;;  %v5096_v51 = vmax.f32 %v4782_v36, 0.0  ;;  %v11671_v56 = vld [vmem:[#allocation25_spill] sm:$0xff] }
 0x4c1   : > { %v5067_v31 = vmax.f32 %v4632_v55, 0.0  ;;  %v5099_v43 = vmax.f32 %v4793_v49, 0.0  ;;  %8062 = vmatprep.subr.bf16.mxu0 %v11183_v42  ;;  %8094 = vmatprep.subr.bf16.mxu1 %v11185_v47  ;;  %v11670_v49 = vld [vmem:[#allocation27_spill] sm:$0xff] }
 0x4c2   : > { %v5065_v26 = vmax.f32 %v4624_v35, 0.0  ;;  %v5097_v14 = vmax.f32 %v4785_v29, 0.0 }
 0x4c3   : > { %v11261_v3 = vpack.c.bf16 %v5067_v31, %v5066_v50  ;;  %v11263_v5 = vpack.c.bf16 %v5099_v43, %v5098_v45 }
 0x4c4   : > { %v11265_v32 = vpack.c.bf16 %v5065_v26, %v5064_v9  ;;  %v11267_v54 = vpack.c.bf16 %v5097_v14, %v5096_v51  ;;  %v7843_v17 = vpop.f32.mrb[48].mxu0  ;;  %v7891_v60 = vpop.f32.mrb[48].mxu1 }
 0x4c5   : > { %v4645_v22 = vadd.f32 %v7843_v17, %v11666_v48  ;;  %v4806_v42 = vadd.f32 %v7891_v60, %v11666_v48  ;;  %v4636_v10 = vpop.f32.mrb[49].mxu0  ;;  %v4797_v47 = vpop.f32.mrb[49].mxu1 }
 0x4c6   : > { %v4637_v40 = vadd.f32 %v4636_v10, %v11667_v7  ;;  %v4798_v46 = vadd.f32 %v4797_v47, %v11667_v7  ;;  %v7844_v41 = vpop.f32.mrb[50].mxu0  ;;  %v7892_v2 = vpop.f32.mrb[50].mxu1 }
 0x4c7   : > { %v4648_v57 = vadd.f32 %v7844_v41, %v11668_v8  ;;  %v4809_v1 = vadd.f32 %v7892_v2, %v11668_v8  ;;  %v4639_v39 = vpop.f32.mrb[51].mxu0  ;;  %v4800_v36 = vpop.f32.mrb[51].mxu1  ;;  %v5070_v6 = vmax.f32 %v4645_v22, 0.0  ;;  %v5102_v35 = vmax.f32 %v4806_v42, 0.0 }
 0x4c8   : > { %v4640_v24 = vadd.f32 %v4639_v39, %v11669_v19  ;;  %v4801_v55 = vadd.f32 %v4800_v36, %v11669_v19  ;;  %8064 = vmatpush3.bf16.xpose.msra.mxu0 %v11670_v49  ;;  %8096 = vmatpush3.bf16.xpose.msra.mxu1 %v11671_v56  ;;  %v5068_v44 = vmax.f32 %v4637_v40, 0.0  ;;  %v5100_v50 = vmax.f32 %v4798_v46, 0.0 }
 0x4c9   : > { %v5071_v29 = vmax.f32 %v4648_v57, 0.0  ;;  %v5103_v62 = vmax.f32 %v4809_v1, 0.0 }
 0x4ca   : > { %v5069_v45 = vmax.f32 %v4640_v24, 0.0  ;;  %v5101_v31 = vmax.f32 %v4801_v55, 0.0 }
 0x4cb   : > { %v8101_v43 = vpack.c.bf16 %v5071_v29, %v5070_v6  ;;  %v8133_v9 = vpack.c.bf16 %v5103_v62, %v5102_v35 }
 0x4cc   : > { %v8097_v51 = vpack.c.bf16 %v5069_v45, %v5068_v44  ;;  %v8129_v26 = vpack.c.bf16 %v5101_v31, %v5100_v50  ;;  %v7847_v14 = vpop.f32.mrb[52].mxu0  ;;  %v7895_v17 = vpop.f32.mrb[52].mxu1 }
 0x4cd   : > { %v4661_v60 = vadd.f32 %v7847_v14, %v11631_v0  ;;  %v4822_v48 = vadd.f32 %v7895_v17, %v11631_v0  ;;  %v4652_v10 = vpop.f32.mrb[53].mxu0  ;;  %v4813_v47 = vpop.f32.mrb[53].mxu1 }
 0x4ce   : > { %v4653_v22 = vadd.f32 %v4652_v10, %v11632_v30  ;;  %v4814_v42 = vadd.f32 %v4813_v47, %v11632_v30  ;;  %v7848_v7 = vpop.f32.mrb[54].mxu0  ;;  %v7896_v40 = vpop.f32.mrb[54].mxu1  ;;  %8098 = vmatprep.subr.bf16.mxu0 %v8097_v51  ;;  %8130 = vmatprep.subr.bf16.mxu1 %v8129_v26 }
 0x4cf   : > { %v4664_v46 = vadd.f32 %v7848_v7, %v11633_v33  ;;  %v4825_v41 = vadd.f32 %v7896_v40, %v11633_v33  ;;  %v4655_v2 = vpop.f32.mrb[55].mxu0  ;;  %v4816_v8 = vpop.f32.mrb[55].mxu1  ;;  %6826 = vmatmul.mubr.f32.vlgmr.msra.gmra.mrb[68].mxu0 %v11646_v4  ;;  %6860 = vmatmul.mubr.f32.vlgmr.msra.gmra.mrb[68].mxu1 %v11646_v4  ;;  %v5074_v30 = vmax.f32 %v4661_v60, 0.0  ;;  %v5106_v1 = vmax.f32 %v4822_v48, 0.0 }
 0x4d0   : > { %v4656_v0 = vadd.f32 %v4655_v2, %v11634_v23  ;;  %v4817_v57 = vadd.f32 %v4816_v8, %v11634_v23  ;;  %8100 = vmatpush3.bf16.xpose.msra.mxu0 %v11205_v25  ;;  %8132 = vmatpush3.bf16.xpose.msra.mxu1 %v11207_v12  ;;  %v5072_v33 = vmax.f32 %v4653_v22, 0.0  ;;  %v5104_v19 = vmax.f32 %v4814_v42, 0.0 }
 0x4d1   : > { %v5075_v39 = vmax.f32 %v4664_v46, 0.0  ;;  %v5107_v36 = vmax.f32 %v4825_v41, 0.0  ;;  %8102 = vmatprep.subr.bf16.mxu0 %v8101_v43  ;;  %8134 = vmatprep.subr.bf16.mxu1 %v8133_v9 }
 0x4d2   : > { %v5073_v24 = vmax.f32 %v4656_v0, 0.0  ;;  %v5105_v55 = vmax.f32 %v4817_v57, 0.0  ;;  %6893 = vmatprep.mubr.f32.mxu0 %v11646_v4  ;;  %6927 = vmatprep.mubr.f32.mxu1 %v11646_v4 }
 0x4d3   : > { %v8109_v49 = vpack.c.bf16 %v5075_v39, %v5074_v30  ;;  %v8141_v23 = vpack.c.bf16 %v5107_v36, %v5106_v1 }
 0x4d4   : > { %v8105_v56 = vpack.c.bf16 %v5073_v24, %v5072_v33  ;;  %v8137_v25 = vpack.c.bf16 %v5105_v55, %v5104_v19  ;;  %v7851_v6 = vpop.f32.mrb[56].mxu0  ;;  %v7899_v12 = vpop.f32.mrb[56].mxu1 }
 0x4d5   : > { %v4677_v35 = vadd.f32 %v7851_v6, %v11635_v28  ;;  %v4838_v29 = vadd.f32 %v7899_v12, %v11635_v28  ;;  %v4668_v62 = vpop.f32.mrb[57].mxu0  ;;  %v4829_v44 = vpop.f32.mrb[57].mxu1 }
 0x4d6   : > { %v4669_v50 = vadd.f32 %v4668_v62, %v11647_v15  ;;  %v4830_v45 = vadd.f32 %v4829_v44, %v11647_v15  ;;  %v7852_v31 = vpop.f32.mrb[58].mxu0  ;;  %v7900_v43 = vpop.f32.mrb[58].mxu1 }
 0x4d7   : > { %v4680_v9 = vadd.f32 %v7852_v31, %v11648_v13  ;;  %v4841_v51 = vadd.f32 %v7900_v43, %v11648_v13  ;;  %v4671_v26 = vpop.f32.mrb[59].mxu0  ;;  %v4832_v14 = vpop.f32.mrb[59].mxu1  ;;  %v5078_v28 = vmax.f32 %v4677_v35, 0.0  ;;  %v5110_v48 = vmax.f32 %v4838_v29, 0.0 }
 0x4d8   : > { %v4672_v17 = vadd.f32 %v4671_v26, %v11638_v58  ;;  %v4833_v60 = vadd.f32 %v4832_v14, %v11638_v58  ;;  %8104 = vmatpush3.bf16.xpose.msra.mxu0 %v11201_v38  ;;  %8136 = vmatpush3.bf16.xpose.msra.mxu1 %v11203_v61  ;;  %v5076_v47 = vmax.f32 %v4669_v50, 0.0  ;;  %v5108_v22 = vmax.f32 %v4830_v45, 0.0 }
 0x4d9   : > { %v5079_v10 = vmax.f32 %v4680_v9, 0.0  ;;  %v5111_v15 = vmax.f32 %v4841_v51, 0.0  ;;  %8106 = vmatprep.subr.bf16.mxu0 %v8105_v56  ;;  %8138 = vmatprep.subr.bf16.mxu1 %v8137_v25 }
 0x4da   : > { %v5077_v42 = vmax.f32 %v4672_v17, 0.0  ;;  %v5109_v13 = vmax.f32 %v4833_v60, 0.0 }
 0x4db   : > { %v8117_v7 = vpack.c.bf16 %v5079_v10, %v5078_v28  ;;  %v8149_v40 = vpack.c.bf16 %v5111_v15, %v5110_v48 }
 0x4dc   : > { %v8113_v46 = vpack.c.bf16 %v5077_v42, %v5076_v47  ;;  %v8145_v41 = vpack.c.bf16 %v5109_v13, %v5108_v22  ;;  %v7855_v2 = vpop.f32.mrb[60].mxu0  ;;  %v7903_v58 = vpop.f32.mrb[60].mxu1  ;;  %v5118_v22 = vld [vmem:[%s8562_s16 + $0x4] sm:$0x3]  ;;  %v5119_v42 = vld [vmem:[%s8562_s16 + $0x6] sm:$0x3] }
 0x4dd   : > { %v4693_v38 = vadd.f32 %v7855_v2, %v10793_v20  ;;  %v4854_v61 = vadd.f32 %v7903_v58, %v10793_v20  ;;  %v4684_v8 = vpop.f32.mrb[61].mxu0  ;;  %v4845_v0 = vpop.f32.mrb[61].mxu1 }
 0x4de   : > { %v4685_v57 = vadd.f32 %v4684_v8, %v11639_v53  ;;  %v4846_v30 = vadd.f32 %v4845_v0, %v11639_v53  ;;  %v7856_v1 = vpop.f32.mrb[62].mxu0  ;;  %v7904_v39 = vpop.f32.mrb[62].mxu1 }
 0x4df   : > { %v4696_v36 = vadd.f32 %v7856_v1, %v11649_v11  ;;  %v4857_v33 = vadd.f32 %v7904_v39, %v11649_v11  ;;  %v4687_v19 = vpop.f32.mrb[63].mxu0  ;;  %v4848_v24 = vpop.f32.mrb[63].mxu1  ;;  %v5082_v20 = vmax.f32 %v4693_v38, 0.0  ;;  %v5114_v25 = vmax.f32 %v4854_v61, 0.0  ;;  %v5121_v1 = vld [vmem:[%s8562_s16 + $0xa] sm:$0x3] }
 0x4e0   : > { %v4688_v55 = vadd.f32 %v4687_v19, %v11640_v63  ;;  %v4849_v56 = vadd.f32 %v4848_v24, %v11640_v63  ;;  %8108 = vmatpush3.bf16.xpose.msra.mxu0 %v11225_v59  ;;  %8140 = vmatpush3.bf16.xpose.msra.mxu1 %v11227_v37  ;;  %v5080_v12 = vmax.f32 %v4685_v57, 0.0  ;;  %v5112_v35 = vmax.f32 %v4846_v30, 0.0  ;;  %v5120_v30 = vld [vmem:[%s8562_s16 + $0x8] sm:$0x3] }
 0x4e1   : > { %v5083_v6 = vmax.f32 %v4696_v36, 0.0  ;;  %v5115_v53 = vmax.f32 %v4857_v33, 0.0  ;;  %8110 = vmatprep.subr.bf16.mxu0 %v8109_v49  ;;  %8142 = vmatprep.subr.bf16.mxu1 %v8141_v23  ;;  %v8411_v63 = vmov 1966171168   ;;  %v5116_v49 = vld [vmem:[%s8562_s16] sm:$0x3] }
 0x4e2   : > { %v5081_v29 = vmax.f32 %v4688_v55, 0.0  ;;  %v5113_v11 = vmax.f32 %v4849_v56, 0.0  ;;  %v5117_v23 = vld [vmem:[%s8562_s16 + $0x2] sm:$0x3] }
 0x4e3   : > { %v8125_v62 = vpack.c.bf16 %v5083_v6, %v5082_v20  ;;  %v8157_v44 = vpack.c.bf16 %v5115_v53, %v5114_v25 }
 0x4e4   : > { %v8121_v50 = vpack.c.bf16 %v5081_v29, %v5080_v12  ;;  %v8153_v45 = vpack.c.bf16 %v5113_v11, %v5112_v35  ;;  %v5122_v35 = vld [vmem:[%s8562_s16 + $0xc] sm:$0x3]  ;;  %v5123_v29 = vld [vmem:[%s8562_s16 + $0xe] sm:$0x3] }
 0x4e8   : > { %8112 = vmatpush3.bf16.xpose.msra.mxu0 %v11221_v21  ;;  %8144 = vmatpush3.bf16.xpose.msra.mxu1 %v11223_v52  ;;  %v5710_v21 = vunpack.c.l.s4 %v8411_v63  ;;  %v5712_v52 = vlaneseq }
 0x4e9   : > { %8114 = vmatprep.subr.bf16.mxu0 %v8113_v46  ;;  %8146 = vmatprep.subr.bf16.mxu1 %v8145_v41 }
 0x4ea   : > { %v5711_v59 = vunpack.c.0.s8 %v5710_v21  ;;  %v5713_v37 = vshrl.u32 %v5712_v52, 7  ;;  %vm11333_vm5 = vcmp.lt.s32.totalorder %v5712_v52, 256 }
 0x4f0   : > { %8116 = vmatpush3.bf16.xpose.msra.mxu0 %v11245_v16  ;;  %8148 = vmatpush3.bf16.xpose.msra.mxu1 %v11247_v18  ;;  %v11325_v16 = vsub.s32 %v5711_v59, %v5713_v37 }
 0x4f1   : > { %8118 = vmatprep.subr.bf16.mxu0 %v8117_v7  ;;  %8150 = vmatprep.subr.bf16.mxu1 %v8149_v40 }
 0x4f8   : > { %8120 = vmatpush3.bf16.xpose.msra.mxu0 %v11241_v34  ;;  %8152 = vmatpush3.bf16.xpose.msra.mxu1 %v11243_v27 }
 0x4f9   : > { %8122 = vmatprep.subr.bf16.mxu0 %v8121_v50  ;;  %8154 = vmatprep.subr.bf16.mxu1 %v8153_v45 }
 0x500   : > { %8124 = vmatpush3.bf16.xpose.msra.mxu0 %v11265_v32  ;;  %8156 = vmatpush3.bf16.xpose.msra.mxu1 %v11267_v54 }
 0x501   : > { %8126 = vmatprep.subr.bf16.mxu0 %v8125_v62  ;;  %8158 = vmatprep.subr.bf16.mxu1 %v8157_v44 }
 0x508   : > { %8128 = vmatpush3.bf16.xpose.msra.mxu0 %v11261_v3  ;;  %8160 = vmatpush3.bf16.xpose.msra.mxu1 %v11263_v5 }
 0x50f   : > { %6894 = vmatmul.mubr.f32.vlgmr.msra.gmra.mrb[70].mxu0 %v11646_v4  ;;  %6928 = vmatmul.mubr.f32.vlgmr.msra.gmra.mrb[70].mxu1 %v11646_v4 }
 0x522   : > { %v5190_v34 = vpop.f32.mrb[64].mxu0  ;;  %v5261_v27 = vpop.f32.mrb[64].mxu1 }
 0x523   : > { %v5192_v18 = vpop.f32.mrb[65].mxu0  ;;  %v5263_v3 = vpop.f32.mrb[65].mxu1 }
 0x524   : > { %v5708_v5 = vcombine.low %v5190_v34, %v5192_v18  ;;  %v5723_v32 = vcombine.low %v5261_v27, %v5263_v3 }
 0x526   : > { %v5715_v54 = vrot.slane %v5708_v5, %v11325_v16  ;;  %v5730_v4 = vrot.slane %v5723_v32, %v11325_v16 }
 0x528   : > { %v5722_v31 = vrot.slane %v5715_v54, %v11325_v16  ;;  %v5737_v43 = vrot.slane %v5730_v4, %v11325_v16 }
 0x52a   : > { %v5836_v51 = vadd.f32 %v5722_v31, %v5116_v49  ;;  %v5837_v26 = vadd.f32 %v5737_v43, %v5117_v23 }
 0x52c   : > { %5848 = vst.msk [vmem:[%s8562_s16] sm:$0x3] %vm11333_vm5, %v5836_v51  ;;  %5849 = vst.msk [vmem:[%s8562_s16 + $0x2] sm:$0x3] %vm11333_vm5, %v5837_v26 }
 0x562   : > { %v5332_v14 = vpop.f32.mrb[66].mxu0  ;;  %v5403_v17 = vpop.f32.mrb[66].mxu1 }
 0x563   : > { %v5334_v60 = vpop.f32.mrb[67].mxu0  ;;  %v5405_v28 = vpop.f32.mrb[67].mxu1 }
 0x564   : > { %v5738_v48 = vcombine.low %v5332_v14, %v5334_v60  ;;  %v5753_v10 = vcombine.low %v5403_v17, %v5405_v28 }
 0x566   : > { %v5745_v15 = vrot.slane %v5738_v48, %v11325_v16  ;;  %v5760_v47 = vrot.slane %v5753_v10, %v11325_v16 }
 0x568   : > { %v5752_v13 = vrot.slane %v5745_v15, %v11325_v16  ;;  %v5767_v7 = vrot.slane %v5760_v47, %v11325_v16 }
 0x56a   : > { %v5838_v40 = vadd.f32 %v5752_v13, %v5118_v22  ;;  %v5839_v46 = vadd.f32 %v5767_v7, %v5119_v42 }
 0x56c   : > { %5850 = vst.msk [vmem:[%s8562_s16 + $0x4] sm:$0x3] %vm11333_vm5, %v5838_v40  ;;  %5851 = vst.msk [vmem:[%s8562_s16 + $0x6] sm:$0x3] %vm11333_vm5, %v5839_v46 }
 0x5a2   : > { %v5474_v41 = vpop.f32.mrb[68].mxu0  ;;  %v5545_v2 = vpop.f32.mrb[68].mxu1 }
 0x5a3   : > { %v5476_v58 = vpop.f32.mrb[69].mxu0  ;;  %v5547_v38 = vpop.f32.mrb[69].mxu1 }
 0x5a4   : > { %v5768_v61 = vcombine.low %v5474_v41, %v5476_v58  ;;  %v5783_v8 = vcombine.low %v5545_v2, %v5547_v38 }
 0x5a6   : > { %v5775_v0 = vrot.slane %v5768_v61, %v11325_v16  ;;  %v5790_v57 = vrot.slane %v5783_v8, %v11325_v16 }
 0x5a8   : > { %v5782_v39 = vrot.slane %v5775_v0, %v11325_v16  ;;  %v5797_v36 = vrot.slane %v5790_v57, %v11325_v16 }
 0x5aa   : > { %v5840_v33 = vadd.f32 %v5782_v39, %v5120_v30  ;;  %v5841_v19 = vadd.f32 %v5797_v36, %v5121_v1 }
 0x5ac   : > { %5852 = vst.msk [vmem:[%s8562_s16 + $0x8] sm:$0x3] %vm11333_vm5, %v5840_v33  ;;  %5853 = vst.msk [vmem:[%s8562_s16 + $0xa] sm:$0x3] %vm11333_vm5, %v5841_v19 }
 0x5e2   : > { %v5616_v24 = vpop.f32.mrb[70].mxu0  ;;  %v5687_v55 = vpop.f32.mrb[70].mxu1 }
 0x5e3   : > { %v5618_v56 = vpop.f32.mrb[71].mxu0  ;;  %v5689_v20 = vpop.f32.mrb[71].mxu1 }
 0x5e4   : > { %v5798_v25 = vcombine.low %v5616_v24, %v5618_v56  ;;  %v5813_v6 = vcombine.low %v5687_v55, %v5689_v20 }
 0x5e6   : > { %v5805_v53 = vrot.slane %v5798_v25, %v11325_v16  ;;  %v5820_v12 = vrot.slane %v5813_v6, %v11325_v16 }
 0x5e8   : > { %v5812_v11 = vrot.slane %v5805_v53, %v11325_v16  ;;  %v5827_v62 = vrot.slane %v5820_v12, %v11325_v16 }
 0x5ea   : > { %v5842_v44 = vadd.f32 %v5812_v11, %v5122_v35  ;;  %v5843_v50 = vadd.f32 %v5827_v62, %v5123_v29 }
 0x5ec   : > { %5854 = vst.msk [vmem:[%s8562_s16 + $0xc] sm:$0x3] %vm11333_vm5, %v5842_v44  ;;  %5855 = vst.msk [vmem:[%s8562_s16 + $0xe] sm:$0x3] %vm11333_vm5, %v5843_v50 }
 0x5ed   : > { %8308 = shalt.err (!%p8305_p11)
}
 0x5ee   : > { %s8309_s14 = scalar_lea.hbm %s11378_s27, 256  ;;  %s8313_s13 = scalar_lea.hbm %s11455_s7, 512 }
 0x5ef   : > { %p8310_p13 = scmp.ne.s32.totalorder %s11378_s27, %s8309_s14  ;;  %p8314_p2 = scmp.lt.u32.totalorder %s11378_s27, %s11455_s7 }
 0x5f0   : > { %p8315_p3 = scmp.lt.u32.totalorder %s8313_s13, %s8309_s14  ;;  %p8317_p5 = scmp.lt.u32.totalorder %s8309_s14, %s11378_s27 }
 0x5f1   : > { %p8311_p0 = pnand %p8310_p13, %p8527_p7 }
 0x5f2   : > { %p8316_p4 = por %p8315_p3, %p8314_p2 }
 0x5f3   : > { %p8312_p1 = pneg %p8311_p0 }
 0x5f4   : > { %p8318_p6 = por %p8317_p5, %p8316_p4 }
 0x5f6   : > { %p8319_p8 = pnand %p8318_p6, %p8312_p1 }
 0x5f8   : > { %8322 = shalt.err (!%p8319_p8)
}
 0x5f9   : > { %s8413_s29 = smov 32   ;;  %s8414_s20 = smov 2  }
 0x5fa   : > { %8161 = dma.vmem_to_hbm [thread:$0]  (%p8527_p7), %s11380_s17, 256, %s11378_s27, %s11390_s30, %s8413_s29, %s8413_s29, %s8414_s20  }
 0x5fb PF: > { %p8167_p9 = scmp.ge.s32.totalorder %s8405_s10, 2  ;;  %s5886_s18 = sand.u32 1, %s8369_s24  }
 0x5fc   : > { %s5887_s14 = scalar_lea.sflag [#allocation4], %s5886_s18 }
 0x5fd   : > { %p8164_p10 = pnand %p8167_p9, %p8535_p12 }
 0x5ff   : > { %8364 = dma.done.wait (!%p8164_p10), %s5887_s14, 256  }
 0x600   : > { %8366 = vsyncadd (!%p8164_p10), %s5887_s14, 4294967040  ;;  %s20_s10 = sadd.s32 1, %s8405_s10   ;;  %s11675_s19 = sld [smem:[#allocation6_spill]] }
 0x601   : > { %p17_p11 = scmp.ge.s32.totalorder %s20_s10, 6   ;;  %s11676_s17 = sld [smem:[#allocation7_spill]] }
 0x602   : > { %s11677_s24 = smov %s8373_s25  ;;  %s11678_s25 = smov %s8377_s26 }
 0x603   : > { %s11679_s26 = smov %s8540_s23  ;;  %s11680_s27 = smov %s8385_s28 }
 0x604   : > { %s11681_s28 = smov %s8543_s11  ;;  %s11682_s29 = smov %s8397_s8 }
 0x605   : > { %s11683_s30 = smov %s8401_s9  ;;  %19 = sbr.rel (!%p17_p11) target bundleno = 6 (0x6), region = 133 }
 0x606   : > { %s11684_s8 = smov %s11675_s19 }
 0x607   : > { %s11685_s9 = smov %s11676_s17 }
 0x60c   :  { %5892 = vsyncpa [#allocation4], 1 }
 0x60d   :  { %5894 = vsyncpa [#allocation4 + $0x1], 1 }

</bundles_post_ra>
